<compile_context>
chip_gen: v5e
topology: v5e:2x2
jax: 0.10.0
libtpu: 0.0.40
codegen_flags: <defaults>
</compile_context>

<pallas_src>
import functools

import numpy as np

import jax
import jax.numpy as jnp
from jax.experimental import pallas as pl
from jax.experimental.pallas import tpu as pltpu

_VMEM_LIMIT = 32 * 1024 * 1024


# ----------------------------------------------------------------------------
# helpers
# ----------------------------------------------------------------------------
def _shift_cols(x, s):
    """y[:, j] = x[:, j + s] (zero fill out of range).  s is a static int."""
    rows, L = x.shape
    if s == 0:
        return x
    if s > 0:
        return jnp.concatenate(
            [x[:, s:], jnp.zeros((rows, s), x.dtype)], axis=1)
    return jnp.concatenate(
        [jnp.zeros((rows, -s), x.dtype), x[:, :L + s]], axis=1)


# ----------------------------------------------------------------------------
# Kernel 1: dilated 3x3 conv + InstanceNorm2d + PReLU on the flattened,
# padded skip buffer.  Writes its output in-place into the skip buffer's
# channel slice (input_output_aliases).
#   s_ref : (1, Cin, L)   flat padded skip (Cin = C*(layer+1)), L = D1p*D2p
#   w_ref : (9, Cout, Cin) taps ordered kt*3 + kf (kt = dilated D1 axis)
#   b_ref : (Cout, 1)      conv bias
#   a_ref : (Cout, 1)      PReLU slope
#   m_ref : (1, L)         validity mask of the interior region
#   o_ref : (1, Cout, L)   channel slice (layer+1) of the skip buffer
# ----------------------------------------------------------------------------
def _dense_conv_kernel(s_ref, w_ref, b_ref, a_ref, m_ref, o_ref, *,
                       dil, d2p, p1lo, c0, n_valid):
    x = s_ref[0]                                      # (Cin, L)
    mask = m_ref[...]                                 # (1, L)
    cout = w_ref.shape[1]
    L = x.shape[-1]

    acc = jnp.zeros((cout, L), jnp.float32)
    for kt in range(3):
        for kf in range(3):
            s = (kt * dil - p1lo) * d2p + (kf - c0)
            acc = acc + jnp.dot(w_ref[kt * 3 + kf], _shift_cols(x, s),
                                preferred_element_type=jnp.float32)
    acc = acc + b_ref[...]

    # InstanceNorm2d (affine=False, eps=1e-5): per-channel stats over the
    # valid (D1, D2) interior only.
    inv_n = 1.0 / n_valid
    am = acc * mask
    mean = jnp.sum(am, axis=1, keepdims=True) * inv_n
    d = acc - mean
    var = jnp.sum(d * d * mask, axis=1, keepdims=True) * inv_n
    y = d * jax.lax.rsqrt(var + 1e-5)
    # PReLU (per output channel)
    y = jnp.where(y >= 0, y, a_ref[...] * y)
    # keep the padding region of the skip buffer exactly zero
    o_ref[0] = (y * mask).astype(o_ref.dtype)


def _dense_layer_call(S, w9, b, alpha, mask, *, layer, C, cin, L,
                      dil, d2p, p1lo, c0, n_valid):
    B = S.shape[0]
    kernel = functools.partial(_dense_conv_kernel, dil=dil, d2p=d2p,
                               p1lo=p1lo, c0=c0, n_valid=n_valid)
    return pl.pallas_call(
        kernel,
        out_shape=jax.ShapeDtypeStruct(S.shape, S.dtype),
        grid=(B,),
        in_specs=[
            pl.BlockSpec((1, cin, L), lambda i: (i, 0, 0)),
            pl.BlockSpec((9, C, cin), lambda i: (0, 0, 0)),
            pl.BlockSpec((C, 1), lambda i: (0, 0)),
            pl.BlockSpec((C, 1), lambda i: (0, 0)),
            pl.BlockSpec((1, L), lambda i: (0, 0)),
        ],
        out_specs=pl.BlockSpec((1, C, L), lambda i: (i, layer + 1, 0)),
        input_output_aliases={0: 0},
        compiler_params=pltpu.CompilerParams(
            dimension_semantics=("parallel",),
            vmem_limit_bytes=_VMEM_LIMIT),
    )(S, w9, b.reshape(C, 1), alpha.reshape(C, 1), mask)


def densenet_unit(x, layers, *, d1_causal, d2_causal):
    """Dilated dense block on (B, C, D1, D2); kernel (3,3), dilation on D1."""
    B, C, D1, D2 = x.shape
    depth = len(layers)
    dil_max = 2 ** (depth - 1)
    D2p = D2 + 2
    D1p = D1 + 2 * dil_max
    L = D1p * D2p
    R0 = 2 * dil_max if d1_causal else dil_max        # interior row offset
    C0 = 2 if d2_causal else 1                        # interior col offset

    # one padded, flattened skip buffer; x in channel block 0.
    S = jnp.pad(x, ((0, 0), (0, C * depth),
                    (R0, D1p - D1 - R0), (C0, D2p - D2 - C0)))
    S = S.reshape(B, C * (depth + 1), L)

    rr = np.arange(L) // D2p
    cc = np.arange(L) % D2p
    m = ((rr >= R0) & (rr < R0 + D1) & (cc >= C0) & (cc < C0 + D2))
    mask = jnp.asarray(m.astype(np.float32)).reshape(1, L)

    for i, lyr in enumerate(layers):
        dil = 2 ** i
        p1lo = 2 * dil if d1_causal else dil
        cin = C * (i + 1)
        # PyTorch Cin block order is [out_{i-1}, ..., out_0, x]; the skip buffer
        # stores [x, out_0, ..., out_{i-1}]  ->  reverse the Cin blocks.
        w = lyr["w"].reshape(3, 3, C, i + 1, C)[:, :, :, ::-1, :]
        w = w.reshape(9, C, cin)
        S = _dense_layer_call(S, w, lyr["b"], lyr["alpha"], mask,
                              layer=i, C=C, cin=cin, L=L,
                              dil=dil, d2p=D2p, p1lo=p1lo, c0=C0,
                              n_valid=float(D1 * D2))

    out = S[:, C * depth:, :].reshape(B, C, D1p, D2p)
    return out[:, :, R0:R0 + D1, C0:C0 + D2]


# ----------------------------------------------------------------------------
# Kernel 2: (1, K) "same" conv along the per-frame feature axis on the
# channel-major flattened layout.  One grid step per batch element.
#   x_ref : (1, Cin, L)   L = T * stride, first `valid` cols of each frame live
#   w_ref : (K, Cout, Cin)
#   b_ref : (Cout, 1)
#   m_ref : (K, L)        per-tap gate (also kills cross-frame leakage of the
#                         flat shifts); row K//2 doubles as the output mask.
#   o_ref : (1, Cout, L)
# ----------------------------------------------------------------------------
def _convKf_flat_kernel(x_ref, w_ref, b_ref, m_ref, o_ref):
    x = x_ref[0]                                      # (Cin, L)
    m = m_ref[...]                                    # (K, L)
    K = w_ref.shape[0]
    cout = w_ref.shape[1]
    L = x.shape[-1]
    pad = K // 2

    acc = jnp.zeros((cout, L), jnp.float32)
    for k in range(K):
        acc = acc + jnp.dot(w_ref[k], _shift_cols(x, k - pad) * m[k:k + 1],
                            preferred_element_type=jnp.float32)
    acc = (acc + b_ref[...]) * m[pad:pad + 1]
    o_ref[0] = acc.astype(o_ref.dtype)


def conv1xk_flat(x, wK, b, *, stride, valid):
    """x: (B, Cin, T*stride) flat; 'same' (1, K) conv over the `valid` first
    features of every frame (frames have flat stride `stride`)."""
    B, cin, L = x.shape
    K, cout, _ = wK.shape
    pad = K // 2
    pos = np.arange(L) % stride
    masks = np.stack(
        [((pos + k - pad >= 0) & (pos + k - pad < valid)) for k in range(K)]
    ).astype(np.float32)
    return pl.pallas_call(
        _convKf_flat_kernel,
        out_shape=jax.ShapeDtypeStruct((B, cout, L), x.dtype),
        grid=(B,),
        in_specs=[
            pl.BlockSpec((1, cin, L), lambda i: (i, 0, 0)),
            pl.BlockSpec((K, cout, cin), lambda i: (0, 0, 0)),
            pl.BlockSpec((cout, 1), lambda i: (0, 0)),
            pl.BlockSpec((K, L), lambda i: (0, 0)),
        ],
        out_specs=pl.BlockSpec((1, cout, L), lambda i: (i, 0, 0)),
        compiler_params=pltpu.CompilerParams(
            dimension_semantics=("parallel",),
            vmem_limit_bytes=_VMEM_LIMIT),
    )(x, wK, b.reshape(cout, 1), jnp.asarray(masks))


# ----------------------------------------------------------------------------
# Kernel 3: fused [LayerNorm(F_in)+PReLU] -> Conv(1,2) -> [LayerNorm(F_in-1)
# + PReLU] on the flat layout (one grid step per batch element).
# Per-frame LN statistics are computed with two tiny segment-indicator
# matmuls (C, L)@(L, T) and (C, T)@(T, L) -- no in-kernel reshapes.
#   x_ref   : (1, C, L)    L = T * f_in, all f_in cols of each frame valid
#   g1/b1   : (1, L)       LN1 gamma/beta pre-tiled per frame
#   a1      : (C, 1)       PReLU slopes
#   w_ref   : (2, C, C)    Conv(1,2) taps
#   bc_ref  : (C, 1)
#   g2/b2   : (1, L)       LN2 gamma/beta pre-tiled (zero on the dead column)
#   a2      : (C, 1)
#   A  / At : (L, T) / (T, L) segment sum / broadcast indicator matrices
#   mo_ref  : (1, L)       valid-output mask (first f_in-1 cols of each frame)
#   o_ref   : (1, C, L)    output at frame stride f_in (last col zero)
# ----------------------------------------------------------------------------
def _lnp_conv2_lnp_flat_kernel(x_ref, g1_ref, b1_ref, a1_ref, w_ref, bc_ref,
                               g2_ref, b2_ref, a2_ref, asum_ref, abc_ref,
                               mo_ref, o_ref, *, f_in):
    x = x_ref[0].astype(jnp.float32)                  # (C, L)
    A = asum_ref[...]                                 # (L, T)
    At = abc_ref[...]                                 # (T, L)
    m_out = mo_ref[...]                               # (1, L)
    f_out = f_in - 1

    def seg_mean(v, count):
        s = jnp.dot(v, A, preferred_element_type=jnp.float32)       # (C, T)
        return jnp.dot(s, At,
                       preferred_element_type=jnp.float32) * (1.0 / count)

    # LayerNorm over f_in per (channel, frame) + PReLU
    mu1 = seg_mean(x, f_in)
    d1 = x - mu1
    var1 = seg_mean(d1 * d1, f_in)
    z = d1 * jax.lax.rsqrt(var1 + 1e-5)
    z = z * g1_ref[...] + b1_ref[...]
    z = jnp.where(z >= 0, z, a1_ref[...] * z)

    # Conv2d(C, C, (1,2)), no padding (valid output cols gated by m_out)
    y = jnp.dot(w_ref[0], z, preferred_element_type=jnp.float32)
    y = y + jnp.dot(w_ref[1], _shift_cols(z, 1),
                    preferred_element_type=jnp.float32)
    y = (y + bc_ref[...]) * m_out

    # LayerNorm over f_in-1 valid cols + PReLU
    mu2 = seg_mean(y, f_out)
    d2 = (y - mu2) * m_out
    var2 = seg_mean(d2 * d2, f_out)
    y2 = d2 * jax.lax.rsqrt(var2 + 1e-5)
    y2 = y2 * g2_ref[...] + b2_ref[...]
    y2 = jnp.where(y2 >= 0, y2, a2_ref[...] * y2)
    o_ref[0] = (y2 * m_out).astype(o_ref.dtype)


def lnp_conv2_lnp_flat(z, p, *, f_in, nseg):
    B, C, L = z.shape
    f_out = f_in - 1
    pos = np.arange(L) % f_in
    seg = np.arange(L) // f_in
    A = (seg[:, None] == np.arange(nseg)[None, :]).astype(np.float32)  # (L,T)
    m_out = (pos < f_out).astype(np.float32)[None, :]

    g1 = jnp.tile(p["ln1_g"].reshape(1, f_in), (1, nseg))
    b1 = jnp.tile(p["ln1_b"].reshape(1, f_in), (1, nseg))
    g2 = jnp.tile(jnp.pad(p["ln2_g"], (0, 1)).reshape(1, f_in), (1, nseg))
    b2 = jnp.tile(jnp.pad(p["ln2_b"], (0, 1)).reshape(1, f_in), (1, nseg))

    return pl.pallas_call(
        functools.partial(_lnp_conv2_lnp_flat_kernel, f_in=f_in),
        out_shape=jax.ShapeDtypeStruct((B, C, L), z.dtype),
        grid=(B,),
        in_specs=[
            pl.BlockSpec((1, C, L), lambda i: (i, 0, 0)),
            pl.BlockSpec((1, L), lambda i: (0, 0)),
            pl.BlockSpec((1, L), lambda i: (0, 0)),
            pl.BlockSpec((C, 1), lambda i: (0, 0)),
            pl.BlockSpec((2, C, C), lambda i: (0, 0, 0)),
            pl.BlockSpec((C, 1), lambda i: (0, 0)),
            pl.BlockSpec((1, L), lambda i: (0, 0)),
            pl.BlockSpec((1, L), lambda i: (0, 0)),
            pl.BlockSpec((C, 1), lambda i: (0, 0)),
            pl.BlockSpec((L, nseg), lambda i: (0, 0)),
            pl.BlockSpec((nseg, L), lambda i: (0, 0)),
            pl.BlockSpec((1, L), lambda i: (0, 0)),
        ],
        out_specs=pl.BlockSpec((1, C, L), lambda i: (i, 0, 0)),
        compiler_params=pltpu.CompilerParams(
            dimension_semantics=("parallel",),
            vmem_limit_bytes=_VMEM_LIMIT),
    )(z, g1, b1, p["alpha1"].reshape(C, 1),
      p["c2_w"], p["c2_b"].reshape(C, 1),
      g2, b2, p["alpha2"].reshape(C, 1),
      jnp.asarray(A), jnp.asarray(A.T.copy()), jnp.asarray(m_out))


# ----------------------------------------------------------------------------
# Module forward (thin glue, heavy work in the kernels above)
# ----------------------------------------------------------------------------
def _sp_rearrange_r2(y, *, C, T, stride, valid):
    """einops 'b (r c) t f -> b c t (f r)', r=2, on the flat layout."""
    B = y.shape[0]
    y5 = y.reshape(B, 2, C, T, stride)[..., :valid]
    z = jnp.transpose(y5, (0, 2, 3, 4, 1))            # (B, C, T, valid, 2)
    return z.reshape(B, C, T * valid * 2)


def dec_conv_block(x, p, *, C, T, stride, valid):
    """SPConvTranspose2d(r=2) -> LN -> PReLU -> Conv(1,2) -> LN -> PReLU.

    x: (B, C, T*stride) flat with `valid` live cols/frame.
    Returns (flat output at stride 2*valid, new stride, new valid).
    """
    y = conv1xk_flat(x, p["sp_w"], p["sp_b"], stride=stride, valid=valid)
    z = _sp_rearrange_r2(y, C=C, T=T, stride=stride, valid=valid)
    z = lnp_conv2_lnp_flat(z, p, f_in=2 * valid, nseg=T)
    return z, 2 * valid, 2 * valid - 1


def dense_decoder_2_forward(x, params):
    """x: (B, C, T, F) NCHW, as in the PyTorch module."""
    B, C, T, F = x.shape
    # DenseNetRes: f_unit on (B, C, F, T) with causal=(False, True)
    xf = jnp.transpose(x, (0, 1, 3, 2))
    xf = densenet_unit(xf, params["f_unit"], d1_causal=False, d2_causal=True)
    xt = jnp.transpose(xf, (0, 1, 3, 2))
    # t_unit on (B, C, T, F) with causal=(True, False)
    xt = densenet_unit(xt, params["t_unit"], d1_causal=True, d2_causal=False)

    # decoder runs on the channel-major flattened layout (B, C, T*F)
    h = xt.reshape(B, C, T * F)
    h, s1, v1 = dec_conv_block(h, params["dec1"], C=C, T=T, stride=F, valid=F)
    h, s2, v2 = dec_conv_block(h, params["dec2"], C=C, T=T, stride=s1, valid=v1)

    # out_conv: Conv2d(C, out_ch, (1,5), padding=(0,2))
    y = conv1xk_flat(h, params["out_w"], params["out_b"], stride=s2, valid=v2)
    out_ch = params["out_w"].shape[1]
    return y.reshape(B, out_ch, T, s2)[..., :v2]      # NCHW (B, out_ch, T, 4F-3)


# ----------------------------------------------------------------------------
# Deterministic synthetic parameters (shapes follow the PyTorch __init__).
# Conv weights are stored as (kH, kW, Cout, Cin) / (kW, Cout, Cin), i.e. the
# PyTorch (Cout, Cin, kH, kW) weight transposed; DenseNet Cin blocks follow the
# PyTorch concat order [out_{i-1}, ..., out_0, x].
# ----------------------------------------------------------------------------
def init_params(key, C, out_ch, feat, depth):
    keys = iter(jax.random.split(key, 512))

    def nrm(shape, scale=0.1):
        return scale * jax.random.normal(next(keys), shape, jnp.float32)

    p = {}
    for unit in ("f_unit", "t_unit"):
        layers = []
        for i in range(depth):
            cin = C * (i + 1)
            layers.append(dict(
                w=nrm((3, 3, C, cin)),
                b=nrm((C,)),
                alpha=0.25 + nrm((C,), 0.01),
            ))
        p[unit] = layers

    def dec_params(f_in):
        f2 = 2 * f_in
        return dict(
            sp_w=nrm((3, 2 * C, C)),
            sp_b=nrm((2 * C,)),
            ln1_g=1.0 + nrm((f2,)),
            ln1_b=nrm((f2,)),
            alpha1=0.25 + nrm((C,), 0.01),
            c2_w=nrm((2, C, C)),
            c2_b=nrm((C,)),
            ln2_g=1.0 + nrm((f2 - 1,)),
            ln2_b=nrm((f2 - 1,)),
            alpha2=0.25 + nrm((C,), 0.01),
        )

    p["dec1"] = dec_params(feat)
    p["dec2"] = dec_params(feat * 2 - 1)
    p["out_w"] = nrm((5, out_ch, C))
    p["out_b"] = nrm((out_ch,))
    return p


if __name__ == "__main__":
    B, C, T, F = 2, 8, 8, 8          # batch, in_channels, time, feature_size
    out_channels = 1
    depth = 2                        # small depth for the small test config

    key = jax.random.PRNGKey(0)
    kx, kp = jax.random.split(key)
    x = jax.random.normal(kx, (B, C, T, F), jnp.float32)   # PyTorch NCHW input
    params = init_params(kp, C, out_channels, F, depth)

    fwd = jax.jit(dense_decoder_2_forward)
    y = jax.block_until_ready(fwd(x, params))

    expected_f = (2 * F - 1) * 2 - 1
    assert y.shape == (B, out_channels, T, expected_f), y.shape
    assert bool(jnp.all(jnp.isfinite(y)))
    print("KERNEL_OK")
</pallas_src>

<mosaic_0001>
module attributes {stable_mosaic.version = 11 : i64} {
  func.func @_dense_conv_kernel(%arg0: i32, %arg1: memref<1x8x120xf32, #tpu.memory_space<vmem>>, %arg2: memref<9x8x8xf32, #tpu.memory_space<vmem>>, %arg3: memref<8x1xf32, #tpu.memory_space<vmem>>, %arg4: memref<8x1xf32, #tpu.memory_space<vmem>>, %arg5: memref<1x120xf32, #tpu.memory_space<vmem>>, %arg6: memref<1x8x120xf32, #tpu.memory_space<vmem>>) attributes {dimension_semantics = [#tpu.dimension_semantics<parallel>], iteration_bounds = array<i64: 2>, scalar_prefetch = 0 : i64, scratch_operands = 0 : i64, tpu.core_type = #tpu.core_type<tc>, window_params = [{transform_indices = @transform_0, window_bounds = array<i64: 1, 8, 120>}, {pipeline_mode = #tpu.pipeline_mode<synchronous>, transform_indices = @transform_1, window_bounds = array<i64: 9, 8, 8>}, {pipeline_mode = #tpu.pipeline_mode<synchronous>, transform_indices = @transform_2, window_bounds = array<i64: 8, 1>}, {pipeline_mode = #tpu.pipeline_mode<synchronous>, transform_indices = @transform_3, window_bounds = array<i64: 8, 1>}, {pipeline_mode = #tpu.pipeline_mode<synchronous>, transform_indices = @transform_4, window_bounds = array<i64: 1, 120>}, {transform_indices = @transform_5, window_bounds = array<i64: 1, 8, 120>}]} {
    %c0 = arith.constant 0 : index
    %c0_0 = arith.constant 0 : index
    %c0_1 = arith.constant 0 : index
    %0 = vector.load %arg1[%c0, %c0_0, %c0_1] : memref<1x8x120xf32, #tpu.memory_space<vmem>>, vector<1x8x120xf32>
    %1 = vector.shape_cast %0 : vector<1x8x120xf32> to vector<8x120xf32>
    %c0_2 = arith.constant 0 : index
    %c0_3 = arith.constant 0 : index
    %2 = vector.load %arg5[%c0_2, %c0_3] : memref<1x120xf32, #tpu.memory_space<vmem>>, vector<1x120xf32>
    %cst = arith.constant 0.000000e+00 : f32
    %3 = vector.broadcast %cst : f32 to vector<8x120xf32>
    %c0_4 = arith.constant 0 : index
    %c0_5 = arith.constant 0 : index
    %c0_6 = arith.constant 0 : index
    %4 = vector.load %arg2[%c0_4, %c0_5, %c0_6] : memref<9x8x8xf32, #tpu.memory_space<vmem>>, vector<1x8x8xf32>
    %5 = vector.shape_cast %4 : vector<1x8x8xf32> to vector<8x8xf32>
    %cst_7 = arith.constant 0.000000e+00 : f32
    %6 = vector.broadcast %cst_7 : f32 to vector<8x12xf32>
    %7 = vector.extract_strided_slice %1 {offsets = [0, 0], sizes = [8, 108], strides = [1, 1]} : vector<8x120xf32> to vector<8x108xf32>
    %8 = tpu.concatenate %6, %7 in 1 : vector<8x12xf32>, vector<8x108xf32> -> vector<8x120xf32>
    %cst_8 = arith.constant dense<0.000000e+00> : vector<8x120xf32>
    %9 = tpu.matmul %5, %8, %cst_8 {dimension_numbers = #tpu.dot_dimension_numbers<[1], [0], [0], [1], [0, 0, 1, 1], [], []>} : vector<8x8xf32>, vector<8x120xf32>, vector<8x120xf32> -> vector<8x120xf32>
    %10 = arith.addf %3, %9 : vector<8x120xf32>
    %c1 = arith.constant 1 : index
    %c0_9 = arith.constant 0 : index
    %c0_10 = arith.constant 0 : index
    %11 = vector.load %arg2[%c1, %c0_9, %c0_10] : memref<9x8x8xf32, #tpu.memory_space<vmem>>, vector<1x8x8xf32>
    %12 = vector.shape_cast %11 : vector<1x8x8xf32> to vector<8x8xf32>
    %cst_11 = arith.constant 0.000000e+00 : f32
    %13 = vector.broadcast %cst_11 : f32 to vector<8x11xf32>
    %14 = vector.extract_strided_slice %1 {offsets = [0, 0], sizes = [8, 109], strides = [1, 1]} : vector<8x120xf32> to vector<8x109xf32>
    %15 = tpu.concatenate %13, %14 in 1 : vector<8x11xf32>, vector<8x109xf32> -> vector<8x120xf32>
    %cst_12 = arith.constant dense<0.000000e+00> : vector<8x120xf32>
    %16 = tpu.matmul %12, %15, %cst_12 {dimension_numbers = #tpu.dot_dimension_numbers<[1], [0], [0], [1], [0, 0, 1, 1], [], []>} : vector<8x8xf32>, vector<8x120xf32>, vector<8x120xf32> -> vector<8x120xf32>
    %17 = arith.addf %10, %16 : vector<8x120xf32>
    %c2 = arith.constant 2 : index
    %c0_13 = arith.constant 0 : index
    %c0_14 = arith.constant 0 : index
    %18 = vector.load %arg2[%c2, %c0_13, %c0_14] : memref<9x8x8xf32, #tpu.memory_space<vmem>>, vector<1x8x8xf32>
    %19 = vector.shape_cast %18 : vector<1x8x8xf32> to vector<8x8xf32>
    %cst_15 = arith.constant 0.000000e+00 : f32
    %20 = vector.broadcast %cst_15 : f32 to vector<8x10xf32>
    %21 = vector.extract_strided_slice %1 {offsets = [0, 0], sizes = [8, 110], strides = [1, 1]} : vector<8x120xf32> to vector<8x110xf32>
    %22 = tpu.concatenate %20, %21 in 1 : vector<8x10xf32>, vector<8x110xf32> -> vector<8x120xf32>
    %cst_16 = arith.constant dense<0.000000e+00> : vector<8x120xf32>
    %23 = tpu.matmul %19, %22, %cst_16 {dimension_numbers = #tpu.dot_dimension_numbers<[1], [0], [0], [1], [0, 0, 1, 1], [], []>} : vector<8x8xf32>, vector<8x120xf32>, vector<8x120xf32> -> vector<8x120xf32>
    %24 = arith.addf %17, %23 : vector<8x120xf32>
    %c3 = arith.constant 3 : index
    %c0_17 = arith.constant 0 : index
    %c0_18 = arith.constant 0 : index
    %25 = vector.load %arg2[%c3, %c0_17, %c0_18] : memref<9x8x8xf32, #tpu.memory_space<vmem>>, vector<1x8x8xf32>
    %26 = vector.shape_cast %25 : vector<1x8x8xf32> to vector<8x8xf32>
    %cst_19 = arith.constant 0.000000e+00 : f32
    %27 = vector.broadcast %cst_19 : f32 to vector<8x2xf32>
    %28 = vector.extract_strided_slice %1 {offsets = [0, 0], sizes = [8, 118], strides = [1, 1]} : vector<8x120xf32> to vector<8x118xf32>
    %29 = tpu.concatenate %27, %28 in 1 : vector<8x2xf32>, vector<8x118xf32> -> vector<8x120xf32>
    %cst_20 = arith.constant dense<0.000000e+00> : vector<8x120xf32>
    %30 = tpu.matmul %26, %29, %cst_20 {dimension_numbers = #tpu.dot_dimension_numbers<[1], [0], [0], [1], [0, 0, 1, 1], [], []>} : vector<8x8xf32>, vector<8x120xf32>, vector<8x120xf32> -> vector<8x120xf32>
    %31 = arith.addf %24, %30 : vector<8x120xf32>
    %c4 = arith.constant 4 : index
    %c0_21 = arith.constant 0 : index
    %c0_22 = arith.constant 0 : index
    %32 = vector.load %arg2[%c4, %c0_21, %c0_22] : memref<9x8x8xf32, #tpu.memory_space<vmem>>, vector<1x8x8xf32>
    %33 = vector.shape_cast %32 : vector<1x8x8xf32> to vector<8x8xf32>
    %cst_23 = arith.constant 0.000000e+00 : f32
    %34 = vector.broadcast %cst_23 : f32 to vector<8x1xf32>
    %35 = vector.extract_strided_slice %1 {offsets = [0, 0], sizes = [8, 119], strides = [1, 1]} : vector<8x120xf32> to vector<8x119xf32>
    %36 = tpu.concatenate %34, %35 in 1 : vector<8x1xf32>, vector<8x119xf32> -> vector<8x120xf32>
    %cst_24 = arith.constant dense<0.000000e+00> : vector<8x120xf32>
    %37 = tpu.matmul %33, %36, %cst_24 {dimension_numbers = #tpu.dot_dimension_numbers<[1], [0], [0], [1], [0, 0, 1, 1], [], []>} : vector<8x8xf32>, vector<8x120xf32>, vector<8x120xf32> -> vector<8x120xf32>
    %38 = arith.addf %31, %37 : vector<8x120xf32>
    %c5 = arith.constant 5 : index
    %c0_25 = arith.constant 0 : index
    %c0_26 = arith.constant 0 : index
    %39 = vector.load %arg2[%c5, %c0_25, %c0_26] : memref<9x8x8xf32, #tpu.memory_space<vmem>>, vector<1x8x8xf32>
    %40 = vector.shape_cast %39 : vector<1x8x8xf32> to vector<8x8xf32>
    %cst_27 = arith.constant dense<0.000000e+00> : vector<8x120xf32>
    %41 = tpu.matmul %40, %1, %cst_27 {dimension_numbers = #tpu.dot_dimension_numbers<[1], [0], [0], [1], [0, 0, 1, 1], [], []>} : vector<8x8xf32>, vector<8x120xf32>, vector<8x120xf32> -> vector<8x120xf32>
    %42 = arith.addf %38, %41 : vector<8x120xf32>
    %c6 = arith.constant 6 : index
    %c0_28 = arith.constant 0 : index
    %c0_29 = arith.constant 0 : index
    %43 = vector.load %arg2[%c6, %c0_28, %c0_29] : memref<9x8x8xf32, #tpu.memory_space<vmem>>, vector<1x8x8xf32>
    %44 = vector.shape_cast %43 : vector<1x8x8xf32> to vector<8x8xf32>
    %45 = vector.extract_strided_slice %1 {offsets = [0, 8], sizes = [8, 112], strides = [1, 1]} : vector<8x120xf32> to vector<8x112xf32>
    %cst_30 = arith.constant 0.000000e+00 : f32
    %46 = vector.broadcast %cst_30 : f32 to vector<8x8xf32>
    %47 = tpu.concatenate %45, %46 in 1 : vector<8x112xf32>, vector<8x8xf32> -> vector<8x120xf32>
    %cst_31 = arith.constant dense<0.000000e+00> : vector<8x120xf32>
    %48 = tpu.matmul %44, %47, %cst_31 {dimension_numbers = #tpu.dot_dimension_numbers<[1], [0], [0], [1], [0, 0, 1, 1], [], []>} : vector<8x8xf32>, vector<8x120xf32>, vector<8x120xf32> -> vector<8x120xf32>
    %49 = arith.addf %42, %48 : vector<8x120xf32>
    %c7 = arith.constant 7 : index
    %c0_32 = arith.constant 0 : index
    %c0_33 = arith.constant 0 : index
    %50 = vector.load %arg2[%c7, %c0_32, %c0_33] : memref<9x8x8xf32, #tpu.memory_space<vmem>>, vector<1x8x8xf32>
    %51 = vector.shape_cast %50 : vector<1x8x8xf32> to vector<8x8xf32>
    %52 = vector.extract_strided_slice %1 {offsets = [0, 9], sizes = [8, 111], strides = [1, 1]} : vector<8x120xf32> to vector<8x111xf32>
    %cst_34 = arith.constant 0.000000e+00 : f32
    %53 = vector.broadcast %cst_34 : f32 to vector<8x9xf32>
    %54 = tpu.concatenate %52, %53 in 1 : vector<8x111xf32>, vector<8x9xf32> -> vector<8x120xf32>
    %cst_35 = arith.constant dense<0.000000e+00> : vector<8x120xf32>
    %55 = tpu.matmul %51, %54, %cst_35 {dimension_numbers = #tpu.dot_dimension_numbers<[1], [0], [0], [1], [0, 0, 1, 1], [], []>} : vector<8x8xf32>, vector<8x120xf32>, vector<8x120xf32> -> vector<8x120xf32>
    %56 = arith.addf %49, %55 : vector<8x120xf32>
    %c8 = arith.constant 8 : index
    %c0_36 = arith.constant 0 : index
    %c0_37 = arith.constant 0 : index
    %57 = vector.load %arg2[%c8, %c0_36, %c0_37] : memref<9x8x8xf32, #tpu.memory_space<vmem>>, vector<1x8x8xf32>
    %58 = vector.shape_cast %57 : vector<1x8x8xf32> to vector<8x8xf32>
    %59 = vector.extract_strided_slice %1 {offsets = [0, 10], sizes = [8, 110], strides = [1, 1]} : vector<8x120xf32> to vector<8x110xf32>
    %cst_38 = arith.constant 0.000000e+00 : f32
    %60 = vector.broadcast %cst_38 : f32 to vector<8x10xf32>
    %61 = tpu.concatenate %59, %60 in 1 : vector<8x110xf32>, vector<8x10xf32> -> vector<8x120xf32>
    %cst_39 = arith.constant dense<0.000000e+00> : vector<8x120xf32>
    %62 = tpu.matmul %58, %61, %cst_39 {dimension_numbers = #tpu.dot_dimension_numbers<[1], [0], [0], [1], [0, 0, 1, 1], [], []>} : vector<8x8xf32>, vector<8x120xf32>, vector<8x120xf32> -> vector<8x120xf32>
    %63 = arith.addf %56, %62 : vector<8x120xf32>
    %c0_40 = arith.constant 0 : index
    %c0_41 = arith.constant 0 : index
    %64 = vector.load %arg3[%c0_40, %c0_41] : memref<8x1xf32, #tpu.memory_space<vmem>>, vector<8x1xf32>
    %65 = vector.broadcast %64 : vector<8x1xf32> to vector<8x120xf32>
    %66 = arith.addf %63, %65 : vector<8x120xf32>
    %67 = vector.broadcast %2 : vector<1x120xf32> to vector<8x120xf32>
    %68 = arith.mulf %66, %67 : vector<8x120xf32>
    %cst_42 = arith.constant dense<0.000000e+00> : vector<8xf32>
    %69 = vector.multi_reduction <add>, %68, %cst_42 [1] : vector<8x120xf32> to vector<8xf32>
    %70 = vector.shape_cast %69 : vector<8xf32> to vector<8x1xf32>
    %cst_43 = arith.constant 1.562500e-02 : f32
    %71 = vector.broadcast %cst_43 : f32 to vector<8x1xf32>
    %72 = arith.mulf %70, %71 : vector<8x1xf32>
    %73 = vector.broadcast %72 : vector<8x1xf32> to vector<8x120xf32>
    %74 = arith.subf %66, %73 : vector<8x120xf32>
    %75 = arith.mulf %74, %74 : vector<8x120xf32>
    %76 = vector.broadcast %2 : vector<1x120xf32> to vector<8x120xf32>
    %77 = arith.mulf %75, %76 : vector<8x120xf32>
    %cst_44 = arith.constant dense<0.000000e+00> : vector<8xf32>
    %78 = vector.multi_reduction <add>, %77, %cst_44 [1] : vector<8x120xf32> to vector<8xf32>
    %79 = vector.shape_cast %78 : vector<8xf32> to vector<8x1xf32>
    %cst_45 = arith.constant 1.562500e-02 : f32
    %80 = vector.broadcast %cst_45 : f32 to vector<8x1xf32>
    %81 = arith.mulf %79, %80 : vector<8x1xf32>
    %cst_46 = arith.constant 9.99999974E-6 : f32
    %82 = vector.broadcast %cst_46 : f32 to vector<8x1xf32>
    %83 = arith.addf %81, %82 : vector<8x1xf32>
    %84 = math.rsqrt %83 : vector<8x1xf32>
    %85 = vector.broadcast %84 : vector<8x1xf32> to vector<8x120xf32>
    %86 = arith.mulf %74, %85 : vector<8x120xf32>
    %cst_47 = arith.constant 0.000000e+00 : f32
    %87 = vector.broadcast %cst_47 : f32 to vector<8x120xf32>
    %88 = arith.cmpf oge, %86, %87 : vector<8x120xf32>
    %c0_48 = arith.constant 0 : index
    %c0_49 = arith.constant 0 : index
    %89 = vector.load %arg4[%c0_48, %c0_49] : memref<8x1xf32, #tpu.memory_space<vmem>>, vector<8x1xf32>
    %90 = vector.broadcast %89 : vector<8x1xf32> to vector<8x120xf32>
    %91 = arith.mulf %90, %86 : vector<8x120xf32>
    %92 = arith.select %88, %86, %91 : vector<8x120xi1>, vector<8x120xf32>
    %93 = vector.broadcast %2 : vector<1x120xf32> to vector<8x120xf32>
    %94 = arith.mulf %92, %93 : vector<8x120xf32>
    %c0_50 = arith.constant 0 : index
    %c0_51 = arith.constant 0 : index
    %c0_52 = arith.constant 0 : index
    %95 = vector.load %arg6[%c0_50, %c0_51, %c0_52] : memref<1x8x120xf32, #tpu.memory_space<vmem>>, vector<1x8x120xf32>
    %96 = vector.shape_cast %95 : vector<1x8x120xf32> to vector<8x120xf32>
    %97 = vector.shape_cast %94 : vector<8x120xf32> to vector<1x8x120xf32>
    tpu.vector_store %arg6[%c0_50, %c0_51, %c0_52], %97 {strides = array<i32>} : memref<1x8x120xf32, #tpu.memory_space<vmem>>, vector<1x8x120xf32>,
    return
  }
  func.func @transform_0(%arg0: i32) -> (i32, i32, i32) {
    %c0_i32 = arith.constant 0 : i32
    %c0_i32_0 = arith.constant 0 : i32
    %c0_i32_1 = arith.constant 0 : i32
    return %arg0, %c0_i32, %c0_i32_0 : i32, i32, i32
  }
  func.func @transform_1(%arg0: i32) -> (i32, i32, i32) {
    %c0_i32 = arith.constant 0 : i32
    %c0_i32_0 = arith.constant 0 : i32
    %c0_i32_1 = arith.constant 0 : i32
    %c0_i32_2 = arith.constant 0 : i32
    return %c0_i32, %c0_i32_0, %c0_i32_1 : i32, i32, i32
  }
  func.func @transform_2(%arg0: i32) -> (i32, i32) {
    %c0_i32 = arith.constant 0 : i32
    %c0_i32_0 = arith.constant 0 : i32
    %c0_i32_1 = arith.constant 0 : i32
    return %c0_i32, %c0_i32_0 : i32, i32
  }
  func.func @transform_3(%arg0: i32) -> (i32, i32) {
    %c0_i32 = arith.constant 0 : i32
    %c0_i32_0 = arith.constant 0 : i32
    %c0_i32_1 = arith.constant 0 : i32
    return %c0_i32, %c0_i32_0 : i32, i32
  }
  func.func @transform_4(%arg0: i32) -> (i32, i32) {
    %c0_i32 = arith.constant 0 : i32
    %c0_i32_0 = arith.constant 0 : i32
    %c0_i32_1 = arith.constant 0 : i32
    return %c0_i32, %c0_i32_0 : i32, i32
  }
  func.func @transform_5(%arg0: i32) -> (i32, i32, i32) {
    %c1_i32 = arith.constant 1 : i32
    %c0_i32 = arith.constant 0 : i32
    %c0_i32_0 = arith.constant 0 : i32
    return %arg0, %c1_i32, %c0_i32 : i32, i32, i32
  }
}

module attributes {stable_mosaic.version = 11 : i64} {
  func.func @_dense_conv_kernel(%arg0: i32, %arg1: memref<1x16x120xf32, #tpu.memory_space<vmem>>, %arg2: memref<9x8x16xf32, #tpu.memory_space<vmem>>, %arg3: memref<8x1xf32, #tpu.memory_space<vmem>>, %arg4: memref<8x1xf32, #tpu.memory_space<vmem>>, %arg5: memref<1x120xf32, #tpu.memory_space<vmem>>, %arg6: memref<1x8x120xf32, #tpu.memory_space<vmem>>) attributes {dimension_semantics = [#tpu.dimension_semantics<parallel>], iteration_bounds = array<i64: 2>, scalar_prefetch = 0 : i64, scratch_operands = 0 : i64, tpu.core_type = #tpu.core_type<tc>, window_params = [{transform_indices = @transform_0, window_bounds = array<i64: 1, 16, 120>}, {pipeline_mode = #tpu.pipeline_mode<synchronous>, transform_indices = @transform_1, window_bounds = array<i64: 9, 8, 16>}, {pipeline_mode = #tpu.pipeline_mode<synchronous>, transform_indices = @transform_2, window_bounds = array<i64: 8, 1>}, {pipeline_mode = #tpu.pipeline_mode<synchronous>, transform_indices = @transform_3, window_bounds = array<i64: 8, 1>}, {pipeline_mode = #tpu.pipeline_mode<synchronous>, transform_indices = @transform_4, window_bounds = array<i64: 1, 120>}, {transform_indices = @transform_5, window_bounds = array<i64: 1, 8, 120>}]} {
    %c0 = arith.constant 0 : index
    %c0_0 = arith.constant 0 : index
    %c0_1 = arith.constant 0 : index
    %0 = vector.load %arg1[%c0, %c0_0, %c0_1] : memref<1x16x120xf32, #tpu.memory_space<vmem>>, vector<1x16x120xf32>
    %1 = vector.shape_cast %0 : vector<1x16x120xf32> to vector<16x120xf32>
    %c0_2 = arith.constant 0 : index
    %c0_3 = arith.constant 0 : index
    %2 = vector.load %arg5[%c0_2, %c0_3] : memref<1x120xf32, #tpu.memory_space<vmem>>, vector<1x120xf32>
    %cst = arith.constant 0.000000e+00 : f32
    %3 = vector.broadcast %cst : f32 to vector<8x120xf32>
    %c0_4 = arith.constant 0 : index
    %c0_5 = arith.constant 0 : index
    %c0_6 = arith.constant 0 : index
    %4 = vector.load %arg2[%c0_4, %c0_5, %c0_6] : memref<9x8x16xf32, #tpu.memory_space<vmem>>, vector<1x8x16xf32>
    %5 = vector.shape_cast %4 : vector<1x8x16xf32> to vector<8x16xf32>
    %cst_7 = arith.constant 0.000000e+00 : f32
    %6 = vector.broadcast %cst_7 : f32 to vector<16x22xf32>
    %7 = vector.extract_strided_slice %1 {offsets = [0, 0], sizes = [16, 98], strides = [1, 1]} : vector<16x120xf32> to vector<16x98xf32>
    %8 = tpu.concatenate %6, %7 in 1 : vector<16x22xf32>, vector<16x98xf32> -> vector<16x120xf32>
    %cst_8 = arith.constant dense<0.000000e+00> : vector<8x120xf32>
    %9 = tpu.matmul %5, %8, %cst_8 {dimension_numbers = #tpu.dot_dimension_numbers<[1], [0], [0], [1], [0, 0, 1, 1], [], []>} : vector<8x16xf32>, vector<16x120xf32>, vector<8x120xf32> -> vector<8x120xf32>
    %10 = arith.addf %3, %9 : vector<8x120xf32>
    %c1 = arith.constant 1 : index
    %c0_9 = arith.constant 0 : index
    %c0_10 = arith.constant 0 : index
    %11 = vector.load %arg2[%c1, %c0_9, %c0_10] : memref<9x8x16xf32, #tpu.memory_space<vmem>>, vector<1x8x16xf32>
    %12 = vector.shape_cast %11 : vector<1x8x16xf32> to vector<8x16xf32>
    %cst_11 = arith.constant 0.000000e+00 : f32
    %13 = vector.broadcast %cst_11 : f32 to vector<16x21xf32>
    %14 = vector.extract_strided_slice %1 {offsets = [0, 0], sizes = [16, 99], strides = [1, 1]} : vector<16x120xf32> to vector<16x99xf32>
    %15 = tpu.concatenate %13, %14 in 1 : vector<16x21xf32>, vector<16x99xf32> -> vector<16x120xf32>
    %cst_12 = arith.constant dense<0.000000e+00> : vector<8x120xf32>
    %16 = tpu.matmul %12, %15, %cst_12 {dimension_numbers = #tpu.dot_dimension_numbers<[1], [0], [0], [1], [0, 0, 1, 1], [], []>} : vector<8x16xf32>, vector<16x120xf32>, vector<8x120xf32> -> vector<8x120xf32>
    %17 = arith.addf %10, %16 : vector<8x120xf32>
    %c2 = arith.constant 2 : index
    %c0_13 = arith.constant 0 : index
    %c0_14 = arith.constant 0 : index
    %18 = vector.load %arg2[%c2, %c0_13, %c0_14] : memref<9x8x16xf32, #tpu.memory_space<vmem>>, vector<1x8x16xf32>
    %19 = vector.shape_cast %18 : vector<1x8x16xf32> to vector<8x16xf32>
    %cst_15 = arith.constant 0.000000e+00 : f32
    %20 = vector.broadcast %cst_15 : f32 to vector<16x20xf32>
    %21 = vector.extract_strided_slice %1 {offsets = [0, 0], sizes = [16, 100], strides = [1, 1]} : vector<16x120xf32> to vector<16x100xf32>
    %22 = tpu.concatenate %20, %21 in 1 : vector<16x20xf32>, vector<16x100xf32> -> vector<16x120xf32>
    %cst_16 = arith.constant dense<0.000000e+00> : vector<8x120xf32>
    %23 = tpu.matmul %19, %22, %cst_16 {dimension_numbers = #tpu.dot_dimension_numbers<[1], [0], [0], [1], [0, 0, 1, 1], [], []>} : vector<8x16xf32>, vector<16x120xf32>, vector<8x120xf32> -> vector<8x120xf32>
    %24 = arith.addf %17, %23 : vector<8x120xf32>
    %c3 = arith.constant 3 : index
    %c0_17 = arith.constant 0 : index
    %c0_18 = arith.constant 0 : index
    %25 = vector.load %arg2[%c3, %c0_17, %c0_18] : memref<9x8x16xf32, #tpu.memory_space<vmem>>, vector<1x8x16xf32>
    %26 = vector.shape_cast %25 : vector<1x8x16xf32> to vector<8x16xf32>
    %cst_19 = arith.constant 0.000000e+00 : f32
    %27 = vector.broadcast %cst_19 : f32 to vector<16x2xf32>
    %28 = vector.extract_strided_slice %1 {offsets = [0, 0], sizes = [16, 118], strides = [1, 1]} : vector<16x120xf32> to vector<16x118xf32>
    %29 = tpu.concatenate %27, %28 in 1 : vector<16x2xf32>, vector<16x118xf32> -> vector<16x120xf32>
    %cst_20 = arith.constant dense<0.000000e+00> : vector<8x120xf32>
    %30 = tpu.matmul %26, %29, %cst_20 {dimension_numbers = #tpu.dot_dimension_numbers<[1], [0], [0], [1], [0, 0, 1, 1], [], []>} : vector<8x16xf32>, vector<16x120xf32>, vector<8x120xf32> -> vector<8x120xf32>
    %31 = arith.addf %24, %30 : vector<8x120xf32>
    %c4 = arith.constant 4 : index
    %c0_21 = arith.constant 0 : index
    %c0_22 = arith.constant 0 : index
    %32 = vector.load %arg2[%c4, %c0_21, %c0_22] : memref<9x8x16xf32, #tpu.memory_space<vmem>>, vector<1x8x16xf32>
    %33 = vector.shape_cast %32 : vector<1x8x16xf32> to vector<8x16xf32>
    %cst_23 = arith.constant 0.000000e+00 : f32
    %34 = vector.broadcast %cst_23 : f32 to vector<16x1xf32>
    %35 = vector.extract_strided_slice %1 {offsets = [0, 0], sizes = [16, 119], strides = [1, 1]} : vector<16x120xf32> to vector<16x119xf32>
    %36 = tpu.concatenate %34, %35 in 1 : vector<16x1xf32>, vector<16x119xf32> -> vector<16x120xf32>
    %cst_24 = arith.constant dense<0.000000e+00> : vector<8x120xf32>
    %37 = tpu.matmul %33, %36, %cst_24 {dimension_numbers = #tpu.dot_dimension_numbers<[1], [0], [0], [1], [0, 0, 1, 1], [], []>} : vector<8x16xf32>, vector<16x120xf32>, vector<8x120xf32> -> vector<8x120xf32>
    %38 = arith.addf %31, %37 : vector<8x120xf32>
    %c5 = arith.constant 5 : index
    %c0_25 = arith.constant 0 : index
    %c0_26 = arith.constant 0 : index
    %39 = vector.load %arg2[%c5, %c0_25, %c0_26] : memref<9x8x16xf32, #tpu.memory_space<vmem>>, vector<1x8x16xf32>
    %40 = vector.shape_cast %39 : vector<1x8x16xf32> to vector<8x16xf32>
    %cst_27 = arith.constant dense<0.000000e+00> : vector<8x120xf32>
    %41 = tpu.matmul %40, %1, %cst_27 {dimension_numbers = #tpu.dot_dimension_numbers<[1], [0], [0], [1], [0, 0, 1, 1], [], []>} : vector<8x16xf32>, vector<16x120xf32>, vector<8x120xf32> -> vector<8x120xf32>
    %42 = arith.addf %38, %41 : vector<8x120xf32>
    %c6 = arith.constant 6 : index
    %c0_28 = arith.constant 0 : index
    %c0_29 = arith.constant 0 : index
    %43 = vector.load %arg2[%c6, %c0_28, %c0_29] : memref<9x8x16xf32, #tpu.memory_space<vmem>>, vector<1x8x16xf32>
    %44 = vector.shape_cast %43 : vector<1x8x16xf32> to vector<8x16xf32>
    %45 = vector.extract_strided_slice %1 {offsets = [0, 18], sizes = [16, 102], strides = [1, 1]} : vector<16x120xf32> to vector<16x102xf32>
    %cst_30 = arith.constant 0.000000e+00 : f32
    %46 = vector.broadcast %cst_30 : f32 to vector<16x18xf32>
    %47 = tpu.concatenate %45, %46 in 1 : vector<16x102xf32>, vector<16x18xf32> -> vector<16x120xf32>
    %cst_31 = arith.constant dense<0.000000e+00> : vector<8x120xf32>
    %48 = tpu.matmul %44, %47, %cst_31 {dimension_numbers = #tpu.dot_dimension_numbers<[1], [0], [0], [1], [0, 0, 1, 1], [], []>} : vector<8x16xf32>, vector<16x120xf32>, vector<8x120xf32> -> vector<8x120xf32>
    %49 = arith.addf %42, %48 : vector<8x120xf32>
    %c7 = arith.constant 7 : index
    %c0_32 = arith.constant 0 : index
    %c0_33 = arith.constant 0 : index
    %50 = vector.load %arg2[%c7, %c0_32, %c0_33] : memref<9x8x16xf32, #tpu.memory_space<vmem>>, vector<1x8x16xf32>
    %51 = vector.shape_cast %50 : vector<1x8x16xf32> to vector<8x16xf32>
    %52 = vector.extract_strided_slice %1 {offsets = [0, 19], sizes = [16, 101], strides = [1, 1]} : vector<16x120xf32> to vector<16x101xf32>
    %cst_34 = arith.constant 0.000000e+00 : f32
    %53 = vector.broadcast %cst_34 : f32 to vector<16x19xf32>
    %54 = tpu.concatenate %52, %53 in 1 : vector<16x101xf32>, vector<16x19xf32> -> vector<16x120xf32>
    %cst_35 = arith.constant dense<0.000000e+00> : vector<8x120xf32>
    %55 = tpu.matmul %51, %54, %cst_35 {dimension_numbers = #tpu.dot_dimension_numbers<[1], [0], [0], [1], [0, 0, 1, 1], [], []>} : vector<8x16xf32>, vector<16x120xf32>, vector<8x120xf32> -> vector<8x120xf32>
    %56 = arith.addf %49, %55 : vector<8x120xf32>
    %c8 = arith.constant 8 : index
    %c0_36 = arith.constant 0 : index
    %c0_37 = arith.constant 0 : index
    %57 = vector.load %arg2[%c8, %c0_36, %c0_37] : memref<9x8x16xf32, #tpu.memory_space<vmem>>, vector<1x8x16xf32>
    %58 = vector.shape_cast %57 : vector<1x8x16xf32> to vector<8x16xf32>
    %59 = vector.extract_strided_slice %1 {offsets = [0, 20], sizes = [16, 100], strides = [1, 1]} : vector<16x120xf32> to vector<16x100xf32>
    %cst_38 = arith.constant 0.000000e+00 : f32
    %60 = vector.broadcast %cst_38 : f32 to vector<16x20xf32>
    %61 = tpu.concatenate %59, %60 in 1 : vector<16x100xf32>, vector<16x20xf32> -> vector<16x120xf32>
    %cst_39 = arith.constant dense<0.000000e+00> : vector<8x120xf32>
    %62 = tpu.matmul %58, %61, %cst_39 {dimension_numbers = #tpu.dot_dimension_numbers<[1], [0], [0], [1], [0, 0, 1, 1], [], []>} : vector<8x16xf32>, vector<16x120xf32>, vector<8x120xf32> -> vector<8x120xf32>
    %63 = arith.addf %56, %62 : vector<8x120xf32>
    %c0_40 = arith.constant 0 : index
    %c0_41 = arith.constant 0 : index
    %64 = vector.load %arg3[%c0_40, %c0_41] : memref<8x1xf32, #tpu.memory_space<vmem>>, vector<8x1xf32>
    %65 = vector.broadcast %64 : vector<8x1xf32> to vector<8x120xf32>
    %66 = arith.addf %63, %65 : vector<8x120xf32>
    %67 = vector.broadcast %2 : vector<1x120xf32> to vector<8x120xf32>
    %68 = arith.mulf %66, %67 : vector<8x120xf32>
    %cst_42 = arith.constant dense<0.000000e+00> : vector<8xf32>
    %69 = vector.multi_reduction <add>, %68, %cst_42 [1] : vector<8x120xf32> to vector<8xf32>
    %70 = vector.shape_cast %69 : vector<8xf32> to vector<8x1xf32>
    %cst_43 = arith.constant 1.562500e-02 : f32
    %71 = vector.broadcast %cst_43 : f32 to vector<8x1xf32>
    %72 = arith.mulf %70, %71 : vector<8x1xf32>
    %73 = vector.broadcast %72 : vector<8x1xf32> to vector<8x120xf32>
    %74 = arith.subf %66, %73 : vector<8x120xf32>
    %75 = arith.mulf %74, %74 : vector<8x120xf32>
    %76 = vector.broadcast %2 : vector<1x120xf32> to vector<8x120xf32>
    %77 = arith.mulf %75, %76 : vector<8x120xf32>
    %cst_44 = arith.constant dense<0.000000e+00> : vector<8xf32>
    %78 = vector.multi_reduction <add>, %77, %cst_44 [1] : vector<8x120xf32> to vector<8xf32>
    %79 = vector.shape_cast %78 : vector<8xf32> to vector<8x1xf32>
    %cst_45 = arith.constant 1.562500e-02 : f32
    %80 = vector.broadcast %cst_45 : f32 to vector<8x1xf32>
    %81 = arith.mulf %79, %80 : vector<8x1xf32>
    %cst_46 = arith.constant 9.99999974E-6 : f32
    %82 = vector.broadcast %cst_46 : f32 to vector<8x1xf32>
    %83 = arith.addf %81, %82 : vector<8x1xf32>
    %84 = math.rsqrt %83 : vector<8x1xf32>
    %85 = vector.broadcast %84 : vector<8x1xf32> to vector<8x120xf32>
    %86 = arith.mulf %74, %85 : vector<8x120xf32>
    %cst_47 = arith.constant 0.000000e+00 : f32
    %87 = vector.broadcast %cst_47 : f32 to vector<8x120xf32>
    %88 = arith.cmpf oge, %86, %87 : vector<8x120xf32>
    %c0_48 = arith.constant 0 : index
    %c0_49 = arith.constant 0 : index
    %89 = vector.load %arg4[%c0_48, %c0_49] : memref<8x1xf32, #tpu.memory_space<vmem>>, vector<8x1xf32>
    %90 = vector.broadcast %89 : vector<8x1xf32> to vector<8x120xf32>
    %91 = arith.mulf %90, %86 : vector<8x120xf32>
    %92 = arith.select %88, %86, %91 : vector<8x120xi1>, vector<8x120xf32>
    %93 = vector.broadcast %2 : vector<1x120xf32> to vector<8x120xf32>
    %94 = arith.mulf %92, %93 : vector<8x120xf32>
    %c0_50 = arith.constant 0 : index
    %c0_51 = arith.constant 0 : index
    %c0_52 = arith.constant 0 : index
    %95 = vector.load %arg6[%c0_50, %c0_51, %c0_52] : memref<1x8x120xf32, #tpu.memory_space<vmem>>, vector<1x8x120xf32>
    %96 = vector.shape_cast %95 : vector<1x8x120xf32> to vector<8x120xf32>
    %97 = vector.shape_cast %94 : vector<8x120xf32> to vector<1x8x120xf32>
    tpu.vector_store %arg6[%c0_50, %c0_51, %c0_52], %97 {strides = array<i32>} : memref<1x8x120xf32, #tpu.memory_space<vmem>>, vector<1x8x120xf32>,
    return
  }
  func.func @transform_0(%arg0: i32) -> (i32, i32, i32) {
    %c0_i32 = arith.constant 0 : i32
    %c0_i32_0 = arith.constant 0 : i32
    %c0_i32_1 = arith.constant 0 : i32
    return %arg0, %c0_i32, %c0_i32_0 : i32, i32, i32
  }
  func.func @transform_1(%arg0: i32) -> (i32, i32, i32) {
    %c0_i32 = arith.constant 0 : i32
    %c0_i32_0 = arith.constant 0 : i32
    %c0_i32_1 = arith.constant 0 : i32
    %c0_i32_2 = arith.constant 0 : i32
    return %c0_i32, %c0_i32_0, %c0_i32_1 : i32, i32, i32
  }
  func.func @transform_2(%arg0: i32) -> (i32, i32) {
    %c0_i32 = arith.constant 0 : i32
    %c0_i32_0 = arith.constant 0 : i32
    %c0_i32_1 = arith.constant 0 : i32
    return %c0_i32, %c0_i32_0 : i32, i32
  }
  func.func @transform_3(%arg0: i32) -> (i32, i32) {
    %c0_i32 = arith.constant 0 : i32
    %c0_i32_0 = arith.constant 0 : i32
    %c0_i32_1 = arith.constant 0 : i32
    return %c0_i32, %c0_i32_0 : i32, i32
  }
  func.func @transform_4(%arg0: i32) -> (i32, i32) {
    %c0_i32 = arith.constant 0 : i32
    %c0_i32_0 = arith.constant 0 : i32
    %c0_i32_1 = arith.constant 0 : i32
    return %c0_i32, %c0_i32_0 : i32, i32
  }
  func.func @transform_5(%arg0: i32) -> (i32, i32, i32) {
    %c2_i32 = arith.constant 2 : i32
    %c0_i32 = arith.constant 0 : i32
    %c0_i32_0 = arith.constant 0 : i32
    return %arg0, %c2_i32, %c0_i32 : i32, i32, i32
  }
}

module attributes {stable_mosaic.version = 11 : i64} {
  func.func @_dense_conv_kernel(%arg0: i32, %arg1: memref<1x8x120xf32, #tpu.memory_space<vmem>>, %arg2: memref<9x8x8xf32, #tpu.memory_space<vmem>>, %arg3: memref<8x1xf32, #tpu.memory_space<vmem>>, %arg4: memref<8x1xf32, #tpu.memory_space<vmem>>, %arg5: memref<1x120xf32, #tpu.memory_space<vmem>>, %arg6: memref<1x8x120xf32, #tpu.memory_space<vmem>>) attributes {dimension_semantics = [#tpu.dimension_semantics<parallel>], iteration_bounds = array<i64: 2>, scalar_prefetch = 0 : i64, scratch_operands = 0 : i64, tpu.core_type = #tpu.core_type<tc>, window_params = [{transform_indices = @transform_0, window_bounds = array<i64: 1, 8, 120>}, {pipeline_mode = #tpu.pipeline_mode<synchronous>, transform_indices = @transform_1, window_bounds = array<i64: 9, 8, 8>}, {pipeline_mode = #tpu.pipeline_mode<synchronous>, transform_indices = @transform_2, window_bounds = array<i64: 8, 1>}, {pipeline_mode = #tpu.pipeline_mode<synchronous>, transform_indices = @transform_3, window_bounds = array<i64: 8, 1>}, {pipeline_mode = #tpu.pipeline_mode<synchronous>, transform_indices = @transform_4, window_bounds = array<i64: 1, 120>}, {transform_indices = @transform_5, window_bounds = array<i64: 1, 8, 120>}]} {
    %c0 = arith.constant 0 : index
    %c0_0 = arith.constant 0 : index
    %c0_1 = arith.constant 0 : index
    %0 = vector.load %arg1[%c0, %c0_0, %c0_1] : memref<1x8x120xf32, #tpu.memory_space<vmem>>, vector<1x8x120xf32>
    %1 = vector.shape_cast %0 : vector<1x8x120xf32> to vector<8x120xf32>
    %c0_2 = arith.constant 0 : index
    %c0_3 = arith.constant 0 : index
    %2 = vector.load %arg5[%c0_2, %c0_3] : memref<1x120xf32, #tpu.memory_space<vmem>>, vector<1x120xf32>
    %cst = arith.constant 0.000000e+00 : f32
    %3 = vector.broadcast %cst : f32 to vector<8x120xf32>
    %c0_4 = arith.constant 0 : index
    %c0_5 = arith.constant 0 : index
    %c0_6 = arith.constant 0 : index
    %4 = vector.load %arg2[%c0_4, %c0_5, %c0_6] : memref<9x8x8xf32, #tpu.memory_space<vmem>>, vector<1x8x8xf32>
    %5 = vector.shape_cast %4 : vector<1x8x8xf32> to vector<8x8xf32>
    %cst_7 = arith.constant 0.000000e+00 : f32
    %6 = vector.broadcast %cst_7 : f32 to vector<8x21xf32>
    %7 = vector.extract_strided_slice %1 {offsets = [0, 0], sizes = [8, 99], strides = [1, 1]} : vector<8x120xf32> to vector<8x99xf32>
    %8 = tpu.concatenate %6, %7 in 1 : vector<8x21xf32>, vector<8x99xf32> -> vector<8x120xf32>
    %cst_8 = arith.constant dense<0.000000e+00> : vector<8x120xf32>
    %9 = tpu.matmul %5, %8, %cst_8 {dimension_numbers = #tpu.dot_dimension_numbers<[1], [0], [0], [1], [0, 0, 1, 1], [], []>} : vector<8x8xf32>, vector<8x120xf32>, vector<8x120xf32> -> vector<8x120xf32>
    %10 = arith.addf %3, %9 : vector<8x120xf32>
    %c1 = arith.constant 1 : index
    %c0_9 = arith.constant 0 : index
    %c0_10 = arith.constant 0 : index
    %11 = vector.load %arg2[%c1, %c0_9, %c0_10] : memref<9x8x8xf32, #tpu.memory_space<vmem>>, vector<1x8x8xf32>
    %12 = vector.shape_cast %11 : vector<1x8x8xf32> to vector<8x8xf32>
    %cst_11 = arith.constant 0.000000e+00 : f32
    %13 = vector.broadcast %cst_11 : f32 to vector<8x20xf32>
    %14 = vector.extract_strided_slice %1 {offsets = [0, 0], sizes = [8, 100], strides = [1, 1]} : vector<8x120xf32> to vector<8x100xf32>
    %15 = tpu.concatenate %13, %14 in 1 : vector<8x20xf32>, vector<8x100xf32> -> vector<8x120xf32>
    %cst_12 = arith.constant dense<0.000000e+00> : vector<8x120xf32>
    %16 = tpu.matmul %12, %15, %cst_12 {dimension_numbers = #tpu.dot_dimension_numbers<[1], [0], [0], [1], [0, 0, 1, 1], [], []>} : vector<8x8xf32>, vector<8x120xf32>, vector<8x120xf32> -> vector<8x120xf32>
    %17 = arith.addf %10, %16 : vector<8x120xf32>
    %c2 = arith.constant 2 : index
    %c0_13 = arith.constant 0 : index
    %c0_14 = arith.constant 0 : index
    %18 = vector.load %arg2[%c2, %c0_13, %c0_14] : memref<9x8x8xf32, #tpu.memory_space<vmem>>, vector<1x8x8xf32>
    %19 = vector.shape_cast %18 : vector<1x8x8xf32> to vector<8x8xf32>
    %cst_15 = arith.constant 0.000000e+00 : f32
    %20 = vector.broadcast %cst_15 : f32 to vector<8x19xf32>
    %21 = vector.extract_strided_slice %1 {offsets = [0, 0], sizes = [8, 101], strides = [1, 1]} : vector<8x120xf32> to vector<8x101xf32>
    %22 = tpu.concatenate %20, %21 in 1 : vector<8x19xf32>, vector<8x101xf32> -> vector<8x120xf32>
    %cst_16 = arith.constant dense<0.000000e+00> : vector<8x120xf32>
    %23 = tpu.matmul %19, %22, %cst_16 {dimension_numbers = #tpu.dot_dimension_numbers<[1], [0], [0], [1], [0, 0, 1, 1], [], []>} : vector<8x8xf32>, vector<8x120xf32>, vector<8x120xf32> -> vector<8x120xf32>
    %24 = arith.addf %17, %23 : vector<8x120xf32>
    %c3 = arith.constant 3 : index
    %c0_17 = arith.constant 0 : index
    %c0_18 = arith.constant 0 : index
    %25 = vector.load %arg2[%c3, %c0_17, %c0_18] : memref<9x8x8xf32, #tpu.memory_space<vmem>>, vector<1x8x8xf32>
    %26 = vector.shape_cast %25 : vector<1x8x8xf32> to vector<8x8xf32>
    %cst_19 = arith.constant 0.000000e+00 : f32
    %27 = vector.broadcast %cst_19 : f32 to vector<8x11xf32>
    %28 = vector.extract_strided_slice %1 {offsets = [0, 0], sizes = [8, 109], strides = [1, 1]} : vector<8x120xf32> to vector<8x109xf32>
    %29 = tpu.concatenate %27, %28 in 1 : vector<8x11xf32>, vector<8x109xf32> -> vector<8x120xf32>
    %cst_20 = arith.constant dense<0.000000e+00> : vector<8x120xf32>
    %30 = tpu.matmul %26, %29, %cst_20 {dimension_numbers = #tpu.dot_dimension_numbers<[1], [0], [0], [1], [0, 0, 1, 1], [], []>} : vector<8x8xf32>, vector<8x120xf32>, vector<8x120xf32> -> vector<8x120xf32>
    %31 = arith.addf %24, %30 : vector<8x120xf32>
    %c4 = arith.constant 4 : index
    %c0_21 = arith.constant 0 : index
    %c0_22 = arith.constant 0 : index
    %32 = vector.load %arg2[%c4, %c0_21, %c0_22] : memref<9x8x8xf32, #tpu.memory_space<vmem>>, vector<1x8x8xf32>
    %33 = vector.shape_cast %32 : vector<1x8x8xf32> to vector<8x8xf32>
    %cst_23 = arith.constant 0.000000e+00 : f32
    %34 = vector.broadcast %cst_23 : f32 to vector<8x10xf32>
    %35 = vector.extract_strided_slice %1 {offsets = [0, 0], sizes = [8, 110], strides = [1, 1]} : vector<8x120xf32> to vector<8x110xf32>
    %36 = tpu.concatenate %34, %35 in 1 : vector<8x10xf32>, vector<8x110xf32> -> vector<8x120xf32>
    %cst_24 = arith.constant dense<0.000000e+00> : vector<8x120xf32>
    %37 = tpu.matmul %33, %36, %cst_24 {dimension_numbers = #tpu.dot_dimension_numbers<[1], [0], [0], [1], [0, 0, 1, 1], [], []>} : vector<8x8xf32>, vector<8x120xf32>, vector<8x120xf32> -> vector<8x120xf32>
    %38 = arith.addf %31, %37 : vector<8x120xf32>
    %c5 = arith.constant 5 : index
    %c0_25 = arith.constant 0 : index
    %c0_26 = arith.constant 0 : index
    %39 = vector.load %arg2[%c5, %c0_25, %c0_26] : memref<9x8x8xf32, #tpu.memory_space<vmem>>, vector<1x8x8xf32>
    %40 = vector.shape_cast %39 : vector<1x8x8xf32> to vector<8x8xf32>
    %cst_27 = arith.constant 0.000000e+00 : f32
    %41 = vector.broadcast %cst_27 : f32 to vector<8x9xf32>
    %42 = vector.extract_strided_slice %1 {offsets = [0, 0], sizes = [8, 111], strides = [1, 1]} : vector<8x120xf32> to vector<8x111xf32>
    %43 = tpu.concatenate %41, %42 in 1 : vector<8x9xf32>, vector<8x111xf32> -> vector<8x120xf32>
    %cst_28 = arith.constant dense<0.000000e+00> : vector<8x120xf32>
    %44 = tpu.matmul %40, %43, %cst_28 {dimension_numbers = #tpu.dot_dimension_numbers<[1], [0], [0], [1], [0, 0, 1, 1], [], []>} : vector<8x8xf32>, vector<8x120xf32>, vector<8x120xf32> -> vector<8x120xf32>
    %45 = arith.addf %38, %44 : vector<8x120xf32>
    %c6 = arith.constant 6 : index
    %c0_29 = arith.constant 0 : index
    %c0_30 = arith.constant 0 : index
    %46 = vector.load %arg2[%c6, %c0_29, %c0_30] : memref<9x8x8xf32, #tpu.memory_space<vmem>>, vector<1x8x8xf32>
    %47 = vector.shape_cast %46 : vector<1x8x8xf32> to vector<8x8xf32>
    %cst_31 = arith.constant 0.000000e+00 : f32
    %48 = vector.broadcast %cst_31 : f32 to vector<8x1xf32>
    %49 = vector.extract_strided_slice %1 {offsets = [0, 0], sizes = [8, 119], strides = [1, 1]} : vector<8x120xf32> to vector<8x119xf32>
    %50 = tpu.concatenate %48, %49 in 1 : vector<8x1xf32>, vector<8x119xf32> -> vector<8x120xf32>
    %cst_32 = arith.constant dense<0.000000e+00> : vector<8x120xf32>
    %51 = tpu.matmul %47, %50, %cst_32 {dimension_numbers = #tpu.dot_dimension_numbers<[1], [0], [0], [1], [0, 0, 1, 1], [], []>} : vector<8x8xf32>, vector<8x120xf32>, vector<8x120xf32> -> vector<8x120xf32>
    %52 = arith.addf %45, %51 : vector<8x120xf32>
    %c7 = arith.constant 7 : index
    %c0_33 = arith.constant 0 : index
    %c0_34 = arith.constant 0 : index
    %53 = vector.load %arg2[%c7, %c0_33, %c0_34] : memref<9x8x8xf32, #tpu.memory_space<vmem>>, vector<1x8x8xf32>
    %54 = vector.shape_cast %53 : vector<1x8x8xf32> to vector<8x8xf32>
    %cst_35 = arith.constant dense<0.000000e+00> : vector<8x120xf32>
    %55 = tpu.matmul %54, %1, %cst_35 {dimension_numbers = #tpu.dot_dimension_numbers<[1], [0], [0], [1], [0, 0, 1, 1], [], []>} : vector<8x8xf32>, vector<8x120xf32>, vector<8x120xf32> -> vector<8x120xf32>
    %56 = arith.addf %52, %55 : vector<8x120xf32>
    %c8 = arith.constant 8 : index
    %c0_36 = arith.constant 0 : index
    %c0_37 = arith.constant 0 : index
    %57 = vector.load %arg2[%c8, %c0_36, %c0_37] : memref<9x8x8xf32, #tpu.memory_space<vmem>>, vector<1x8x8xf32>
    %58 = vector.shape_cast %57 : vector<1x8x8xf32> to vector<8x8xf32>
    %59 = vector.extract_strided_slice %1 {offsets = [0, 1], sizes = [8, 119], strides = [1, 1]} : vector<8x120xf32> to vector<8x119xf32>
    %cst_38 = arith.constant 0.000000e+00 : f32
    %60 = vector.broadcast %cst_38 : f32 to vector<8x1xf32>
    %61 = tpu.concatenate %59, %60 in 1 : vector<8x119xf32>, vector<8x1xf32> -> vector<8x120xf32>
    %cst_39 = arith.constant dense<0.000000e+00> : vector<8x120xf32>
    %62 = tpu.matmul %58, %61, %cst_39 {dimension_numbers = #tpu.dot_dimension_numbers<[1], [0], [0], [1], [0, 0, 1, 1], [], []>} : vector<8x8xf32>, vector<8x120xf32>, vector<8x120xf32> -> vector<8x120xf32>
    %63 = arith.addf %56, %62 : vector<8x120xf32>
    %c0_40 = arith.constant 0 : index
    %c0_41 = arith.constant 0 : index
    %64 = vector.load %arg3[%c0_40, %c0_41] : memref<8x1xf32, #tpu.memory_space<vmem>>, vector<8x1xf32>
    %65 = vector.broadcast %64 : vector<8x1xf32> to vector<8x120xf32>
    %66 = arith.addf %63, %65 : vector<8x120xf32>
    %67 = vector.broadcast %2 : vector<1x120xf32> to vector<8x120xf32>
    %68 = arith.mulf %66, %67 : vector<8x120xf32>
    %cst_42 = arith.constant dense<0.000000e+00> : vector<8xf32>
    %69 = vector.multi_reduction <add>, %68, %cst_42 [1] : vector<8x120xf32> to vector<8xf32>
    %70 = vector.shape_cast %69 : vector<8xf32> to vector<8x1xf32>
    %cst_43 = arith.constant 1.562500e-02 : f32
    %71 = vector.broadcast %cst_43 : f32 to vector<8x1xf32>
    %72 = arith.mulf %70, %71 : vector<8x1xf32>
    %73 = vector.broadcast %72 : vector<8x1xf32> to vector<8x120xf32>
    %74 = arith.subf %66, %73 : vector<8x120xf32>
    %75 = arith.mulf %74, %74 : vector<8x120xf32>
    %76 = vector.broadcast %2 : vector<1x120xf32> to vector<8x120xf32>
    %77 = arith.mulf %75, %76 : vector<8x120xf32>
    %cst_44 = arith.constant dense<0.000000e+00> : vector<8xf32>
    %78 = vector.multi_reduction <add>, %77, %cst_44 [1] : vector<8x120xf32> to vector<8xf32>
    %79 = vector.shape_cast %78 : vector<8xf32> to vector<8x1xf32>
    %cst_45 = arith.constant 1.562500e-02 : f32
    %80 = vector.broadcast %cst_45 : f32 to vector<8x1xf32>
    %81 = arith.mulf %79, %80 : vector<8x1xf32>
    %cst_46 = arith.constant 9.99999974E-6 : f32
    %82 = vector.broadcast %cst_46 : f32 to vector<8x1xf32>
    %83 = arith.addf %81, %82 : vector<8x1xf32>
    %84 = math.rsqrt %83 : vector<8x1xf32>
    %85 = vector.broadcast %84 : vector<8x1xf32> to vector<8x120xf32>
    %86 = arith.mulf %74, %85 : vector<8x120xf32>
    %cst_47 = arith.constant 0.000000e+00 : f32
    %87 = vector.broadcast %cst_47 : f32 to vector<8x120xf32>
    %88 = arith.cmpf oge, %86, %87 : vector<8x120xf32>
    %c0_48 = arith.constant 0 : index
    %c0_49 = arith.constant 0 : index
    %89 = vector.load %arg4[%c0_48, %c0_49] : memref<8x1xf32, #tpu.memory_space<vmem>>, vector<8x1xf32>
    %90 = vector.broadcast %89 : vector<8x1xf32> to vector<8x120xf32>
    %91 = arith.mulf %90, %86 : vector<8x120xf32>
    %92 = arith.select %88, %86, %91 : vector<8x120xi1>, vector<8x120xf32>
    %93 = vector.broadcast %2 : vector<1x120xf32> to vector<8x120xf32>
    %94 = arith.mulf %92, %93 : vector<8x120xf32>
    %c0_50 = arith.constant 0 : index
    %c0_51 = arith.constant 0 : index
    %c0_52 = arith.constant 0 : index
    %95 = vector.load %arg6[%c0_50, %c0_51, %c0_52] : memref<1x8x120xf32, #tpu.memory_space<vmem>>, vector<1x8x120xf32>
    %96 = vector.shape_cast %95 : vector<1x8x120xf32> to vector<8x120xf32>
    %97 = vector.shape_cast %94 : vector<8x120xf32> to vector<1x8x120xf32>
    tpu.vector_store %arg6[%c0_50, %c0_51, %c0_52], %97 {strides = array<i32>} : memref<1x8x120xf32, #tpu.memory_space<vmem>>, vector<1x8x120xf32>,
    return
  }
  func.func @transform_0(%arg0: i32) -> (i32, i32, i32) {
    %c0_i32 = arith.constant 0 : i32
    %c0_i32_0 = arith.constant 0 : i32
    %c0_i32_1 = arith.constant 0 : i32
    return %arg0, %c0_i32, %c0_i32_0 : i32, i32, i32
  }
  func.func @transform_1(%arg0: i32) -> (i32, i32, i32) {
    %c0_i32 = arith.constant 0 : i32
    %c0_i32_0 = arith.constant 0 : i32
    %c0_i32_1 = arith.constant 0 : i32
    %c0_i32_2 = arith.constant 0 : i32
    return %c0_i32, %c0_i32_0, %c0_i32_1 : i32, i32, i32
  }
  func.func @transform_2(%arg0: i32) -> (i32, i32) {
    %c0_i32 = arith.constant 0 : i32
    %c0_i32_0 = arith.constant 0 : i32
    %c0_i32_1 = arith.constant 0 : i32
    return %c0_i32, %c0_i32_0 : i32, i32
  }
  func.func @transform_3(%arg0: i32) -> (i32, i32) {
    %c0_i32 = arith.constant 0 : i32
    %c0_i32_0 = arith.constant 0 : i32
    %c0_i32_1 = arith.constant 0 : i32
    return %c0_i32, %c0_i32_0 : i32, i32
  }
  func.func @transform_4(%arg0: i32) -> (i32, i32) {
    %c0_i32 = arith.constant 0 : i32
    %c0_i32_0 = arith.constant 0 : i32
    %c0_i32_1 = arith.constant 0 : i32
    return %c0_i32, %c0_i32_0 : i32, i32
  }
  func.func @transform_5(%arg0: i32) -> (i32, i32, i32) {
    %c1_i32 = arith.constant 1 : i32
    %c0_i32 = arith.constant 0 : i32
    %c0_i32_0 = arith.constant 0 : i32
    return %arg0, %c1_i32, %c0_i32 : i32, i32, i32
  }
}

module attributes {stable_mosaic.version = 11 : i64} {
  func.func @_dense_conv_kernel(%arg0: i32, %arg1: memref<1x16x120xf32, #tpu.memory_space<vmem>>, %arg2: memref<9x8x16xf32, #tpu.memory_space<vmem>>, %arg3: memref<8x1xf32, #tpu.memory_space<vmem>>, %arg4: memref<8x1xf32, #tpu.memory_space<vmem>>, %arg5: memref<1x120xf32, #tpu.memory_space<vmem>>, %arg6: memref<1x8x120xf32, #tpu.memory_space<vmem>>) attributes {dimension_semantics = [#tpu.dimension_semantics<parallel>], iteration_bounds = array<i64: 2>, scalar_prefetch = 0 : i64, scratch_operands = 0 : i64, tpu.core_type = #tpu.core_type<tc>, window_params = [{transform_indices = @transform_0, window_bounds = array<i64: 1, 16, 120>}, {pipeline_mode = #tpu.pipeline_mode<synchronous>, transform_indices = @transform_1, window_bounds = array<i64: 9, 8, 16>}, {pipeline_mode = #tpu.pipeline_mode<synchronous>, transform_indices = @transform_2, window_bounds = array<i64: 8, 1>}, {pipeline_mode = #tpu.pipeline_mode<synchronous>, transform_indices = @transform_3, window_bounds = array<i64: 8, 1>}, {pipeline_mode = #tpu.pipeline_mode<synchronous>, transform_indices = @transform_4, window_bounds = array<i64: 1, 120>}, {transform_indices = @transform_5, window_bounds = array<i64: 1, 8, 120>}]} {
    %c0 = arith.constant 0 : index
    %c0_0 = arith.constant 0 : index
    %c0_1 = arith.constant 0 : index
    %0 = vector.load %arg1[%c0, %c0_0, %c0_1] : memref<1x16x120xf32, #tpu.memory_space<vmem>>, vector<1x16x120xf32>
    %1 = vector.shape_cast %0 : vector<1x16x120xf32> to vector<16x120xf32>
    %c0_2 = arith.constant 0 : index
    %c0_3 = arith.constant 0 : index
    %2 = vector.load %arg5[%c0_2, %c0_3] : memref<1x120xf32, #tpu.memory_space<vmem>>, vector<1x120xf32>
    %cst = arith.constant 0.000000e+00 : f32
    %3 = vector.broadcast %cst : f32 to vector<8x120xf32>
    %c0_4 = arith.constant 0 : index
    %c0_5 = arith.constant 0 : index
    %c0_6 = arith.constant 0 : index
    %4 = vector.load %arg2[%c0_4, %c0_5, %c0_6] : memref<9x8x16xf32, #tpu.memory_space<vmem>>, vector<1x8x16xf32>
    %5 = vector.shape_cast %4 : vector<1x8x16xf32> to vector<8x16xf32>
    %cst_7 = arith.constant 0.000000e+00 : f32
    %6 = vector.broadcast %cst_7 : f32 to vector<16x41xf32>
    %7 = vector.extract_strided_slice %1 {offsets = [0, 0], sizes = [16, 79], strides = [1, 1]} : vector<16x120xf32> to vector<16x79xf32>
    %8 = tpu.concatenate %6, %7 in 1 : vector<16x41xf32>, vector<16x79xf32> -> vector<16x120xf32>
    %cst_8 = arith.constant dense<0.000000e+00> : vector<8x120xf32>
    %9 = tpu.matmul %5, %8, %cst_8 {dimension_numbers = #tpu.dot_dimension_numbers<[1], [0], [0], [1], [0, 0, 1, 1], [], []>} : vector<8x16xf32>, vector<16x120xf32>, vector<8x120xf32> -> vector<8x120xf32>
    %10 = arith.addf %3, %9 : vector<8x120xf32>
    %c1 = arith.constant 1 : index
    %c0_9 = arith.constant 0 : index
    %c0_10 = arith.constant 0 : index
    %11 = vector.load %arg2[%c1, %c0_9, %c0_10] : memref<9x8x16xf32, #tpu.memory_space<vmem>>, vector<1x8x16xf32>
    %12 = vector.shape_cast %11 : vector<1x8x16xf32> to vector<8x16xf32>
    %cst_11 = arith.constant 0.000000e+00 : f32
    %13 = vector.broadcast %cst_11 : f32 to vector<16x40xf32>
    %14 = vector.extract_strided_slice %1 {offsets = [0, 0], sizes = [16, 80], strides = [1, 1]} : vector<16x120xf32> to vector<16x80xf32>
    %15 = tpu.concatenate %13, %14 in 1 : vector<16x40xf32>, vector<16x80xf32> -> vector<16x120xf32>
    %cst_12 = arith.constant dense<0.000000e+00> : vector<8x120xf32>
    %16 = tpu.matmul %12, %15, %cst_12 {dimension_numbers = #tpu.dot_dimension_numbers<[1], [0], [0], [1], [0, 0, 1, 1], [], []>} : vector<8x16xf32>, vector<16x120xf32>, vector<8x120xf32> -> vector<8x120xf32>
    %17 = arith.addf %10, %16 : vector<8x120xf32>
    %c2 = arith.constant 2 : index
    %c0_13 = arith.constant 0 : index
    %c0_14 = arith.constant 0 : index
    %18 = vector.load %arg2[%c2, %c0_13, %c0_14] : memref<9x8x16xf32, #tpu.memory_space<vmem>>, vector<1x8x16xf32>
    %19 = vector.shape_cast %18 : vector<1x8x16xf32> to vector<8x16xf32>
    %cst_15 = arith.constant 0.000000e+00 : f32
    %20 = vector.broadcast %cst_15 : f32 to vector<16x39xf32>
    %21 = vector.extract_strided_slice %1 {offsets = [0, 0], sizes = [16, 81], strides = [1, 1]} : vector<16x120xf32> to vector<16x81xf32>
    %22 = tpu.concatenate %20, %21 in 1 : vector<16x39xf32>, vector<16x81xf32> -> vector<16x120xf32>
    %cst_16 = arith.constant dense<0.000000e+00> : vector<8x120xf32>
    %23 = tpu.matmul %19, %22, %cst_16 {dimension_numbers = #tpu.dot_dimension_numbers<[1], [0], [0], [1], [0, 0, 1, 1], [], []>} : vector<8x16xf32>, vector<16x120xf32>, vector<8x120xf32> -> vector<8x120xf32>
    %24 = arith.addf %17, %23 : vector<8x120xf32>
    %c3 = arith.constant 3 : index
    %c0_17 = arith.constant 0 : index
    %c0_18 = arith.constant 0 : index
    %25 = vector.load %arg2[%c3, %c0_17, %c0_18] : memref<9x8x16xf32, #tpu.memory_space<vmem>>, vector<1x8x16xf32>
    %26 = vector.shape_cast %25 : vector<1x8x16xf32> to vector<8x16xf32>
    %cst_19 = arith.constant 0.000000e+00 : f32
    %27 = vector.broadcast %cst_19 : f32 to vector<16x21xf32>
    %28 = vector.extract_strided_slice %1 {offsets = [0, 0], sizes = [16, 99], strides = [1, 1]} : vector<16x120xf32> to vector<16x99xf32>
    %29 = tpu.concatenate %27, %28 in 1 : vector<16x21xf32>, vector<16x99xf32> -> vector<16x120xf32>
    %cst_20 = arith.constant dense<0.000000e+00> : vector<8x120xf32>
    %30 = tpu.matmul %26, %29, %cst_20 {dimension_numbers = #tpu.dot_dimension_numbers<[1], [0], [0], [1], [0, 0, 1, 1], [], []>} : vector<8x16xf32>, vector<16x120xf32>, vector<8x120xf32> -> vector<8x120xf32>
    %31 = arith.addf %24, %30 : vector<8x120xf32>
    %c4 = arith.constant 4 : index
    %c0_21 = arith.constant 0 : index
    %c0_22 = arith.constant 0 : index
    %32 = vector.load %arg2[%c4, %c0_21, %c0_22] : memref<9x8x16xf32, #tpu.memory_space<vmem>>, vector<1x8x16xf32>
    %33 = vector.shape_cast %32 : vector<1x8x16xf32> to vector<8x16xf32>
    %cst_23 = arith.constant 0.000000e+00 : f32
    %34 = vector.broadcast %cst_23 : f32 to vector<16x20xf32>
    %35 = vector.extract_strided_slice %1 {offsets = [0, 0], sizes = [16, 100], strides = [1, 1]} : vector<16x120xf32> to vector<16x100xf32>
    %36 = tpu.concatenate %34, %35 in 1 : vector<16x20xf32>, vector<16x100xf32> -> vector<16x120xf32>
    %cst_24 = arith.constant dense<0.000000e+00> : vector<8x120xf32>
    %37 = tpu.matmul %33, %36, %cst_24 {dimension_numbers = #tpu.dot_dimension_numbers<[1], [0], [0], [1], [0, 0, 1, 1], [], []>} : vector<8x16xf32>, vector<16x120xf32>, vector<8x120xf32> -> vector<8x120xf32>
    %38 = arith.addf %31, %37 : vector<8x120xf32>
    %c5 = arith.constant 5 : index
    %c0_25 = arith.constant 0 : index
    %c0_26 = arith.constant 0 : index
    %39 = vector.load %arg2[%c5, %c0_25, %c0_26] : memref<9x8x16xf32, #tpu.memory_space<vmem>>, vector<1x8x16xf32>
    %40 = vector.shape_cast %39 : vector<1x8x16xf32> to vector<8x16xf32>
    %cst_27 = arith.constant 0.000000e+00 : f32
    %41 = vector.broadcast %cst_27 : f32 to vector<16x19xf32>
    %42 = vector.extract_strided_slice %1 {offsets = [0, 0], sizes = [16, 101], strides = [1, 1]} : vector<16x120xf32> to vector<16x101xf32>
    %43 = tpu.concatenate %41, %42 in 1 : vector<16x19xf32>, vector<16x101xf32> -> vector<16x120xf32>
    %cst_28 = arith.constant dense<0.000000e+00> : vector<8x120xf32>
    %44 = tpu.matmul %40, %43, %cst_28 {dimension_numbers = #tpu.dot_dimension_numbers<[1], [0], [0], [1], [0, 0, 1, 1], [], []>} : vector<8x16xf32>, vector<16x120xf32>, vector<8x120xf32> -> vector<8x120xf32>
    %45 = arith.addf %38, %44 : vector<8x120xf32>
    %c6 = arith.constant 6 : index
    %c0_29 = arith.constant 0 : index
    %c0_30 = arith.constant 0 : index
    %46 = vector.load %arg2[%c6, %c0_29, %c0_30] : memref<9x8x16xf32, #tpu.memory_space<vmem>>, vector<1x8x16xf32>
    %47 = vector.shape_cast %46 : vector<1x8x16xf32> to vector<8x16xf32>
    %cst_31 = arith.constant 0.000000e+00 : f32
    %48 = vector.broadcast %cst_31 : f32 to vector<16x1xf32>
    %49 = vector.extract_strided_slice %1 {offsets = [0, 0], sizes = [16, 119], strides = [1, 1]} : vector<16x120xf32> to vector<16x119xf32>
    %50 = tpu.concatenate %48, %49 in 1 : vector<16x1xf32>, vector<16x119xf32> -> vector<16x120xf32>
    %cst_32 = arith.constant dense<0.000000e+00> : vector<8x120xf32>
    %51 = tpu.matmul %47, %50, %cst_32 {dimension_numbers = #tpu.dot_dimension_numbers<[1], [0], [0], [1], [0, 0, 1, 1], [], []>} : vector<8x16xf32>, vector<16x120xf32>, vector<8x120xf32> -> vector<8x120xf32>
    %52 = arith.addf %45, %51 : vector<8x120xf32>
    %c7 = arith.constant 7 : index
    %c0_33 = arith.constant 0 : index
    %c0_34 = arith.constant 0 : index
    %53 = vector.load %arg2[%c7, %c0_33, %c0_34] : memref<9x8x16xf32, #tpu.memory_space<vmem>>, vector<1x8x16xf32>
    %54 = vector.shape_cast %53 : vector<1x8x16xf32> to vector<8x16xf32>
    %cst_35 = arith.constant dense<0.000000e+00> : vector<8x120xf32>
    %55 = tpu.matmul %54, %1, %cst_35 {dimension_numbers = #tpu.dot_dimension_numbers<[1], [0], [0], [1], [0, 0, 1, 1], [], []>} : vector<8x16xf32>, vector<16x120xf32>, vector<8x120xf32> -> vector<8x120xf32>
    %56 = arith.addf %52, %55 : vector<8x120xf32>
    %c8 = arith.constant 8 : index
    %c0_36 = arith.constant 0 : index
    %c0_37 = arith.constant 0 : index
    %57 = vector.load %arg2[%c8, %c0_36, %c0_37] : memref<9x8x16xf32, #tpu.memory_space<vmem>>, vector<1x8x16xf32>
    %58 = vector.shape_cast %57 : vector<1x8x16xf32> to vector<8x16xf32>
    %59 = vector.extract_strided_slice %1 {offsets = [0, 1], sizes = [16, 119], strides = [1, 1]} : vector<16x120xf32> to vector<16x119xf32>
    %cst_38 = arith.constant 0.000000e+00 : f32
    %60 = vector.broadcast %cst_38 : f32 to vector<16x1xf32>
    %61 = tpu.concatenate %59, %60 in 1 : vector<16x119xf32>, vector<16x1xf32> -> vector<16x120xf32>
    %cst_39 = arith.constant dense<0.000000e+00> : vector<8x120xf32>
    %62 = tpu.matmul %58, %61, %cst_39 {dimension_numbers = #tpu.dot_dimension_numbers<[1], [0], [0], [1], [0, 0, 1, 1], [], []>} : vector<8x16xf32>, vector<16x120xf32>, vector<8x120xf32> -> vector<8x120xf32>
    %63 = arith.addf %56, %62 : vector<8x120xf32>
    %c0_40 = arith.constant 0 : index
    %c0_41 = arith.constant 0 : index
    %64 = vector.load %arg3[%c0_40, %c0_41] : memref<8x1xf32, #tpu.memory_space<vmem>>, vector<8x1xf32>
    %65 = vector.broadcast %64 : vector<8x1xf32> to vector<8x120xf32>
    %66 = arith.addf %63, %65 : vector<8x120xf32>
    %67 = vector.broadcast %2 : vector<1x120xf32> to vector<8x120xf32>
    %68 = arith.mulf %66, %67 : vector<8x120xf32>
    %cst_42 = arith.constant dense<0.000000e+00> : vector<8xf32>
    %69 = vector.multi_reduction <add>, %68, %cst_42 [1] : vector<8x120xf32> to vector<8xf32>
    %70 = vector.shape_cast %69 : vector<8xf32> to vector<8x1xf32>
    %cst_43 = arith.constant 1.562500e-02 : f32
    %71 = vector.broadcast %cst_43 : f32 to vector<8x1xf32>
    %72 = arith.mulf %70, %71 : vector<8x1xf32>
    %73 = vector.broadcast %72 : vector<8x1xf32> to vector<8x120xf32>
    %74 = arith.subf %66, %73 : vector<8x120xf32>
    %75 = arith.mulf %74, %74 : vector<8x120xf32>
    %76 = vector.broadcast %2 : vector<1x120xf32> to vector<8x120xf32>
    %77 = arith.mulf %75, %76 : vector<8x120xf32>
    %cst_44 = arith.constant dense<0.000000e+00> : vector<8xf32>
    %78 = vector.multi_reduction <add>, %77, %cst_44 [1] : vector<8x120xf32> to vector<8xf32>
    %79 = vector.shape_cast %78 : vector<8xf32> to vector<8x1xf32>
    %cst_45 = arith.constant 1.562500e-02 : f32
    %80 = vector.broadcast %cst_45 : f32 to vector<8x1xf32>
    %81 = arith.mulf %79, %80 : vector<8x1xf32>
    %cst_46 = arith.constant 9.99999974E-6 : f32
    %82 = vector.broadcast %cst_46 : f32 to vector<8x1xf32>
    %83 = arith.addf %81, %82 : vector<8x1xf32>
    %84 = math.rsqrt %83 : vector<8x1xf32>
    %85 = vector.broadcast %84 : vector<8x1xf32> to vector<8x120xf32>
    %86 = arith.mulf %74, %85 : vector<8x120xf32>
    %cst_47 = arith.constant 0.000000e+00 : f32
    %87 = vector.broadcast %cst_47 : f32 to vector<8x120xf32>
    %88 = arith.cmpf oge, %86, %87 : vector<8x120xf32>
    %c0_48 = arith.constant 0 : index
    %c0_49 = arith.constant 0 : index
    %89 = vector.load %arg4[%c0_48, %c0_49] : memref<8x1xf32, #tpu.memory_space<vmem>>, vector<8x1xf32>
    %90 = vector.broadcast %89 : vector<8x1xf32> to vector<8x120xf32>
    %91 = arith.mulf %90, %86 : vector<8x120xf32>
    %92 = arith.select %88, %86, %91 : vector<8x120xi1>, vector<8x120xf32>
    %93 = vector.broadcast %2 : vector<1x120xf32> to vector<8x120xf32>
    %94 = arith.mulf %92, %93 : vector<8x120xf32>
    %c0_50 = arith.constant 0 : index
    %c0_51 = arith.constant 0 : index
    %c0_52 = arith.constant 0 : index
    %95 = vector.load %arg6[%c0_50, %c0_51, %c0_52] : memref<1x8x120xf32, #tpu.memory_space<vmem>>, vector<1x8x120xf32>
    %96 = vector.shape_cast %95 : vector<1x8x120xf32> to vector<8x120xf32>
    %97 = vector.shape_cast %94 : vector<8x120xf32> to vector<1x8x120xf32>
    tpu.vector_store %arg6[%c0_50, %c0_51, %c0_52], %97 {strides = array<i32>} : memref<1x8x120xf32, #tpu.memory_space<vmem>>, vector<1x8x120xf32>,
    return
  }
  func.func @transform_0(%arg0: i32) -> (i32, i32, i32) {
    %c0_i32 = arith.constant 0 : i32
    %c0_i32_0 = arith.constant 0 : i32
    %c0_i32_1 = arith.constant 0 : i32
    return %arg0, %c0_i32, %c0_i32_0 : i32, i32, i32
  }
  func.func @transform_1(%arg0: i32) -> (i32, i32, i32) {
    %c0_i32 = arith.constant 0 : i32
    %c0_i32_0 = arith.constant 0 : i32
    %c0_i32_1 = arith.constant 0 : i32
    %c0_i32_2 = arith.constant 0 : i32
    return %c0_i32, %c0_i32_0, %c0_i32_1 : i32, i32, i32
  }
  func.func @transform_2(%arg0: i32) -> (i32, i32) {
    %c0_i32 = arith.constant 0 : i32
    %c0_i32_0 = arith.constant 0 : i32
    %c0_i32_1 = arith.constant 0 : i32
    return %c0_i32, %c0_i32_0 : i32, i32
  }
  func.func @transform_3(%arg0: i32) -> (i32, i32) {
    %c0_i32 = arith.constant 0 : i32
    %c0_i32_0 = arith.constant 0 : i32
    %c0_i32_1 = arith.constant 0 : i32
    return %c0_i32, %c0_i32_0 : i32, i32
  }
  func.func @transform_4(%arg0: i32) -> (i32, i32) {
    %c0_i32 = arith.constant 0 : i32
    %c0_i32_0 = arith.constant 0 : i32
    %c0_i32_1 = arith.constant 0 : i32
    return %c0_i32, %c0_i32_0 : i32, i32
  }
  func.func @transform_5(%arg0: i32) -> (i32, i32, i32) {
    %c2_i32 = arith.constant 2 : i32
    %c0_i32 = arith.constant 0 : i32
    %c0_i32_0 = arith.constant 0 : i32
    return %arg0, %c2_i32, %c0_i32 : i32, i32, i32
  }
}

module attributes {stable_mosaic.version = 11 : i64} {
  func.func @_convKf_flat_kernel(%arg0: i32, %arg1: memref<1x8x64xf32, #tpu.memory_space<vmem>>, %arg2: memref<3x16x8xf32, #tpu.memory_space<vmem>>, %arg3: memref<16x1xf32, #tpu.memory_space<vmem>>, %arg4: memref<3x64xf32, #tpu.memory_space<vmem>>, %arg5: memref<1x16x64xf32, #tpu.memory_space<vmem>>) attributes {dimension_semantics = [#tpu.dimension_semantics<parallel>], iteration_bounds = array<i64: 2>, scalar_prefetch = 0 : i64, scratch_operands = 0 : i64, tpu.core_type = #tpu.core_type<tc>, window_params = [{transform_indices = @transform_0, window_bounds = array<i64: 1, 8, 64>}, {pipeline_mode = #tpu.pipeline_mode<synchronous>, transform_indices = @transform_1, window_bounds = array<i64: 3, 16, 8>}, {pipeline_mode = #tpu.pipeline_mode<synchronous>, transform_indices = @transform_2, window_bounds = array<i64: 16, 1>}, {pipeline_mode = #tpu.pipeline_mode<synchronous>, transform_indices = @transform_3, window_bounds = array<i64: 3, 64>}, {transform_indices = @transform_4, window_bounds = array<i64: 1, 16, 64>}]} {
    %c0 = arith.constant 0 : index
    %c0_0 = arith.constant 0 : index
    %c0_1 = arith.constant 0 : index
    %0 = vector.load %arg1[%c0, %c0_0, %c0_1] : memref<1x8x64xf32, #tpu.memory_space<vmem>>, vector<1x8x64xf32>
    %1 = vector.shape_cast %0 : vector<1x8x64xf32> to vector<8x64xf32>
    %c0_2 = arith.constant 0 : index
    %c0_3 = arith.constant 0 : index
    %2 = vector.load %arg4[%c0_2, %c0_3] : memref<3x64xf32, #tpu.memory_space<vmem>>, vector<3x64xf32>
    %cst = arith.constant 0.000000e+00 : f32
    %3 = vector.broadcast %cst : f32 to vector<16x64xf32>
    %c0_4 = arith.constant 0 : index
    %c0_5 = arith.constant 0 : index
    %c0_6 = arith.constant 0 : index
    %4 = vector.load %arg2[%c0_4, %c0_5, %c0_6] : memref<3x16x8xf32, #tpu.memory_space<vmem>>, vector<1x16x8xf32>
    %5 = vector.shape_cast %4 : vector<1x16x8xf32> to vector<16x8xf32>
    %cst_7 = arith.constant 0.000000e+00 : f32
    %6 = vector.broadcast %cst_7 : f32 to vector<8x1xf32>
    %7 = vector.extract_strided_slice %1 {offsets = [0, 0], sizes = [8, 63], strides = [1, 1]} : vector<8x64xf32> to vector<8x63xf32>
    %8 = tpu.concatenate %6, %7 in 1 : vector<8x1xf32>, vector<8x63xf32> -> vector<8x64xf32>
    %9 = vector.extract_strided_slice %2 {offsets = [0, 0], sizes = [1, 64], strides = [1, 1]} : vector<3x64xf32> to vector<1x64xf32>
    %10 = vector.broadcast %9 : vector<1x64xf32> to vector<8x64xf32>
    %11 = arith.mulf %8, %10 : vector<8x64xf32>
    %cst_8 = arith.constant dense<0.000000e+00> : vector<16x64xf32>
    %12 = tpu.matmul %5, %11, %cst_8 {dimension_numbers = #tpu.dot_dimension_numbers<[1], [0], [0], [1], [0, 0, 1, 1], [], []>} : vector<16x8xf32>, vector<8x64xf32>, vector<16x64xf32> -> vector<16x64xf32>
    %13 = arith.addf %3, %12 : vector<16x64xf32>
    %c1 = arith.constant 1 : index
    %c0_9 = arith.constant 0 : index
    %c0_10 = arith.constant 0 : index
    %14 = vector.load %arg2[%c1, %c0_9, %c0_10] : memref<3x16x8xf32, #tpu.memory_space<vmem>>, vector<1x16x8xf32>
    %15 = vector.shape_cast %14 : vector<1x16x8xf32> to vector<16x8xf32>
    %16 = vector.extract_strided_slice %2 {offsets = [1, 0], sizes = [1, 64], strides = [1, 1]} : vector<3x64xf32> to vector<1x64xf32>
    %17 = vector.broadcast %16 : vector<1x64xf32> to vector<8x64xf32>
    %18 = arith.mulf %1, %17 : vector<8x64xf32>
    %cst_11 = arith.constant dense<0.000000e+00> : vector<16x64xf32>
    %19 = tpu.matmul %15, %18, %cst_11 {dimension_numbers = #tpu.dot_dimension_numbers<[1], [0], [0], [1], [0, 0, 1, 1], [], []>} : vector<16x8xf32>, vector<8x64xf32>, vector<16x64xf32> -> vector<16x64xf32>
    %20 = arith.addf %13, %19 : vector<16x64xf32>
    %c2 = arith.constant 2 : index
    %c0_12 = arith.constant 0 : index
    %c0_13 = arith.constant 0 : index
    %21 = vector.load %arg2[%c2, %c0_12, %c0_13] : memref<3x16x8xf32, #tpu.memory_space<vmem>>, vector<1x16x8xf32>
    %22 = vector.shape_cast %21 : vector<1x16x8xf32> to vector<16x8xf32>
    %23 = vector.extract_strided_slice %1 {offsets = [0, 1], sizes = [8, 63], strides = [1, 1]} : vector<8x64xf32> to vector<8x63xf32>
    %cst_14 = arith.constant 0.000000e+00 : f32
    %24 = vector.broadcast %cst_14 : f32 to vector<8x1xf32>
    %25 = tpu.concatenate %23, %24 in 1 : vector<8x63xf32>, vector<8x1xf32> -> vector<8x64xf32>
    %26 = vector.extract_strided_slice %2 {offsets = [2, 0], sizes = [1, 64], strides = [1, 1]} : vector<3x64xf32> to vector<1x64xf32>
    %27 = vector.broadcast %26 : vector<1x64xf32> to vector<8x64xf32>
    %28 = arith.mulf %25, %27 : vector<8x64xf32>
    %cst_15 = arith.constant dense<0.000000e+00> : vector<16x64xf32>
    %29 = tpu.matmul %22, %28, %cst_15 {dimension_numbers = #tpu.dot_dimension_numbers<[1], [0], [0], [1], [0, 0, 1, 1], [], []>} : vector<16x8xf32>, vector<8x64xf32>, vector<16x64xf32> -> vector<16x64xf32>
    %30 = arith.addf %20, %29 : vector<16x64xf32>
    %c0_16 = arith.constant 0 : index
    %c0_17 = arith.constant 0 : index
    %31 = vector.load %arg3[%c0_16, %c0_17] : memref<16x1xf32, #tpu.memory_space<vmem>>, vector<16x1xf32>
    %32 = vector.broadcast %31 : vector<16x1xf32> to vector<16x64xf32>
    %33 = arith.addf %30, %32 : vector<16x64xf32>
    %34 = vector.extract_strided_slice %2 {offsets = [1, 0], sizes = [1, 64], strides = [1, 1]} : vector<3x64xf32> to vector<1x64xf32>
    %35 = vector.broadcast %34 : vector<1x64xf32> to vector<16x64xf32>
    %36 = arith.mulf %33, %35 : vector<16x64xf32>
    %c0_18 = arith.constant 0 : index
    %c0_19 = arith.constant 0 : index
    %c0_20 = arith.constant 0 : index
    %37 = vector.load %arg5[%c0_18, %c0_19, %c0_20] : memref<1x16x64xf32, #tpu.memory_space<vmem>>, vector<1x16x64xf32>
    %38 = vector.shape_cast %37 : vector<1x16x64xf32> to vector<16x64xf32>
    %39 = vector.shape_cast %36 : vector<16x64xf32> to vector<1x16x64xf32>
    tpu.vector_store %arg5[%c0_18, %c0_19, %c0_20], %39 {strides = array<i32>} : memref<1x16x64xf32, #tpu.memory_space<vmem>>, vector<1x16x64xf32>,
    return
  }
  func.func @transform_0(%arg0: i32) -> (i32, i32, i32) {
    %c0_i32 = arith.constant 0 : i32
    %c0_i32_0 = arith.constant 0 : i32
    %c0_i32_1 = arith.constant 0 : i32
    return %arg0, %c0_i32, %c0_i32_0 : i32, i32, i32
  }
  func.func @transform_1(%arg0: i32) -> (i32, i32, i32) {
    %c0_i32 = arith.constant 0 : i32
    %c0_i32_0 = arith.constant 0 : i32
    %c0_i32_1 = arith.constant 0 : i32
    %c0_i32_2 = arith.constant 0 : i32
    return %c0_i32, %c0_i32_0, %c0_i32_1 : i32, i32, i32
  }
  func.func @transform_2(%arg0: i32) -> (i32, i32) {
    %c0_i32 = arith.constant 0 : i32
    %c0_i32_0 = arith.constant 0 : i32
    %c0_i32_1 = arith.constant 0 : i32
    return %c0_i32, %c0_i32_0 : i32, i32
  }
  func.func @transform_3(%arg0: i32) -> (i32, i32) {
    %c0_i32 = arith.constant 0 : i32
    %c0_i32_0 = arith.constant 0 : i32
    %c0_i32_1 = arith.constant 0 : i32
    return %c0_i32, %c0_i32_0 : i32, i32
  }
  func.func @transform_4(%arg0: i32) -> (i32, i32, i32) {
    %c0_i32 = arith.constant 0 : i32
    %c0_i32_0 = arith.constant 0 : i32
    %c0_i32_1 = arith.constant 0 : i32
    return %arg0, %c0_i32, %c0_i32_0 : i32, i32, i32
  }
}

module attributes {stable_mosaic.version = 11 : i64} {
  func.func @_convKf_flat_kernel(%arg0: i32, %arg1: memref<1x8x128xf32, #tpu.memory_space<vmem>>, %arg2: memref<3x16x8xf32, #tpu.memory_space<vmem>>, %arg3: memref<16x1xf32, #tpu.memory_space<vmem>>, %arg4: memref<3x128xf32, #tpu.memory_space<vmem>>, %arg5: memref<1x16x128xf32, #tpu.memory_space<vmem>>) attributes {dimension_semantics = [#tpu.dimension_semantics<parallel>], iteration_bounds = array<i64: 2>, scalar_prefetch = 0 : i64, scratch_operands = 0 : i64, tpu.core_type = #tpu.core_type<tc>, window_params = [{transform_indices = @transform_0, window_bounds = array<i64: 1, 8, 128>}, {pipeline_mode = #tpu.pipeline_mode<synchronous>, transform_indices = @transform_1, window_bounds = array<i64: 3, 16, 8>}, {pipeline_mode = #tpu.pipeline_mode<synchronous>, transform_indices = @transform_2, window_bounds = array<i64: 16, 1>}, {pipeline_mode = #tpu.pipeline_mode<synchronous>, transform_indices = @transform_3, window_bounds = array<i64: 3, 128>}, {transform_indices = @transform_4, window_bounds = array<i64: 1, 16, 128>}]} {
    %c0 = arith.constant 0 : index
    %c0_0 = arith.constant 0 : index
    %c0_1 = arith.constant 0 : index
    %0 = vector.load %arg1[%c0, %c0_0, %c0_1] : memref<1x8x128xf32, #tpu.memory_space<vmem>>, vector<1x8x128xf32>
    %1 = vector.shape_cast %0 : vector<1x8x128xf32> to vector<8x128xf32>
    %c0_2 = arith.constant 0 : index
    %c0_3 = arith.constant 0 : index
    %2 = vector.load %arg4[%c0_2, %c0_3] : memref<3x128xf32, #tpu.memory_space<vmem>>, vector<3x128xf32>
    %cst = arith.constant 0.000000e+00 : f32
    %3 = vector.broadcast %cst : f32 to vector<16x128xf32>
    %c0_4 = arith.constant 0 : index
    %c0_5 = arith.constant 0 : index
    %c0_6 = arith.constant 0 : index
    %4 = vector.load %arg2[%c0_4, %c0_5, %c0_6] : memref<3x16x8xf32, #tpu.memory_space<vmem>>, vector<1x16x8xf32>
    %5 = vector.shape_cast %4 : vector<1x16x8xf32> to vector<16x8xf32>
    %cst_7 = arith.constant 0.000000e+00 : f32
    %6 = vector.broadcast %cst_7 : f32 to vector<8x1xf32>
    %7 = vector.extract_strided_slice %1 {offsets = [0, 0], sizes = [8, 127], strides = [1, 1]} : vector<8x128xf32> to vector<8x127xf32>
    %8 = tpu.concatenate %6, %7 in 1 : vector<8x1xf32>, vector<8x127xf32> -> vector<8x128xf32>
    %9 = vector.extract_strided_slice %2 {offsets = [0, 0], sizes = [1, 128], strides = [1, 1]} : vector<3x128xf32> to vector<1x128xf32>
    %10 = vector.broadcast %9 : vector<1x128xf32> to vector<8x128xf32>
    %11 = arith.mulf %8, %10 : vector<8x128xf32>
    %cst_8 = arith.constant dense<0.000000e+00> : vector<16x128xf32>
    %12 = tpu.matmul %5, %11, %cst_8 {dimension_numbers = #tpu.dot_dimension_numbers<[1], [0], [0], [1], [0, 0, 1, 1], [], []>} : vector<16x8xf32>, vector<8x128xf32>, vector<16x128xf32> -> vector<16x128xf32>
    %13 = arith.addf %3, %12 : vector<16x128xf32>
    %c1 = arith.constant 1 : index
    %c0_9 = arith.constant 0 : index
    %c0_10 = arith.constant 0 : index
    %14 = vector.load %arg2[%c1, %c0_9, %c0_10] : memref<3x16x8xf32, #tpu.memory_space<vmem>>, vector<1x16x8xf32>
    %15 = vector.shape_cast %14 : vector<1x16x8xf32> to vector<16x8xf32>
    %16 = vector.extract_strided_slice %2 {offsets = [1, 0], sizes = [1, 128], strides = [1, 1]} : vector<3x128xf32> to vector<1x128xf32>
    %17 = vector.broadcast %16 : vector<1x128xf32> to vector<8x128xf32>
    %18 = arith.mulf %1, %17 : vector<8x128xf32>
    %cst_11 = arith.constant dense<0.000000e+00> : vector<16x128xf32>
    %19 = tpu.matmul %15, %18, %cst_11 {dimension_numbers = #tpu.dot_dimension_numbers<[1], [0], [0], [1], [0, 0, 1, 1], [], []>} : vector<16x8xf32>, vector<8x128xf32>, vector<16x128xf32> -> vector<16x128xf32>
    %20 = arith.addf %13, %19 : vector<16x128xf32>
    %c2 = arith.constant 2 : index
    %c0_12 = arith.constant 0 : index
    %c0_13 = arith.constant 0 : index
    %21 = vector.load %arg2[%c2, %c0_12, %c0_13] : memref<3x16x8xf32, #tpu.memory_space<vmem>>, vector<1x16x8xf32>
    %22 = vector.shape_cast %21 : vector<1x16x8xf32> to vector<16x8xf32>
    %23 = vector.extract_strided_slice %1 {offsets = [0, 1], sizes = [8, 127], strides = [1, 1]} : vector<8x128xf32> to vector<8x127xf32>
    %cst_14 = arith.constant 0.000000e+00 : f32
    %24 = vector.broadcast %cst_14 : f32 to vector<8x1xf32>
    %25 = tpu.concatenate %23, %24 in 1 : vector<8x127xf32>, vector<8x1xf32> -> vector<8x128xf32>
    %26 = vector.extract_strided_slice %2 {offsets = [2, 0], sizes = [1, 128], strides = [1, 1]} : vector<3x128xf32> to vector<1x128xf32>
    %27 = vector.broadcast %26 : vector<1x128xf32> to vector<8x128xf32>
    %28 = arith.mulf %25, %27 : vector<8x128xf32>
    %cst_15 = arith.constant dense<0.000000e+00> : vector<16x128xf32>
    %29 = tpu.matmul %22, %28, %cst_15 {dimension_numbers = #tpu.dot_dimension_numbers<[1], [0], [0], [1], [0, 0, 1, 1], [], []>} : vector<16x8xf32>, vector<8x128xf32>, vector<16x128xf32> -> vector<16x128xf32>
    %30 = arith.addf %20, %29 : vector<16x128xf32>
    %c0_16 = arith.constant 0 : index
    %c0_17 = arith.constant 0 : index
    %31 = vector.load %arg3[%c0_16, %c0_17] : memref<16x1xf32, #tpu.memory_space<vmem>>, vector<16x1xf32>
    %32 = vector.broadcast %31 : vector<16x1xf32> to vector<16x128xf32>
    %33 = arith.addf %30, %32 : vector<16x128xf32>
    %34 = vector.extract_strided_slice %2 {offsets = [1, 0], sizes = [1, 128], strides = [1, 1]} : vector<3x128xf32> to vector<1x128xf32>
    %35 = vector.broadcast %34 : vector<1x128xf32> to vector<16x128xf32>
    %36 = arith.mulf %33, %35 : vector<16x128xf32>
    %c0_18 = arith.constant 0 : index
    %c0_19 = arith.constant 0 : index
    %c0_20 = arith.constant 0 : index
    %37 = vector.load %arg5[%c0_18, %c0_19, %c0_20] : memref<1x16x128xf32, #tpu.memory_space<vmem>>, vector<1x16x128xf32>
    %38 = vector.shape_cast %37 : vector<1x16x128xf32> to vector<16x128xf32>
    %39 = vector.shape_cast %36 : vector<16x128xf32> to vector<1x16x128xf32>
    tpu.vector_store %arg5[%c0_18, %c0_19, %c0_20], %39 {strides = array<i32>} : memref<1x16x128xf32, #tpu.memory_space<vmem>>, vector<1x16x128xf32>,
    return
  }
  func.func @transform_0(%arg0: i32) -> (i32, i32, i32) {
    %c0_i32 = arith.constant 0 : i32
    %c0_i32_0 = arith.constant 0 : i32
    %c0_i32_1 = arith.constant 0 : i32
    return %arg0, %c0_i32, %c0_i32_0 : i32, i32, i32
  }
  func.func @transform_1(%arg0: i32) -> (i32, i32, i32) {
    %c0_i32 = arith.constant 0 : i32
    %c0_i32_0 = arith.constant 0 : i32
    %c0_i32_1 = arith.constant 0 : i32
    %c0_i32_2 = arith.constant 0 : i32
    return %c0_i32, %c0_i32_0, %c0_i32_1 : i32, i32, i32
  }
  func.func @transform_2(%arg0: i32) -> (i32, i32) {
    %c0_i32 = arith.constant 0 : i32
    %c0_i32_0 = arith.constant 0 : i32
    %c0_i32_1 = arith.constant 0 : i32
    return %c0_i32, %c0_i32_0 : i32, i32
  }
  func.func @transform_3(%arg0: i32) -> (i32, i32) {
    %c0_i32 = arith.constant 0 : i32
    %c0_i32_0 = arith.constant 0 : i32
    %c0_i32_1 = arith.constant 0 : i32
    return %c0_i32, %c0_i32_0 : i32, i32
  }
  func.func @transform_4(%arg0: i32) -> (i32, i32, i32) {
    %c0_i32 = arith.constant 0 : i32
    %c0_i32_0 = arith.constant 0 : i32
    %c0_i32_1 = arith.constant 0 : i32
    return %arg0, %c0_i32, %c0_i32_0 : i32, i32, i32
  }
}

module attributes {stable_mosaic.version = 11 : i64} {
  func.func @_lnp_conv2_lnp_flat_kernel(%arg0: i32, %arg1: memref<1x8x128xf32, #tpu.memory_space<vmem>>, %arg2: memref<1x128xf32, #tpu.memory_space<vmem>>, %arg3: memref<1x128xf32, #tpu.memory_space<vmem>>, %arg4: memref<8x1xf32, #tpu.memory_space<vmem>>, %arg5: memref<2x8x8xf32, #tpu.memory_space<vmem>>, %arg6: memref<8x1xf32, #tpu.memory_space<vmem>>, %arg7: memref<1x128xf32, #tpu.memory_space<vmem>>, %arg8: memref<1x128xf32, #tpu.memory_space<vmem>>, %arg9: memref<8x1xf32, #tpu.memory_space<vmem>>, %arg10: memref<128x8xf32, #tpu.memory_space<vmem>>, %arg11: memref<8x128xf32, #tpu.memory_space<vmem>>, %arg12: memref<1x128xf32, #tpu.memory_space<vmem>>, %arg13: memref<1x8x128xf32, #tpu.memory_space<vmem>>) attributes {dimension_semantics = [#tpu.dimension_semantics<parallel>], iteration_bounds = array<i64: 2>, scalar_prefetch = 0 : i64, scratch_operands = 0 : i64, tpu.core_type = #tpu.core_type<tc>, window_params = [{transform_indices = @transform_0, window_bounds = array<i64: 1, 8, 128>}, {pipeline_mode = #tpu.pipeline_mode<synchronous>, transform_indices = @transform_1, window_bounds = array<i64: 1, 128>}, {pipeline_mode = #tpu.pipeline_mode<synchronous>, transform_indices = @transform_2, window_bounds = array<i64: 1, 128>}, {pipeline_mode = #tpu.pipeline_mode<synchronous>, transform_indices = @transform_3, window_bounds = array<i64: 8, 1>}, {pipeline_mode = #tpu.pipeline_mode<synchronous>, transform_indices = @transform_4, window_bounds = array<i64: 2, 8, 8>}, {pipeline_mode = #tpu.pipeline_mode<synchronous>, transform_indices = @transform_5, window_bounds = array<i64: 8, 1>}, {pipeline_mode = #tpu.pipeline_mode<synchronous>, transform_indices = @transform_6, window_bounds = array<i64: 1, 128>}, {pipeline_mode = #tpu.pipeline_mode<synchronous>, transform_indices = @transform_7, window_bounds = array<i64: 1, 128>}, {pipeline_mode = #tpu.pipeline_mode<synchronous>, transform_indices = @transform_8, window_bounds = array<i64: 8, 1>}, {pipeline_mode = #tpu.pipeline_mode<synchronous>, transform_indices = @transform_9, window_bounds = array<i64: 128, 8>}, {pipeline_mode = #tpu.pipeline_mode<synchronous>, transform_indices = @transform_10, window_bounds = array<i64: 8, 128>}, {pipeline_mode = #tpu.pipeline_mode<synchronous>, transform_indices = @transform_11, window_bounds = array<i64: 1, 128>}, {transform_indices = @transform_12, window_bounds = array<i64: 1, 8, 128>}]} {
    %c0 = arith.constant 0 : index
    %c0_0 = arith.constant 0 : index
    %c0_1 = arith.constant 0 : index
    %0 = vector.load %arg1[%c0, %c0_0, %c0_1] : memref<1x8x128xf32, #tpu.memory_space<vmem>>, vector<1x8x128xf32>
    %1 = vector.shape_cast %0 : vector<1x8x128xf32> to vector<8x128xf32>
    %c0_2 = arith.constant 0 : index
    %c0_3 = arith.constant 0 : index
    %2 = vector.load %arg10[%c0_2, %c0_3] : memref<128x8xf32, #tpu.memory_space<vmem>>, vector<128x8xf32>
    %c0_4 = arith.constant 0 : index
    %c0_5 = arith.constant 0 : index
    %3 = vector.load %arg11[%c0_4, %c0_5] : memref<8x128xf32, #tpu.memory_space<vmem>>, vector<8x128xf32>
    %c0_6 = arith.constant 0 : index
    %c0_7 = arith.constant 0 : index
    %4 = vector.load %arg12[%c0_6, %c0_7] : memref<1x128xf32, #tpu.memory_space<vmem>>, vector<1x128xf32>
    %cst = arith.constant dense<0.000000e+00> : vector<8x8xf32>
    %5 = tpu.matmul %1, %2, %cst {dimension_numbers = #tpu.dot_dimension_numbers<[1], [0], [0], [1], [0, 0, 1, 1], [], []>} : vector<8x128xf32>, vector<128x8xf32>, vector<8x8xf32> -> vector<8x8xf32>
    %cst_8 = arith.constant dense<0.000000e+00> : vector<8x128xf32>
    %6 = tpu.matmul %5, %3, %cst_8 {dimension_numbers = #tpu.dot_dimension_numbers<[1], [0], [0], [1], [0, 0, 1, 1], [], []>} : vector<8x8xf32>, vector<8x128xf32>, vector<8x128xf32> -> vector<8x128xf32>
    %cst_9 = arith.constant 6.250000e-02 : f32
    %7 = vector.broadcast %cst_9 : f32 to vector<8x128xf32>
    %8 = arith.mulf %6, %7 : vector<8x128xf32>
    %9 = arith.subf %1, %8 : vector<8x128xf32>
    %10 = arith.mulf %9, %9 : vector<8x128xf32>
    %cst_10 = arith.constant dense<0.000000e+00> : vector<8x8xf32>
    %11 = tpu.matmul %10, %2, %cst_10 {dimension_numbers = #tpu.dot_dimension_numbers<[1], [0], [0], [1], [0, 0, 1, 1], [], []>} : vector<8x128xf32>, vector<128x8xf32>, vector<8x8xf32> -> vector<8x8xf32>
    %cst_11 = arith.constant dense<0.000000e+00> : vector<8x128xf32>
    %12 = tpu.matmul %11, %3, %cst_11 {dimension_numbers = #tpu.dot_dimension_numbers<[1], [0], [0], [1], [0, 0, 1, 1], [], []>} : vector<8x8xf32>, vector<8x128xf32>, vector<8x128xf32> -> vector<8x128xf32>
    %cst_12 = arith.constant 6.250000e-02 : f32
    %13 = vector.broadcast %cst_12 : f32 to vector<8x128xf32>
    %14 = arith.mulf %12, %13 : vector<8x128xf32>
    %cst_13 = arith.constant 9.99999974E-6 : f32
    %15 = vector.broadcast %cst_13 : f32 to vector<8x128xf32>
    %16 = arith.addf %14, %15 : vector<8x128xf32>
    %17 = math.rsqrt %16 : vector<8x128xf32>
    %18 = arith.mulf %9, %17 : vector<8x128xf32>
    %c0_14 = arith.constant 0 : index
    %c0_15 = arith.constant 0 : index
    %19 = vector.load %arg2[%c0_14, %c0_15] : memref<1x128xf32, #tpu.memory_space<vmem>>, vector<1x128xf32>
    %20 = vector.broadcast %19 : vector<1x128xf32> to vector<8x128xf32>
    %21 = arith.mulf %18, %20 : vector<8x128xf32>
    %c0_16 = arith.constant 0 : index
    %c0_17 = arith.constant 0 : index
    %22 = vector.load %arg3[%c0_16, %c0_17] : memref<1x128xf32, #tpu.memory_space<vmem>>, vector<1x128xf32>
    %23 = vector.broadcast %22 : vector<1x128xf32> to vector<8x128xf32>
    %24 = arith.addf %21, %23 : vector<8x128xf32>
    %cst_18 = arith.constant 0.000000e+00 : f32
    %25 = vector.broadcast %cst_18 : f32 to vector<8x128xf32>
    %26 = arith.cmpf oge, %24, %25 : vector<8x128xf32>
    %c0_19 = arith.constant 0 : index
    %c0_20 = arith.constant 0 : index
    %27 = vector.load %arg4[%c0_19, %c0_20] : memref<8x1xf32, #tpu.memory_space<vmem>>, vector<8x1xf32>
    %28 = vector.broadcast %27 : vector<8x1xf32> to vector<8x128xf32>
    %29 = arith.mulf %28, %24 : vector<8x128xf32>
    %30 = arith.select %26, %24, %29 : vector<8x128xi1>, vector<8x128xf32>
    %c0_21 = arith.constant 0 : index
    %c0_22 = arith.constant 0 : index
    %c0_23 = arith.constant 0 : index
    %31 = vector.load %arg5[%c0_21, %c0_22, %c0_23] : memref<2x8x8xf32, #tpu.memory_space<vmem>>, vector<1x8x8xf32>
    %32 = vector.shape_cast %31 : vector<1x8x8xf32> to vector<8x8xf32>
    %cst_24 = arith.constant dense<0.000000e+00> : vector<8x128xf32>
    %33 = tpu.matmul %32, %30, %cst_24 {dimension_numbers = #tpu.dot_dimension_numbers<[1], [0], [0], [1], [0, 0, 1, 1], [], []>} : vector<8x8xf32>, vector<8x128xf32>, vector<8x128xf32> -> vector<8x128xf32>
    %c1 = arith.constant 1 : index
    %c0_25 = arith.constant 0 : index
    %c0_26 = arith.constant 0 : index
    %34 = vector.load %arg5[%c1, %c0_25, %c0_26] : memref<2x8x8xf32, #tpu.memory_space<vmem>>, vector<1x8x8xf32>
    %35 = vector.shape_cast %34 : vector<1x8x8xf32> to vector<8x8xf32>
    %36 = vector.extract_strided_slice %30 {offsets = [0, 1], sizes = [8, 127], strides = [1, 1]} : vector<8x128xf32> to vector<8x127xf32>
    %cst_27 = arith.constant 0.000000e+00 : f32
    %37 = vector.broadcast %cst_27 : f32 to vector<8x1xf32>
    %38 = tpu.concatenate %36, %37 in 1 : vector<8x127xf32>, vector<8x1xf32> -> vector<8x128xf32>
    %cst_28 = arith.constant dense<0.000000e+00> : vector<8x128xf32>
    %39 = tpu.matmul %35, %38, %cst_28 {dimension_numbers = #tpu.dot_dimension_numbers<[1], [0], [0], [1], [0, 0, 1, 1], [], []>} : vector<8x8xf32>, vector<8x128xf32>, vector<8x128xf32> -> vector<8x128xf32>
    %40 = arith.addf %33, %39 : vector<8x128xf32>
    %c0_29 = arith.constant 0 : index
    %c0_30 = arith.constant 0 : index
    %41 = vector.load %arg6[%c0_29, %c0_30] : memref<8x1xf32, #tpu.memory_space<vmem>>, vector<8x1xf32>
    %42 = vector.broadcast %41 : vector<8x1xf32> to vector<8x128xf32>
    %43 = arith.addf %40, %42 : vector<8x128xf32>
    %44 = vector.broadcast %4 : vector<1x128xf32> to vector<8x128xf32>
    %45 = arith.mulf %43, %44 : vector<8x128xf32>
    %cst_31 = arith.constant dense<0.000000e+00> : vector<8x8xf32>
    %46 = tpu.matmul %45, %2, %cst_31 {dimension_numbers = #tpu.dot_dimension_numbers<[1], [0], [0], [1], [0, 0, 1, 1], [], []>} : vector<8x128xf32>, vector<128x8xf32>, vector<8x8xf32> -> vector<8x8xf32>
    %cst_32 = arith.constant dense<0.000000e+00> : vector<8x128xf32>
    %47 = tpu.matmul %46, %3, %cst_32 {dimension_numbers = #tpu.dot_dimension_numbers<[1], [0], [0], [1], [0, 0, 1, 1], [], []>} : vector<8x8xf32>, vector<8x128xf32>, vector<8x128xf32> -> vector<8x128xf32>
    %cst_33 = arith.constant 0.0666666701 : f32
    %48 = vector.broadcast %cst_33 : f32 to vector<8x128xf32>
    %49 = arith.mulf %47, %48 : vector<8x128xf32>
    %50 = arith.subf %45, %49 : vector<8x128xf32>
    %51 = vector.broadcast %4 : vector<1x128xf32> to vector<8x128xf32>
    %52 = arith.mulf %50, %51 : vector<8x128xf32>
    %53 = arith.mulf %52, %52 : vector<8x128xf32>
    %cst_34 = arith.constant dense<0.000000e+00> : vector<8x8xf32>
    %54 = tpu.matmul %53, %2, %cst_34 {dimension_numbers = #tpu.dot_dimension_numbers<[1], [0], [0], [1], [0, 0, 1, 1], [], []>} : vector<8x128xf32>, vector<128x8xf32>, vector<8x8xf32> -> vector<8x8xf32>
    %cst_35 = arith.constant dense<0.000000e+00> : vector<8x128xf32>
    %55 = tpu.matmul %54, %3, %cst_35 {dimension_numbers = #tpu.dot_dimension_numbers<[1], [0], [0], [1], [0, 0, 1, 1], [], []>} : vector<8x8xf32>, vector<8x128xf32>, vector<8x128xf32> -> vector<8x128xf32>
    %cst_36 = arith.constant 0.0666666701 : f32
    %56 = vector.broadcast %cst_36 : f32 to vector<8x128xf32>
    %57 = arith.mulf %55, %56 : vector<8x128xf32>
    %cst_37 = arith.constant 9.99999974E-6 : f32
    %58 = vector.broadcast %cst_37 : f32 to vector<8x128xf32>
    %59 = arith.addf %57, %58 : vector<8x128xf32>
    %60 = math.rsqrt %59 : vector<8x128xf32>
    %61 = arith.mulf %52, %60 : vector<8x128xf32>
    %c0_38 = arith.constant 0 : index
    %c0_39 = arith.constant 0 : index
    %62 = vector.load %arg7[%c0_38, %c0_39] : memref<1x128xf32, #tpu.memory_space<vmem>>, vector<1x128xf32>
    %63 = vector.broadcast %62 : vector<1x128xf32> to vector<8x128xf32>
    %64 = arith.mulf %61, %63 : vector<8x128xf32>
    %c0_40 = arith.constant 0 : index
    %c0_41 = arith.constant 0 : index
    %65 = vector.load %arg8[%c0_40, %c0_41] : memref<1x128xf32, #tpu.memory_space<vmem>>, vector<1x128xf32>
    %66 = vector.broadcast %65 : vector<1x128xf32> to vector<8x128xf32>
    %67 = arith.addf %64, %66 : vector<8x128xf32>
    %cst_42 = arith.constant 0.000000e+00 : f32
    %68 = vector.broadcast %cst_42 : f32 to vector<8x128xf32>
    %69 = arith.cmpf oge, %67, %68 : vector<8x128xf32>
    %c0_43 = arith.constant 0 : index
    %c0_44 = arith.constant 0 : index
    %70 = vector.load %arg9[%c0_43, %c0_44] : memref<8x1xf32, #tpu.memory_space<vmem>>, vector<8x1xf32>
    %71 = vector.broadcast %70 : vector<8x1xf32> to vector<8x128xf32>
    %72 = arith.mulf %71, %67 : vector<8x128xf32>
    %73 = arith.select %69, %67, %72 : vector<8x128xi1>, vector<8x128xf32>
    %74 = vector.broadcast %4 : vector<1x128xf32> to vector<8x128xf32>
    %75 = arith.mulf %73, %74 : vector<8x128xf32>
    %c0_45 = arith.constant 0 : index
    %c0_46 = arith.constant 0 : index
    %c0_47 = arith.constant 0 : index
    %76 = vector.load %arg13[%c0_45, %c0_46, %c0_47] : memref<1x8x128xf32, #tpu.memory_space<vmem>>, vector<1x8x128xf32>
    %77 = vector.shape_cast %76 : vector<1x8x128xf32> to vector<8x128xf32>
    %78 = vector.shape_cast %75 : vector<8x128xf32> to vector<1x8x128xf32>
    tpu.vector_store %arg13[%c0_45, %c0_46, %c0_47], %78 {strides = array<i32>} : memref<1x8x128xf32, #tpu.memory_space<vmem>>, vector<1x8x128xf32>,
    return
  }
  func.func @transform_0(%arg0: i32) -> (i32, i32, i32) {
    %c0_i32 = arith.constant 0 : i32
    %c0_i32_0 = arith.constant 0 : i32
    %c0_i32_1 = arith.constant 0 : i32
    return %arg0, %c0_i32, %c0_i32_0 : i32, i32, i32
  }
  func.func @transform_1(%arg0: i32) -> (i32, i32) {
    %c0_i32 = arith.constant 0 : i32
    %c0_i32_0 = arith.constant 0 : i32
    %c0_i32_1 = arith.constant 0 : i32
    return %c0_i32, %c0_i32_0 : i32, i32
  }
  func.func @transform_2(%arg0: i32) -> (i32, i32) {
    %c0_i32 = arith.constant 0 : i32
    %c0_i32_0 = arith.constant 0 : i32
    %c0_i32_1 = arith.constant 0 : i32
    return %c0_i32, %c0_i32_0 : i32, i32
  }
  func.func @transform_3(%arg0: i32) -> (i32, i32) {
    %c0_i32 = arith.constant 0 : i32
    %c0_i32_0 = arith.constant 0 : i32
    %c0_i32_1 = arith.constant 0 : i32
    return %c0_i32, %c0_i32_0 : i32, i32
  }
  func.func @transform_4(%arg0: i32) -> (i32, i32, i32) {
    %c0_i32 = arith.constant 0 : i32
    %c0_i32_0 = arith.constant 0 : i32
    %c0_i32_1 = arith.constant 0 : i32
    %c0_i32_2 = arith.constant 0 : i32
    return %c0_i32, %c0_i32_0, %c0_i32_1 : i32, i32, i32
  }
  func.func @transform_5(%arg0: i32) -> (i32, i32) {
    %c0_i32 = arith.constant 0 : i32
    %c0_i32_0 = arith.constant 0 : i32
    %c0_i32_1 = arith.constant 0 : i32
    return %c0_i32, %c0_i32_0 : i32, i32
  }
  func.func @transform_6(%arg0: i32) -> (i32, i32) {
    %c0_i32 = arith.constant 0 : i32
    %c0_i32_0 = arith.constant 0 : i32
    %c0_i32_1 = arith.constant 0 : i32
    return %c0_i32, %c0_i32_0 : i32, i32
  }
  func.func @transform_7(%arg0: i32) -> (i32, i32) {
    %c0_i32 = arith.constant 0 : i32
    %c0_i32_0 = arith.constant 0 : i32
    %c0_i32_1 = arith.constant 0 : i32
    return %c0_i32, %c0_i32_0 : i32, i32
  }
  func.func @transform_8(%arg0: i32) -> (i32, i32) {
    %c0_i32 = arith.constant 0 : i32
    %c0_i32_0 = arith.constant 0 : i32
    %c0_i32_1 = arith.constant 0 : i32
    return %c0_i32, %c0_i32_0 : i32, i32
  }
  func.func @transform_9(%arg0: i32) -> (i32, i32) {
    %c0_i32 = arith.constant 0 : i32
    %c0_i32_0 = arith.constant 0 : i32
    %c0_i32_1 = arith.constant 0 : i32
    return %c0_i32, %c0_i32_0 : i32, i32
  }
  func.func @transform_10(%arg0: i32) -> (i32, i32) {
    %c0_i32 = arith.constant 0 : i32
    %c0_i32_0 = arith.constant 0 : i32
    %c0_i32_1 = arith.constant 0 : i32
    return %c0_i32, %c0_i32_0 : i32, i32
  }
  func.func @transform_11(%arg0: i32) -> (i32, i32) {
    %c0_i32 = arith.constant 0 : i32
    %c0_i32_0 = arith.constant 0 : i32
    %c0_i32_1 = arith.constant 0 : i32
    return %c0_i32, %c0_i32_0 : i32, i32
  }
  func.func @transform_12(%arg0: i32) -> (i32, i32, i32) {
    %c0_i32 = arith.constant 0 : i32
    %c0_i32_0 = arith.constant 0 : i32
    %c0_i32_1 = arith.constant 0 : i32
    return %arg0, %c0_i32, %c0_i32_0 : i32, i32, i32
  }
}

module attributes {stable_mosaic.version = 11 : i64} {
  func.func @_lnp_conv2_lnp_flat_kernel(%arg0: i32, %arg1: memref<1x8x240xf32, #tpu.memory_space<vmem>>, %arg2: memref<1x240xf32, #tpu.memory_space<vmem>>, %arg3: memref<1x240xf32, #tpu.memory_space<vmem>>, %arg4: memref<8x1xf32, #tpu.memory_space<vmem>>, %arg5: memref<2x8x8xf32, #tpu.memory_space<vmem>>, %arg6: memref<8x1xf32, #tpu.memory_space<vmem>>, %arg7: memref<1x240xf32, #tpu.memory_space<vmem>>, %arg8: memref<1x240xf32, #tpu.memory_space<vmem>>, %arg9: memref<8x1xf32, #tpu.memory_space<vmem>>, %arg10: memref<240x8xf32, #tpu.memory_space<vmem>>, %arg11: memref<8x240xf32, #tpu.memory_space<vmem>>, %arg12: memref<1x240xf32, #tpu.memory_space<vmem>>, %arg13: memref<1x8x240xf32, #tpu.memory_space<vmem>>) attributes {dimension_semantics = [#tpu.dimension_semantics<parallel>], iteration_bounds = array<i64: 2>, scalar_prefetch = 0 : i64, scratch_operands = 0 : i64, tpu.core_type = #tpu.core_type<tc>, window_params = [{transform_indices = @transform_0, window_bounds = array<i64: 1, 8, 240>}, {pipeline_mode = #tpu.pipeline_mode<synchronous>, transform_indices = @transform_1, window_bounds = array<i64: 1, 240>}, {pipeline_mode = #tpu.pipeline_mode<synchronous>, transform_indices = @transform_2, window_bounds = array<i64: 1, 240>}, {pipeline_mode = #tpu.pipeline_mode<synchronous>, transform_indices = @transform_3, window_bounds = array<i64: 8, 1>}, {pipeline_mode = #tpu.pipeline_mode<synchronous>, transform_indices = @transform_4, window_bounds = array<i64: 2, 8, 8>}, {pipeline_mode = #tpu.pipeline_mode<synchronous>, transform_indices = @transform_5, window_bounds = array<i64: 8, 1>}, {pipeline_mode = #tpu.pipeline_mode<synchronous>, transform_indices = @transform_6, window_bounds = array<i64: 1, 240>}, {pipeline_mode = #tpu.pipeline_mode<synchronous>, transform_indices = @transform_7, window_bounds = array<i64: 1, 240>}, {pipeline_mode = #tpu.pipeline_mode<synchronous>, transform_indices = @transform_8, window_bounds = array<i64: 8, 1>}, {pipeline_mode = #tpu.pipeline_mode<synchronous>, transform_indices = @transform_9, window_bounds = array<i64: 240, 8>}, {pipeline_mode = #tpu.pipeline_mode<synchronous>, transform_indices = @transform_10, window_bounds = array<i64: 8, 240>}, {pipeline_mode = #tpu.pipeline_mode<synchronous>, transform_indices = @transform_11, window_bounds = array<i64: 1, 240>}, {transform_indices = @transform_12, window_bounds = array<i64: 1, 8, 240>}]} {
    %c0 = arith.constant 0 : index
    %c0_0 = arith.constant 0 : index
    %c0_1 = arith.constant 0 : index
    %0 = vector.load %arg1[%c0, %c0_0, %c0_1] : memref<1x8x240xf32, #tpu.memory_space<vmem>>, vector<1x8x240xf32>
    %1 = vector.shape_cast %0 : vector<1x8x240xf32> to vector<8x240xf32>
    %c0_2 = arith.constant 0 : index
    %c0_3 = arith.constant 0 : index
    %2 = vector.load %arg10[%c0_2, %c0_3] : memref<240x8xf32, #tpu.memory_space<vmem>>, vector<240x8xf32>
    %c0_4 = arith.constant 0 : index
    %c0_5 = arith.constant 0 : index
    %3 = vector.load %arg11[%c0_4, %c0_5] : memref<8x240xf32, #tpu.memory_space<vmem>>, vector<8x240xf32>
    %c0_6 = arith.constant 0 : index
    %c0_7 = arith.constant 0 : index
    %4 = vector.load %arg12[%c0_6, %c0_7] : memref<1x240xf32, #tpu.memory_space<vmem>>, vector<1x240xf32>
    %cst = arith.constant dense<0.000000e+00> : vector<8x8xf32>
    %5 = tpu.matmul %1, %2, %cst {dimension_numbers = #tpu.dot_dimension_numbers<[1], [0], [0], [1], [0, 0, 1, 1], [], []>} : vector<8x240xf32>, vector<240x8xf32>, vector<8x8xf32> -> vector<8x8xf32>
    %cst_8 = arith.constant dense<0.000000e+00> : vector<8x240xf32>
    %6 = tpu.matmul %5, %3, %cst_8 {dimension_numbers = #tpu.dot_dimension_numbers<[1], [0], [0], [1], [0, 0, 1, 1], [], []>} : vector<8x8xf32>, vector<8x240xf32>, vector<8x240xf32> -> vector<8x240xf32>
    %cst_9 = arith.constant 0.0333333351 : f32
    %7 = vector.broadcast %cst_9 : f32 to vector<8x240xf32>
    %8 = arith.mulf %6, %7 : vector<8x240xf32>
    %9 = arith.subf %1, %8 : vector<8x240xf32>
    %10 = arith.mulf %9, %9 : vector<8x240xf32>
    %cst_10 = arith.constant dense<0.000000e+00> : vector<8x8xf32>
    %11 = tpu.matmul %10, %2, %cst_10 {dimension_numbers = #tpu.dot_dimension_numbers<[1], [0], [0], [1], [0, 0, 1, 1], [], []>} : vector<8x240xf32>, vector<240x8xf32>, vector<8x8xf32> -> vector<8x8xf32>
    %cst_11 = arith.constant dense<0.000000e+00> : vector<8x240xf32>
    %12 = tpu.matmul %11, %3, %cst_11 {dimension_numbers = #tpu.dot_dimension_numbers<[1], [0], [0], [1], [0, 0, 1, 1], [], []>} : vector<8x8xf32>, vector<8x240xf32>, vector<8x240xf32> -> vector<8x240xf32>
    %cst_12 = arith.constant 0.0333333351 : f32
    %13 = vector.broadcast %cst_12 : f32 to vector<8x240xf32>
    %14 = arith.mulf %12, %13 : vector<8x240xf32>
    %cst_13 = arith.constant 9.99999974E-6 : f32
    %15 = vector.broadcast %cst_13 : f32 to vector<8x240xf32>
    %16 = arith.addf %14, %15 : vector<8x240xf32>
    %17 = math.rsqrt %16 : vector<8x240xf32>
    %18 = arith.mulf %9, %17 : vector<8x240xf32>
    %c0_14 = arith.constant 0 : index
    %c0_15 = arith.constant 0 : index
    %19 = vector.load %arg2[%c0_14, %c0_15] : memref<1x240xf32, #tpu.memory_space<vmem>>, vector<1x240xf32>
    %20 = vector.broadcast %19 : vector<1x240xf32> to vector<8x240xf32>
    %21 = arith.mulf %18, %20 : vector<8x240xf32>
    %c0_16 = arith.constant 0 : index
    %c0_17 = arith.constant 0 : index
    %22 = vector.load %arg3[%c0_16, %c0_17] : memref<1x240xf32, #tpu.memory_space<vmem>>, vector<1x240xf32>
    %23 = vector.broadcast %22 : vector<1x240xf32> to vector<8x240xf32>
    %24 = arith.addf %21, %23 : vector<8x240xf32>
    %cst_18 = arith.constant 0.000000e+00 : f32
    %25 = vector.broadcast %cst_18 : f32 to vector<8x240xf32>
    %26 = arith.cmpf oge, %24, %25 : vector<8x240xf32>
    %c0_19 = arith.constant 0 : index
    %c0_20 = arith.constant 0 : index
    %27 = vector.load %arg4[%c0_19, %c0_20] : memref<8x1xf32, #tpu.memory_space<vmem>>, vector<8x1xf32>
    %28 = vector.broadcast %27 : vector<8x1xf32> to vector<8x240xf32>
    %29 = arith.mulf %28, %24 : vector<8x240xf32>
    %30 = arith.select %26, %24, %29 : vector<8x240xi1>, vector<8x240xf32>
    %c0_21 = arith.constant 0 : index
    %c0_22 = arith.constant 0 : index
    %c0_23 = arith.constant 0 : index
    %31 = vector.load %arg5[%c0_21, %c0_22, %c0_23] : memref<2x8x8xf32, #tpu.memory_space<vmem>>, vector<1x8x8xf32>
    %32 = vector.shape_cast %31 : vector<1x8x8xf32> to vector<8x8xf32>
    %cst_24 = arith.constant dense<0.000000e+00> : vector<8x240xf32>
    %33 = tpu.matmul %32, %30, %cst_24 {dimension_numbers = #tpu.dot_dimension_numbers<[1], [0], [0], [1], [0, 0, 1, 1], [], []>} : vector<8x8xf32>, vector<8x240xf32>, vector<8x240xf32> -> vector<8x240xf32>
    %c1 = arith.constant 1 : index
    %c0_25 = arith.constant 0 : index
    %c0_26 = arith.constant 0 : index
    %34 = vector.load %arg5[%c1, %c0_25, %c0_26] : memref<2x8x8xf32, #tpu.memory_space<vmem>>, vector<1x8x8xf32>
    %35 = vector.shape_cast %34 : vector<1x8x8xf32> to vector<8x8xf32>
    %36 = vector.extract_strided_slice %30 {offsets = [0, 1], sizes = [8, 239], strides = [1, 1]} : vector<8x240xf32> to vector<8x239xf32>
    %cst_27 = arith.constant 0.000000e+00 : f32
    %37 = vector.broadcast %cst_27 : f32 to vector<8x1xf32>
    %38 = tpu.concatenate %36, %37 in 1 : vector<8x239xf32>, vector<8x1xf32> -> vector<8x240xf32>
    %cst_28 = arith.constant dense<0.000000e+00> : vector<8x240xf32>
    %39 = tpu.matmul %35, %38, %cst_28 {dimension_numbers = #tpu.dot_dimension_numbers<[1], [0], [0], [1], [0, 0, 1, 1], [], []>} : vector<8x8xf32>, vector<8x240xf32>, vector<8x240xf32> -> vector<8x240xf32>
    %40 = arith.addf %33, %39 : vector<8x240xf32>
    %c0_29 = arith.constant 0 : index
    %c0_30 = arith.constant 0 : index
    %41 = vector.load %arg6[%c0_29, %c0_30] : memref<8x1xf32, #tpu.memory_space<vmem>>, vector<8x1xf32>
    %42 = vector.broadcast %41 : vector<8x1xf32> to vector<8x240xf32>
    %43 = arith.addf %40, %42 : vector<8x240xf32>
    %44 = vector.broadcast %4 : vector<1x240xf32> to vector<8x240xf32>
    %45 = arith.mulf %43, %44 : vector<8x240xf32>
    %cst_31 = arith.constant dense<0.000000e+00> : vector<8x8xf32>
    %46 = tpu.matmul %45, %2, %cst_31 {dimension_numbers = #tpu.dot_dimension_numbers<[1], [0], [0], [1], [0, 0, 1, 1], [], []>} : vector<8x240xf32>, vector<240x8xf32>, vector<8x8xf32> -> vector<8x8xf32>
    %cst_32 = arith.constant dense<0.000000e+00> : vector<8x240xf32>
    %47 = tpu.matmul %46, %3, %cst_32 {dimension_numbers = #tpu.dot_dimension_numbers<[1], [0], [0], [1], [0, 0, 1, 1], [], []>} : vector<8x8xf32>, vector<8x240xf32>, vector<8x240xf32> -> vector<8x240xf32>
    %cst_33 = arith.constant 0.0344827585 : f32
    %48 = vector.broadcast %cst_33 : f32 to vector<8x240xf32>
    %49 = arith.mulf %47, %48 : vector<8x240xf32>
    %50 = arith.subf %45, %49 : vector<8x240xf32>
    %51 = vector.broadcast %4 : vector<1x240xf32> to vector<8x240xf32>
    %52 = arith.mulf %50, %51 : vector<8x240xf32>
    %53 = arith.mulf %52, %52 : vector<8x240xf32>
    %cst_34 = arith.constant dense<0.000000e+00> : vector<8x8xf32>
    %54 = tpu.matmul %53, %2, %cst_34 {dimension_numbers = #tpu.dot_dimension_numbers<[1], [0], [0], [1], [0, 0, 1, 1], [], []>} : vector<8x240xf32>, vector<240x8xf32>, vector<8x8xf32> -> vector<8x8xf32>
    %cst_35 = arith.constant dense<0.000000e+00> : vector<8x240xf32>
    %55 = tpu.matmul %54, %3, %cst_35 {dimension_numbers = #tpu.dot_dimension_numbers<[1], [0], [0], [1], [0, 0, 1, 1], [], []>} : vector<8x8xf32>, vector<8x240xf32>, vector<8x240xf32> -> vector<8x240xf32>
    %cst_36 = arith.constant 0.0344827585 : f32
    %56 = vector.broadcast %cst_36 : f32 to vector<8x240xf32>
    %57 = arith.mulf %55, %56 : vector<8x240xf32>
    %cst_37 = arith.constant 9.99999974E-6 : f32
    %58 = vector.broadcast %cst_37 : f32 to vector<8x240xf32>
    %59 = arith.addf %57, %58 : vector<8x240xf32>
    %60 = math.rsqrt %59 : vector<8x240xf32>
    %61 = arith.mulf %52, %60 : vector<8x240xf32>
    %c0_38 = arith.constant 0 : index
    %c0_39 = arith.constant 0 : index
    %62 = vector.load %arg7[%c0_38, %c0_39] : memref<1x240xf32, #tpu.memory_space<vmem>>, vector<1x240xf32>
    %63 = vector.broadcast %62 : vector<1x240xf32> to vector<8x240xf32>
    %64 = arith.mulf %61, %63 : vector<8x240xf32>
    %c0_40 = arith.constant 0 : index
    %c0_41 = arith.constant 0 : index
    %65 = vector.load %arg8[%c0_40, %c0_41] : memref<1x240xf32, #tpu.memory_space<vmem>>, vector<1x240xf32>
    %66 = vector.broadcast %65 : vector<1x240xf32> to vector<8x240xf32>
    %67 = arith.addf %64, %66 : vector<8x240xf32>
    %cst_42 = arith.constant 0.000000e+00 : f32
    %68 = vector.broadcast %cst_42 : f32 to vector<8x240xf32>
    %69 = arith.cmpf oge, %67, %68 : vector<8x240xf32>
    %c0_43 = arith.constant 0 : index
    %c0_44 = arith.constant 0 : index
    %70 = vector.load %arg9[%c0_43, %c0_44] : memref<8x1xf32, #tpu.memory_space<vmem>>, vector<8x1xf32>
    %71 = vector.broadcast %70 : vector<8x1xf32> to vector<8x240xf32>
    %72 = arith.mulf %71, %67 : vector<8x240xf32>
    %73 = arith.select %69, %67, %72 : vector<8x240xi1>, vector<8x240xf32>
    %74 = vector.broadcast %4 : vector<1x240xf32> to vector<8x240xf32>
    %75 = arith.mulf %73, %74 : vector<8x240xf32>
    %c0_45 = arith.constant 0 : index
    %c0_46 = arith.constant 0 : index
    %c0_47 = arith.constant 0 : index
    %76 = vector.load %arg13[%c0_45, %c0_46, %c0_47] : memref<1x8x240xf32, #tpu.memory_space<vmem>>, vector<1x8x240xf32>
    %77 = vector.shape_cast %76 : vector<1x8x240xf32> to vector<8x240xf32>
    %78 = vector.shape_cast %75 : vector<8x240xf32> to vector<1x8x240xf32>
    tpu.vector_store %arg13[%c0_45, %c0_46, %c0_47], %78 {strides = array<i32>} : memref<1x8x240xf32, #tpu.memory_space<vmem>>, vector<1x8x240xf32>,
    return
  }
  func.func @transform_0(%arg0: i32) -> (i32, i32, i32) {
    %c0_i32 = arith.constant 0 : i32
    %c0_i32_0 = arith.constant 0 : i32
    %c0_i32_1 = arith.constant 0 : i32
    return %arg0, %c0_i32, %c0_i32_0 : i32, i32, i32
  }
  func.func @transform_1(%arg0: i32) -> (i32, i32) {
    %c0_i32 = arith.constant 0 : i32
    %c0_i32_0 = arith.constant 0 : i32
    %c0_i32_1 = arith.constant 0 : i32
    return %c0_i32, %c0_i32_0 : i32, i32
  }
  func.func @transform_2(%arg0: i32) -> (i32, i32) {
    %c0_i32 = arith.constant 0 : i32
    %c0_i32_0 = arith.constant 0 : i32
    %c0_i32_1 = arith.constant 0 : i32
    return %c0_i32, %c0_i32_0 : i32, i32
  }
  func.func @transform_3(%arg0: i32) -> (i32, i32) {
    %c0_i32 = arith.constant 0 : i32
    %c0_i32_0 = arith.constant 0 : i32
    %c0_i32_1 = arith.constant 0 : i32
    return %c0_i32, %c0_i32_0 : i32, i32
  }
  func.func @transform_4(%arg0: i32) -> (i32, i32, i32) {
    %c0_i32 = arith.constant 0 : i32
    %c0_i32_0 = arith.constant 0 : i32
    %c0_i32_1 = arith.constant 0 : i32
    %c0_i32_2 = arith.constant 0 : i32
    return %c0_i32, %c0_i32_0, %c0_i32_1 : i32, i32, i32
  }
  func.func @transform_5(%arg0: i32) -> (i32, i32) {
    %c0_i32 = arith.constant 0 : i32
    %c0_i32_0 = arith.constant 0 : i32
    %c0_i32_1 = arith.constant 0 : i32
    return %c0_i32, %c0_i32_0 : i32, i32
  }
  func.func @transform_6(%arg0: i32) -> (i32, i32) {
    %c0_i32 = arith.constant 0 : i32
    %c0_i32_0 = arith.constant 0 : i32
    %c0_i32_1 = arith.constant 0 : i32
    return %c0_i32, %c0_i32_0 : i32, i32
  }
  func.func @transform_7(%arg0: i32) -> (i32, i32) {
    %c0_i32 = arith.constant 0 : i32
    %c0_i32_0 = arith.constant 0 : i32
    %c0_i32_1 = arith.constant 0 : i32
    return %c0_i32, %c0_i32_0 : i32, i32
  }
  func.func @transform_8(%arg0: i32) -> (i32, i32) {
    %c0_i32 = arith.constant 0 : i32
    %c0_i32_0 = arith.constant 0 : i32
    %c0_i32_1 = arith.constant 0 : i32
    return %c0_i32, %c0_i32_0 : i32, i32
  }
  func.func @transform_9(%arg0: i32) -> (i32, i32) {
    %c0_i32 = arith.constant 0 : i32
    %c0_i32_0 = arith.constant 0 : i32
    %c0_i32_1 = arith.constant 0 : i32
    return %c0_i32, %c0_i32_0 : i32, i32
  }
  func.func @transform_10(%arg0: i32) -> (i32, i32) {
    %c0_i32 = arith.constant 0 : i32
    %c0_i32_0 = arith.constant 0 : i32
    %c0_i32_1 = arith.constant 0 : i32
    return %c0_i32, %c0_i32_0 : i32, i32
  }
  func.func @transform_11(%arg0: i32) -> (i32, i32) {
    %c0_i32 = arith.constant 0 : i32
    %c0_i32_0 = arith.constant 0 : i32
    %c0_i32_1 = arith.constant 0 : i32
    return %c0_i32, %c0_i32_0 : i32, i32
  }
  func.func @transform_12(%arg0: i32) -> (i32, i32, i32) {
    %c0_i32 = arith.constant 0 : i32
    %c0_i32_0 = arith.constant 0 : i32
    %c0_i32_1 = arith.constant 0 : i32
    return %arg0, %c0_i32, %c0_i32_0 : i32, i32, i32
  }
}

module attributes {stable_mosaic.version = 11 : i64} {
  func.func @_convKf_flat_kernel(%arg0: i32, %arg1: memref<1x8x240xf32, #tpu.memory_space<vmem>>, %arg2: memref<5x1x8xf32, #tpu.memory_space<vmem>>, %arg3: memref<1x1xf32, #tpu.memory_space<vmem>>, %arg4: memref<5x240xf32, #tpu.memory_space<vmem>>, %arg5: memref<1x1x240xf32, #tpu.memory_space<vmem>>) attributes {dimension_semantics = [#tpu.dimension_semantics<parallel>], iteration_bounds = array<i64: 2>, scalar_prefetch = 0 : i64, scratch_operands = 0 : i64, tpu.core_type = #tpu.core_type<tc>, window_params = [{transform_indices = @transform_0, window_bounds = array<i64: 1, 8, 240>}, {pipeline_mode = #tpu.pipeline_mode<synchronous>, transform_indices = @transform_1, window_bounds = array<i64: 5, 1, 8>}, {pipeline_mode = #tpu.pipeline_mode<synchronous>, transform_indices = @transform_2, window_bounds = array<i64: 1, 1>}, {pipeline_mode = #tpu.pipeline_mode<synchronous>, transform_indices = @transform_3, window_bounds = array<i64: 5, 240>}, {transform_indices = @transform_4, window_bounds = array<i64: 1, 1, 240>}]} {
    %c0 = arith.constant 0 : index
    %c0_0 = arith.constant 0 : index
    %c0_1 = arith.constant 0 : index
    %0 = vector.load %arg1[%c0, %c0_0, %c0_1] : memref<1x8x240xf32, #tpu.memory_space<vmem>>, vector<1x8x240xf32>
    %1 = vector.shape_cast %0 : vector<1x8x240xf32> to vector<8x240xf32>
    %c0_2 = arith.constant 0 : index
    %c0_3 = arith.constant 0 : index
    %2 = vector.load %arg4[%c0_2, %c0_3] : memref<5x240xf32, #tpu.memory_space<vmem>>, vector<5x240xf32>
    %cst = arith.constant 0.000000e+00 : f32
    %3 = vector.broadcast %cst : f32 to vector<1x240xf32>
    %c0_4 = arith.constant 0 : index
    %c0_5 = arith.constant 0 : index
    %c0_6 = arith.constant 0 : index
    %4 = vector.load %arg2[%c0_4, %c0_5, %c0_6] : memref<5x1x8xf32, #tpu.memory_space<vmem>>, vector<1x1x8xf32>
    %5 = vector.shape_cast %4 : vector<1x1x8xf32> to vector<1x8xf32>
    %cst_7 = arith.constant 0.000000e+00 : f32
    %6 = vector.broadcast %cst_7 : f32 to vector<8x2xf32>
    %7 = vector.extract_strided_slice %1 {offsets = [0, 0], sizes = [8, 238], strides = [1, 1]} : vector<8x240xf32> to vector<8x238xf32>
    %8 = tpu.concatenate %6, %7 in 1 : vector<8x2xf32>, vector<8x238xf32> -> vector<8x240xf32>
    %9 = vector.extract_strided_slice %2 {offsets = [0, 0], sizes = [1, 240], strides = [1, 1]} : vector<5x240xf32> to vector<1x240xf32>
    %10 = vector.broadcast %9 : vector<1x240xf32> to vector<8x240xf32>
    %11 = arith.mulf %8, %10 : vector<8x240xf32>
    %cst_8 = arith.constant dense<0.000000e+00> : vector<1x240xf32>
    %12 = tpu.matmul %5, %11, %cst_8 {dimension_numbers = #tpu.dot_dimension_numbers<[1], [0], [0], [1], [0, 0, 1, 1], [], []>} : vector<1x8xf32>, vector<8x240xf32>, vector<1x240xf32> -> vector<1x240xf32>
    %13 = arith.addf %3, %12 : vector<1x240xf32>
    %c1 = arith.constant 1 : index
    %c0_9 = arith.constant 0 : index
    %c0_10 = arith.constant 0 : index
    %14 = vector.load %arg2[%c1, %c0_9, %c0_10] : memref<5x1x8xf32, #tpu.memory_space<vmem>>, vector<1x1x8xf32>
    %15 = vector.shape_cast %14 : vector<1x1x8xf32> to vector<1x8xf32>
    %cst_11 = arith.constant 0.000000e+00 : f32
    %16 = vector.broadcast %cst_11 : f32 to vector<8x1xf32>
    %17 = vector.extract_strided_slice %1 {offsets = [0, 0], sizes = [8, 239], strides = [1, 1]} : vector<8x240xf32> to vector<8x239xf32>
    %18 = tpu.concatenate %16, %17 in 1 : vector<8x1xf32>, vector<8x239xf32> -> vector<8x240xf32>
    %19 = vector.extract_strided_slice %2 {offsets = [1, 0], sizes = [1, 240], strides = [1, 1]} : vector<5x240xf32> to vector<1x240xf32>
    %20 = vector.broadcast %19 : vector<1x240xf32> to vector<8x240xf32>
    %21 = arith.mulf %18, %20 : vector<8x240xf32>
    %cst_12 = arith.constant dense<0.000000e+00> : vector<1x240xf32>
    %22 = tpu.matmul %15, %21, %cst_12 {dimension_numbers = #tpu.dot_dimension_numbers<[1], [0], [0], [1], [0, 0, 1, 1], [], []>} : vector<1x8xf32>, vector<8x240xf32>, vector<1x240xf32> -> vector<1x240xf32>
    %23 = arith.addf %13, %22 : vector<1x240xf32>
    %c2 = arith.constant 2 : index
    %c0_13 = arith.constant 0 : index
    %c0_14 = arith.constant 0 : index
    %24 = vector.load %arg2[%c2, %c0_13, %c0_14] : memref<5x1x8xf32, #tpu.memory_space<vmem>>, vector<1x1x8xf32>
    %25 = vector.shape_cast %24 : vector<1x1x8xf32> to vector<1x8xf32>
    %26 = vector.extract_strided_slice %2 {offsets = [2, 0], sizes = [1, 240], strides = [1, 1]} : vector<5x240xf32> to vector<1x240xf32>
    %27 = vector.broadcast %26 : vector<1x240xf32> to vector<8x240xf32>
    %28 = arith.mulf %1, %27 : vector<8x240xf32>
    %cst_15 = arith.constant dense<0.000000e+00> : vector<1x240xf32>
    %29 = tpu.matmul %25, %28, %cst_15 {dimension_numbers = #tpu.dot_dimension_numbers<[1], [0], [0], [1], [0, 0, 1, 1], [], []>} : vector<1x8xf32>, vector<8x240xf32>, vector<1x240xf32> -> vector<1x240xf32>
    %30 = arith.addf %23, %29 : vector<1x240xf32>
    %c3 = arith.constant 3 : index
    %c0_16 = arith.constant 0 : index
    %c0_17 = arith.constant 0 : index
    %31 = vector.load %arg2[%c3, %c0_16, %c0_17] : memref<5x1x8xf32, #tpu.memory_space<vmem>>, vector<1x1x8xf32>
    %32 = vector.shape_cast %31 : vector<1x1x8xf32> to vector<1x8xf32>
    %33 = vector.extract_strided_slice %1 {offsets = [0, 1], sizes = [8, 239], strides = [1, 1]} : vector<8x240xf32> to vector<8x239xf32>
    %cst_18 = arith.constant 0.000000e+00 : f32
    %34 = vector.broadcast %cst_18 : f32 to vector<8x1xf32>
    %35 = tpu.concatenate %33, %34 in 1 : vector<8x239xf32>, vector<8x1xf32> -> vector<8x240xf32>
    %36 = vector.extract_strided_slice %2 {offsets = [3, 0], sizes = [1, 240], strides = [1, 1]} : vector<5x240xf32> to vector<1x240xf32>
    %37 = vector.broadcast %36 : vector<1x240xf32> to vector<8x240xf32>
    %38 = arith.mulf %35, %37 : vector<8x240xf32>
    %cst_19 = arith.constant dense<0.000000e+00> : vector<1x240xf32>
    %39 = tpu.matmul %32, %38, %cst_19 {dimension_numbers = #tpu.dot_dimension_numbers<[1], [0], [0], [1], [0, 0, 1, 1], [], []>} : vector<1x8xf32>, vector<8x240xf32>, vector<1x240xf32> -> vector<1x240xf32>
    %40 = arith.addf %30, %39 : vector<1x240xf32>
    %c4 = arith.constant 4 : index
    %c0_20 = arith.constant 0 : index
    %c0_21 = arith.constant 0 : index
    %41 = vector.load %arg2[%c4, %c0_20, %c0_21] : memref<5x1x8xf32, #tpu.memory_space<vmem>>, vector<1x1x8xf32>
    %42 = vector.shape_cast %41 : vector<1x1x8xf32> to vector<1x8xf32>
    %43 = vector.extract_strided_slice %1 {offsets = [0, 2], sizes = [8, 238], strides = [1, 1]} : vector<8x240xf32> to vector<8x238xf32>
    %cst_22 = arith.constant 0.000000e+00 : f32
    %44 = vector.broadcast %cst_22 : f32 to vector<8x2xf32>
    %45 = tpu.concatenate %43, %44 in 1 : vector<8x238xf32>, vector<8x2xf32> -> vector<8x240xf32>
    %46 = vector.extract_strided_slice %2 {offsets = [4, 0], sizes = [1, 240], strides = [1, 1]} : vector<5x240xf32> to vector<1x240xf32>
    %47 = vector.broadcast %46 : vector<1x240xf32> to vector<8x240xf32>
    %48 = arith.mulf %45, %47 : vector<8x240xf32>
    %cst_23 = arith.constant dense<0.000000e+00> : vector<1x240xf32>
    %49 = tpu.matmul %42, %48, %cst_23 {dimension_numbers = #tpu.dot_dimension_numbers<[1], [0], [0], [1], [0, 0, 1, 1], [], []>} : vector<1x8xf32>, vector<8x240xf32>, vector<1x240xf32> -> vector<1x240xf32>
    %50 = arith.addf %40, %49 : vector<1x240xf32>
    %c0_24 = arith.constant 0 : index
    %c0_25 = arith.constant 0 : index
    %51 = vector.load %arg3[%c0_24, %c0_25] : memref<1x1xf32, #tpu.memory_space<vmem>>, vector<1x1xf32>
    %52 = vector.broadcast %51 : vector<1x1xf32> to vector<1x240xf32>
    %53 = arith.addf %50, %52 : vector<1x240xf32>
    %54 = vector.extract_strided_slice %2 {offsets = [2, 0], sizes = [1, 240], strides = [1, 1]} : vector<5x240xf32> to vector<1x240xf32>
    %55 = arith.mulf %53, %54 : vector<1x240xf32>
    %c0_26 = arith.constant 0 : index
    %c0_27 = arith.constant 0 : index
    %c0_28 = arith.constant 0 : index
    %56 = vector.load %arg5[%c0_26, %c0_27, %c0_28] : memref<1x1x240xf32, #tpu.memory_space<vmem>>, vector<1x1x240xf32>
    %57 = vector.shape_cast %56 : vector<1x1x240xf32> to vector<1x240xf32>
    %58 = vector.shape_cast %55 : vector<1x240xf32> to vector<1x1x240xf32>
    tpu.vector_store %arg5[%c0_26, %c0_27, %c0_28], %58 {strides = array<i32>} : memref<1x1x240xf32, #tpu.memory_space<vmem>>, vector<1x1x240xf32>,
    return
  }
  func.func @transform_0(%arg0: i32) -> (i32, i32, i32) {
    %c0_i32 = arith.constant 0 : i32
    %c0_i32_0 = arith.constant 0 : i32
    %c0_i32_1 = arith.constant 0 : i32
    return %arg0, %c0_i32, %c0_i32_0 : i32, i32, i32
  }
  func.func @transform_1(%arg0: i32) -> (i32, i32, i32) {
    %c0_i32 = arith.constant 0 : i32
    %c0_i32_0 = arith.constant 0 : i32
    %c0_i32_1 = arith.constant 0 : i32
    %c0_i32_2 = arith.constant 0 : i32
    return %c0_i32, %c0_i32_0, %c0_i32_1 : i32, i32, i32
  }
  func.func @transform_2(%arg0: i32) -> (i32, i32) {
    %c0_i32 = arith.constant 0 : i32
    %c0_i32_0 = arith.constant 0 : i32
    %c0_i32_1 = arith.constant 0 : i32
    return %c0_i32, %c0_i32_0 : i32, i32
  }
  func.func @transform_3(%arg0: i32) -> (i32, i32) {
    %c0_i32 = arith.constant 0 : i32
    %c0_i32_0 = arith.constant 0 : i32
    %c0_i32_1 = arith.constant 0 : i32
    return %c0_i32, %c0_i32_0 : i32, i32
  }
  func.func @transform_4(%arg0: i32) -> (i32, i32, i32) {
    %c0_i32 = arith.constant 0 : i32
    %c0_i32_0 = arith.constant 0 : i32
    %c0_i32_1 = arith.constant 0 : i32
    return %arg0, %c0_i32, %c0_i32_0 : i32, i32, i32
  }
}

</mosaic_0001>

<bundles_post_ra>
// kernel: dense_decoder_2_forward.9
= control target key start
LH: loop header
LB: loop body
LE: loop exit
PB: predicated region body
PF: predicated region fallthrough
CT: control target
= control target key end

     0   :  { %s723_s18 = smov 0   ;;  %s795_s0 = inlined_call_operand.vmem [shape: f32[2,24,120], index: 0, kind: input, shape index: {}, may-alias: {0,5}]   ;;  %s796_s1 = inlined_call_operand.vmem [shape: f32[9,8,8], index: 1, kind: input, shape index: {}]   ;;  %s797_s2 = inlined_call_operand.vmem [shape: f32[8,1], index: 2, kind: input, shape index: {}]   ;;  %s798_s3 = inlined_call_operand.vmem [shape: f32[8,1], index: 3, kind: input, shape index: {}]   ;;  %s799_s4 = inlined_call_operand.vmem [shape: f32[1,120], index: 4, kind: input, shape index: {}]   ;;  %s800_s5 = inlined_call_operand.vmem [shape: f32[2,24,120], index: 5, kind: output, shape index: {}, may-alias: {0,5}]  }
   0x1 LB: > { %s613_s19 = sadd.s32 4294967295, %s682_s18   ;;  %p617_p0 = scmp.ge.s32.totalorder %s682_s18, 1  ;;  %s682_s18 = sphi %s723_s18, %s15_s18  }
   0x2   : > { %p187_p1 = scmp.lt.s32.totalorder %s682_s18, 3 }
   0x4   : > { %p188_p2 = pnand %p617_p0, %p187_p1 }
   0x5   : > { %p216_p3 = scmp.lt.s32.totalorder (!%p188_p2), %s613_s19, 1  ;;  %s684_s24 = smov (!%p188_p2), 10  }
   0x6   : > { %191 = sbr.rel (%p188_p2) target bundleno = 560 (0x230), region = 40  ;;  %s685_s25 = smov (!%p188_p2), 2  }
   0x7   : > { %s686_s26 = smov (!%p188_p2), 120   ;;  %s687_s27 = smov (!%p188_p2), 11  }
   0x8   : > { %s688_s28 = smov (!%p188_p2), 12   ;;  %s689_s29 = smov (!%p188_p2), 1  }
   0x9   : > { %s690_s30 = smov (!%p188_p2), 119   ;;  %s691_s6 = smov (!%p188_p2), 118  }
   0xb   : > { %s802_s19 = smov (!%p216_p3, %s613_s19), 1  ;;  %vm295_vm0 = vcmask 80896   ;;  %v502_v1 = vld [vmem:[%s797_s2] sm:$0xff]  ;;  %vm326_vm1 = vcmask 15360   ;;  %v692_v2 = vmov 0   ;;  %vm243_vm4 = vcmask 64512  }
   0xc   : > { %s653_s20 = smul.u32 24, %s802_s19  ;;  %671 = vset.pattern.permute.xlu2 %v692_v2  ;;  %672 = vset.pattern.permute.xlu0 %v692_v2  ;;  %vm628_vm2 = vmneg %vm295_vm0  ;;  %v627_v4 = vld [vmem:[%s796_s1 + $0x10] sm:$0xff]  ;;  %v631_v5 = vld [vmem:[%s796_s1 + $0x18] sm:$0xff]  ;;  %vm414_vm5 = vcmask 916480   ;;  %vm241_vm6 = vcmask 89088   ;;  %vm234_vm7 = vcmask 97280  }
   0xd   : > { %vm632_vm3 = vmneg %vm326_vm1  ;;  %v538_v8 = vld [vmem:[%s798_s3] sm:$0xff]  ;;  %vm357_vm9 = vcmask 7168   ;;  %v620_v9 = vld [vmem:[%s796_s1 + $0x8] sm:$0xff]  ;;  %vm445_vm12 = vcmask 908288   ;;  %vm476_vm13 = vcmask 900096   ;;  %vm513_vm14 = vcmask 982016  }
   0xe   : > { %s220_s23 = scalar_lea.vmem %s795_s0, %s653_s20  ;;  %vm621_vm8 = vmneg %vm241_vm6  ;;  %v229_v10 = vld [vmem:[%s796_s1] sm:$0xff]  ;;  %v641_v14 = vld [vmem:[%s796_s1 + $0x30] sm:$0xff]  ;;  %s583_s11 = scalar_lea.vmem %s800_s5, %s653_s20 }
   0xf   : > { %v227_v0 = vld [vmem:[%s220_s23] sm:$0xff]  ;;  %vm624_vm10 = vmneg %vm234_vm7  ;;  %v644_v16 = vld [vmem:[%s796_s1 + $0x38] sm:$0xff] }
  0x10   : > { %292 = vrot.lane.b32.xlu0 %v227_v0, %s684_s24  ;;  %323 = vrot.lane.b32.xlu1 %v227_v0, %s685_s25  ;;  %vm636_vm11 = vmneg %vm357_vm9  ;;  %v635_v15 = vld [vmem:[%s796_s1 + $0x20] sm:$0xff]  ;;  %v639_v18 = vld [vmem:[%s796_s1 + $0x28] sm:$0xff] }
  0x11   : > { %411 = vrot.lane.b32.xlu2 %v227_v0, %s686_s26  ;;  %v647_v20 = vld [vmem:[%s796_s1 + $0x40] sm:$0xff] }
  0x12   : > { %v673_v38 = vld [vmem:[%s799_s4] ss:$0 sm:$0xff] }
  0x18   : > { %238 = vrot.lane.b32.xlu0 %v227_v0, %s687_s27  ;;  %231 = vrot.lane.b32.xlu1 %v227_v0, %s688_s28 }
  0x19   : > { %354 = vrot.lane.b32.xlu2 %v227_v0, %s689_s29 }
  0x20   : > { %442 = vrot.lane.b32.xlu0 %v227_v0, %s690_s30  ;;  %473 = vrot.lane.b32.xlu1 %v227_v0, %s691_s6 }
  0x21   : > { %505 = vperm.xlu2 %671, %v502_v1  }
  0x29   : > { %541 = vperm.xlu2 %671, %v538_v8  }
  0x6b   : > { %v412_v3 = vpop.permute.xlu2 %411 }
  0x73   : > { %v355_v11 = vpop.permute.xlu2 %354 }
  0x7b   : > { %v506_v39 = vpop.permute.xlu2 %505 }
  0x82   : > { %v293_v6 = vpop.permute.xlu0 %292  ;;  %v324_v7 = vpop.permute.xlu1 %323 }
  0x83   : > { %629 = vmatpush.msk.msra.mxu2 %vm628_vm2, %v293_v6  ;;  %633 = vmatpush.msk.msra.mxu3 %vm632_vm3, %v324_v7  ;;  %v542_v60 = vpop.permute.xlu2 %541 }
  0x84   : > { %630 = vmatmul.msk.f32.vlgmr.msra.gmra.mxu2 %vm243_vm4, %v627_v4  ;;  %634 = vmatmul.msk.f32.vlgmr.msra.gmra.mxu3 %vm243_vm4, %v631_v5 }
  0x85   : > { %642 = vmatpush.msk.msrb.mxu2 %vm414_vm5, %v412_v3 }
  0x8a   : > { %v239_v12 = vpop.permute.xlu0 %238  ;;  %v232_v13 = vpop.permute.xlu1 %231 }
  0x8b   : > { %622 = vmatpush.msk.msra.mxu0 %vm621_vm8, %v239_v12  ;;  %625 = vmatpush.msk.msra.mxu1 %vm624_vm10, %v232_v13 }
  0x8c   : > { %623 = vmatmul.msk.f32.vlgmr.msra.gmra.mxu0 %vm243_vm4, %v620_v9  ;;  %626 = vmatmul.msk.f32.vlgmr.msra.gmra.mxu1 %vm243_vm4, %v229_v10 }
  0x8d   : > { %643 = vmatmul.msk.f32.vlgmr.msrb.gmra.mxu2 %vm243_vm4, %v641_v14  ;;  %637 = vmatpush.msk.msrb.mxu0 %vm636_vm11, %v355_v11 }
  0x8e   : > { %403 = vmatpush.msrb.mxu1 %v227_v0 }
  0x92   : > { %v443_v17 = vpop.permute.xlu0 %442  ;;  %v474_v19 = vpop.permute.xlu1 %473 }
  0x93   : > { %645 = vmatpush.msk.msrb.mxu3 %vm445_vm12, %v443_v17  ;;  %648 = vmatpush.msk.msra.mxu0 %vm476_vm13, %v474_v19 }
  0x94   : > { %638 = vmatmul.msk.f32.vlgmr.msrb.gmra.mxu0 %vm243_vm4, %v635_v15  ;;  %646 = vmatmul.msk.f32.vlgmr.msrb.gmra.mxu3 %vm243_vm4, %v644_v16 }
  0x95   : > { %640 = vmatmul.msk.f32.vlgmr.msrb.gmra.mxu1 %vm243_vm4, %v639_v18 }
  0x9c   : > { %649 = vmatmul.msk.f32.vlgmr.msra.gmra.mxu0 %vm243_vm4, %v647_v20 }
 0x107   : > { %v317_v21 = vpop.f32.mrf.mxu2  ;;  %v348_v26 = vpop.f32.mrf.mxu3 }
 0x109   : > { %v264_v22 = vpop.f32.mrf.mxu0  ;;  %v287_v23 = vpop.f32.mrf.mxu1 }
 0x10a   : > { %v288_v24 = vadd.f32 %v287_v23, %v264_v22 }
 0x10c   : > { %v320_v25 = vadd.f32 %v317_v21, %v288_v24 }
 0x10e   : > { %v351_v27 = vadd.f32 %v348_v26, %v320_v25 }
 0x110   : > { %v436_v31 = vpop.f32.mrf.mxu2 }
 0x111   : > { %v379_v28 = vpop.f32.mrf.mxu0 }
 0x112   : > { %v382_v29 = vadd.f32 %v379_v28, %v351_v27  ;;  %v405_v30 = vpop.f32.mrf.mxu1 }
 0x114   : > { %v408_v32 = vadd.f32 %v405_v30, %v382_v29 }
 0x116   : > { %v439_v33 = vadd.f32 %v436_v31, %v408_v32 }
 0x117   : > { %v467_v34 = vpop.f32.mrf.mxu3 }
 0x118   : > { %v470_v35 = vadd.f32 %v467_v34, %v439_v33 }
 0x119   : > { %v498_v36 = vpop.f32.mrf.mxu0 }
 0x11a   : > { %v501_v37 = vadd.f32 %v498_v36, %v470_v35 }
 0x11c   : > { %v508_v40 = vadd.f32 %v506_v39, %v501_v37 }
 0x11e   : > { %v512_v41 = vmul.f32 %v673_v38, %v508_v40 }
 0x120   : > { %v514_v42 = vsel %vm513_vm14, %v512_v41, 0.0 }
 0x121   : > { %515 = vadd.xlane.f32.xlu0 %v514_v42 }
 0x194   : > { %v516_v43 = vpop.xlane.xlu0 %515 }
 0x195   : > { %v517_v44 = vmul.f32 0.015625, %v516_v43 }
 0x197   : > { %v518_v45 = vsub.f32 %v508_v40, %v517_v44 }
 0x199   : > { %v519_v46 = vmul.f32 %v518_v45, %v518_v45 }
 0x19b   : > { %v520_v47 = vmul.f32 %v673_v38, %v519_v46 }
 0x19d   : > { %v521_v48 = vsel %vm513_vm14, %v520_v47, 0.0 }
 0x19e   : > { %522 = vadd.xlane.f32.xlu1 %v521_v48 }
 0x211   : > { %v523_v49 = vpop.xlane.xlu1 %522 }
 0x212   : > { %v524_v50 = vmul.f32 0.015625, %v523_v49 }
 0x214   : > { %v525_v51 = vadd.f32 1e-05, %v524_v50 }
 0x216   : > { %674 = vrsqrt.f32 %v525_v51  ;;  %vm532_vm0 = vweird.f32 %v525_v51 }
 0x21c   : > { %v675_v52 = vpop.eup %674 }
 0x21d   : > { %v527_v53 = vmul.f32 %v675_v52, %v525_v51  ;;  %vm533_vm15 = vweird.f32 %v675_v52 }
 0x21e   : > { %vm534_vm1 = vmor %vm532_vm0, %vm533_vm15 }
 0x21f   : > { %v528_v54 = vmul.f32 %v675_v52, %v527_v53 }
 0x221   : > { %v529_v55 = vmul.f32 0.5, %v528_v54 }
 0x223   : > { %v530_v56 = vsub.f32 1.5, %v529_v55 }
 0x225   : > { %v531_v57 = vmul.f32 %v675_v52, %v530_v56 }
 0x227   : > { %v535_v58 = vsel %vm534_vm1, %v675_v52, %v531_v57 }
 0x228   : > { %v536_v59 = vmul.f32 %v535_v58, %v518_v45 }
 0x22a   : > { %vm537_vm2 = vcmp.ge.f32.partialorder %v536_v59, 0.0  ;;  %v544_v61 = vmul.f32 %v542_v60, %v536_v59 }
 0x22c   : > { %v545_v62 = vsel %vm537_vm2, %v536_v59, %v544_v61 }
 0x22d   : > { %v546_v63 = vmul.f32 %v673_v38, %v545_v62 }
 0x22f   : > { %650 = vst.msk [vmem:[%s583_s11 + $0x8] sm:$0xff] %vm513_vm14, %v546_v63 }
 0x230 PF: > { %s15_s18 = sadd.s32 1, %s682_s18  }
 0x231   : > { %p12_p4 = scmp.ge.s32.totalorder %s15_s18, 4  }
 0x233   :  { %14 = sbr.rel (!%p12_p4) target bundleno = 1 (0x1), region = 78 }

// kernel: dense_decoder_2_forward.10
= control target key start
LH: loop header
LB: loop body
LE: loop exit
PB: predicated region body
PF: predicated region fallthrough
CT: control target
= control target key end

     0   :  { %s770_s18 = smov 0   ;;  %s884_s0 = inlined_call_operand.vmem [shape: f32[2,24,120], index: 0, kind: input, shape index: {}, may-alias: {0,5}]   ;;  %s885_s1 = inlined_call_operand.vmem [shape: f32[9,8,16], index: 1, kind: input, shape index: {}]   ;;  %s886_s2 = inlined_call_operand.vmem [shape: f32[8,1], index: 2, kind: input, shape index: {}]   ;;  %s887_s3 = inlined_call_operand.vmem [shape: f32[8,1], index: 3, kind: input, shape index: {}]   ;;  %s888_s4 = inlined_call_operand.vmem [shape: f32[1,120], index: 4, kind: input, shape index: {}]   ;;  %s889_s5 = inlined_call_operand.vmem [shape: f32[2,24,120], index: 5, kind: output, shape index: {}, may-alias: {0,5}]  }
   0x1 LB: > { %s647_s19 = sadd.s32 4294967295, %s729_s18   ;;  %p651_p0 = scmp.ge.s32.totalorder %s729_s18, 1  ;;  %s729_s18 = sphi %s770_s18, %s15_s18  }
   0x2   : > { %p187_p1 = scmp.lt.s32.totalorder %s729_s18, 3 }
   0x4   : > { %p188_p2 = pnand %p651_p0, %p187_p1 }
   0x5   : > { %p216_p3 = scmp.lt.s32.totalorder (!%p188_p2), %s647_s19, 1  ;;  %s731_s24 = smov (!%p188_p2), 20  }
   0x6   : > { %191 = sbr.rel (%p188_p2) target bundleno = 576 (0x240), region = 40  ;;  %s732_s25 = smov (!%p188_p2), 22  }
   0x7   : > { %s733_s26 = smov (!%p188_p2), 21   ;;  %s734_s27 = smov (!%p188_p2), 2  }
   0x8   : > { %s735_s28 = smov (!%p188_p2), 110   ;;  %s736_s29 = smov (!%p188_p2), 1  }
   0x9   : > { %s737_s30 = smov (!%p188_p2), 109   ;;  %s738_s6 = smov (!%p188_p2), 108  }
   0xb   : > { %s895_s19 = smov (!%p216_p3, %s647_s19), 1  ;;  %vm239_vm0 = vcmask 179200   ;;  %vm308_vm2 = vcmask 162816   ;;  %vm439_vm4 = vcmask 834560   ;;  %vm250_vm5 = vcmask 171008   ;;  %v665_v8 = vld [vmem:[%s885_s1 + $0x10] sm:$0xff] }
   0xc   : > { %s700_s20 = smul.u32 24, %s895_s19  ;;  %vm806_vm1 = vmneg %vm239_vm0  ;;  %vm253_vm6 = vcmask 130048   ;;  %vm343_vm7 = vcmask 15360   ;;  %v654_v12 = vld [vmem:[%s885_s1 + $0x8] sm:$0xff]  ;;  %v536_v13 = vld [vmem:[%s886_s2] sm:$0xff]  ;;  %v739_v14 = vmov 0  }
   0xd   : > { %vm666_vm3 = vmneg %vm308_vm2  ;;  %718 = vset.pattern.permute.xlu1 %v739_v14  ;;  %719 = vset.pattern.permute.xlu0 %v739_v14  ;;  %v671_v15 = vld [vmem:[%s885_s1 + $0x18] sm:$0xff]  ;;  %v230_v17 = vld [vmem:[%s885_s1] sm:$0xff]  ;;  %vm474_vm10 = vcmask 826368   ;;  %vm378_vm11 = vcmask 7168   ;;  %vm509_vm13 = vcmask 818176   ;;  %vm547_vm14 = vcmask 982016  }
   0xe   : > { %s220_s23 = scalar_lea.vmem %s884_s0, %s700_s20  ;;  %vm655_vm8 = vmneg %vm250_vm5  ;;  %v572_v20 = vld [vmem:[%s887_s3] sm:$0xff]  ;;  %v685_v21 = vld [vmem:[%s885_s1 + $0x30] sm:$0xff]  ;;  %s617_s11 = scalar_lea.vmem %s889_s5, %s700_s20 }
   0xf   : > { %v786_v0 = vld [vmem:[%s220_s23 + $0x8] sm:$0xff]  ;;  %v788_v1 = vld [vmem:[%s220_s23] sm:$0xff]  ;;  %vm817_vm9 = vmneg %vm343_vm7 }
  0x10   : > { %304 = vrot.lane.b32.xlu0 %v786_v0, %s731_s24  ;;  %302 = vrot.lane.b32.xlu1 %v788_v1, %s731_s24  ;;  %vm678_vm12 = vmneg %vm378_vm11  ;;  %v683_v22 = vld [vmem:[%s885_s1 + $0x28] sm:$0xff]  ;;  %v677_v25 = vld [vmem:[%s885_s1 + $0x20] sm:$0xff] }
  0x11   : > { %235 = vrot.lane.b32.xlu2 %v786_v0, %s732_s25  ;;  %v689_v26 = vld [vmem:[%s885_s1 + $0x38] sm:$0xff]  ;;  %v693_v30 = vld [vmem:[%s885_s1 + $0x40] sm:$0xff] }
  0x12   : > { %v720_v49 = vld [vmem:[%s888_s4] ss:$0 sm:$0xff] }
  0x18   : > { %246 = vrot.lane.b32.xlu0 %v786_v0, %s733_s26  ;;  %339 = vrot.lane.b32.xlu1 %v786_v0, %s734_s27 }
  0x19   : > { %244 = vrot.lane.b32.xlu2 %v788_v1, %s733_s26 }
  0x20   : > { %337 = vrot.lane.b32.xlu0 %v788_v1, %s734_s27  ;;  %233 = vrot.lane.b32.xlu1 %v788_v1, %s732_s25 }
  0x21   : > { %435 = vrot.lane.b32.xlu2 %v786_v0, %s735_s28 }
  0x28   : > { %374 = vrot.lane.b32.xlu0 %v786_v0, %s736_s29  ;;  %433 = vrot.lane.b32.xlu1 %v788_v1, %s735_s28 }
  0x29   : > { %470 = vrot.lane.b32.xlu2 %v786_v0, %s737_s30 }
  0x30   : > { %372 = vrot.lane.b32.xlu0 %v788_v1, %s736_s29  ;;  %468 = vrot.lane.b32.xlu1 %v788_v1, %s737_s30 }
  0x31   : > { %505 = vrot.lane.b32.xlu2 %v786_v0, %s738_s6 }
  0x38   : > { %503 = vrot.lane.b32.xlu0 %v788_v1, %s738_s6  ;;  %539 = vperm.xlu1 %718, %v536_v13  }
  0x40   : > { %575 = vperm.xlu1 %718, %v572_v20  }
  0x6b   : > { %v236_v3 = vpop.permute.xlu2 %235 }
  0x6c   : > { %661 = vmatpush.msk.msra.mxu1 %vm806_vm1, %v236_v3 }
  0x73   : > { %v245_v4 = vpop.permute.xlu2 %244 }
  0x7b   : > { %v436_v7 = vpop.permute.xlu2 %435 }
  0x82   : > { %v305_v5 = vpop.permute.xlu0 %304  ;;  %v303_v6 = vpop.permute.xlu1 %302 }
  0x83   : > { %667 = vmatpush.msk.msra.mxu2 %vm666_vm3, %v305_v5  ;;  %v471_v16 = vpop.permute.xlu2 %470 }
  0x85   : > { %669 = vmatpush.msk.msra.mxu2 %vm666_vm3, %v303_v6 }
  0x86   : > { %670 = vmatmul.msk.f32.vlgmr.msra.gmra.mxu2 %vm253_vm6, %v665_v8 }
  0x87   : > { %686 = vmatpush.msk.msrb.mxu2 %vm439_vm4, %v436_v7 }
  0x8a   : > { %v247_v10 = vpop.permute.xlu0 %246  ;;  %v340_v11 = vpop.permute.xlu1 %339 }
  0x8b   : > { %656 = vmatpush.msk.msra.mxu0 %vm655_vm8, %v247_v10  ;;  %673 = vmatpush.msk.msra.mxu3 %vm817_vm9, %v340_v11  ;;  %v506_v27 = vpop.permute.xlu2 %505 }
  0x8d   : > { %658 = vmatpush.msk.msra.mxu0 %vm655_vm8, %v245_v4 }
  0x8e   : > { %659 = vmatmul.msk.f32.vlgmr.msra.gmra.mxu0 %vm253_vm6, %v654_v12 }
  0x92   : > { %v338_v18 = vpop.permute.xlu0 %337  ;;  %v234_v19 = vpop.permute.xlu1 %233 }
  0x93   : > { %663 = vmatpush.msk.msra.mxu1 %vm806_vm1, %v234_v19  ;;  %675 = vmatpush.msk.msra.mxu3 %vm817_vm9, %v338_v18 }
  0x94   : > { %676 = vmatmul.msk.f32.vlgmr.msra.gmra.mxu3 %vm253_vm6, %v671_v15  ;;  %664 = vmatmul.msk.f32.vlgmr.msra.gmra.mxu1 %vm253_vm6, %v230_v17 }
  0x95   : > { %690 = vmatpush.msk.msrb.mxu3 %vm474_vm10, %v471_v16  ;;  %424 = vmatpush.msrb.mxu1 %v786_v0 }
  0x97   : > { %425 = vmatpush.msrb.mxu1 %v788_v1 }
  0x9a   : > { %v375_v23 = vpop.permute.xlu0 %374  ;;  %v434_v24 = vpop.permute.xlu1 %433 }
  0x9b   : > { %679 = vmatpush.msk.msrb.mxu0 %vm678_vm12, %v375_v23  ;;  %687 = vmatpush.msk.msrb.mxu2 %vm439_vm4, %v434_v24 }
  0x9c   : > { %688 = vmatmul.msk.f32.vlgmr.msrb.gmra.mxu2 %vm253_vm6, %v685_v21  ;;  %684 = vmatmul.msk.f32.vlgmr.msrb.gmra.mxu1 %vm253_vm6, %v683_v22 }
  0xa2   : > { %v373_v28 = vpop.permute.xlu0 %372  ;;  %v469_v29 = vpop.permute.xlu1 %468 }
  0xa3   : > { %681 = vmatpush.msk.msrb.mxu0 %vm678_vm12, %v373_v28  ;;  %691 = vmatpush.msk.msrb.mxu3 %vm474_vm10, %v469_v29 }
  0xa4   : > { %682 = vmatmul.msk.f32.vlgmr.msrb.gmra.mxu0 %vm253_vm6, %v677_v25  ;;  %692 = vmatmul.msk.f32.vlgmr.msrb.gmra.mxu3 %vm253_vm6, %v689_v26 }
  0xa5   : > { %694 = vmatpush.msk.msra.mxu0 %vm509_vm13, %v506_v27 }
  0xaa   : > { %v504_v31 = vpop.permute.xlu0 %503  ;;  %v540_v50 = vpop.permute.xlu1 %539 }
  0xab   : > { %695 = vmatpush.msk.msra.mxu0 %vm509_vm13, %v504_v31 }
  0xac   : > { %696 = vmatmul.msk.f32.vlgmr.msra.gmra.mxu0 %vm253_vm6, %v693_v30 }
  0xb2   : > { %v576_v7 = vpop.permute.xlu1 %575 }
 0x109   : > { %v331_v35 = vpop.f32.mrf.mxu2 }
 0x10b   : > { %v274_v32 = vpop.f32.mrf.mxu0 }
 0x111   : > { %v297_v33 = vpop.f32.mrf.mxu1 }
 0x112   : > { %v298_v34 = vadd.f32 %v297_v33, %v274_v32 }
 0x114   : > { %v334_v36 = vadd.f32 %v331_v35, %v298_v34 }
 0x117   : > { %v366_v37 = vpop.f32.mrf.mxu3 }
 0x118   : > { %v369_v38 = vadd.f32 %v366_v37, %v334_v36 }
 0x119   : > { %v427_v40 = vpop.f32.mrf.mxu1 }
 0x11f   : > { %v462_v42 = vpop.f32.mrf.mxu2 }
 0x121   : > { %v401_v39 = vpop.f32.mrf.mxu0 }
 0x122   : > { %v404_v41 = vadd.f32 %v401_v39, %v369_v38 }
 0x124   : > { %v430_v43 = vadd.f32 %v427_v40, %v404_v41 }
 0x126   : > { %v465_v44 = vadd.f32 %v462_v42, %v430_v43 }
 0x127   : > { %v497_v45 = vpop.f32.mrf.mxu3 }
 0x128   : > { %v500_v46 = vadd.f32 %v497_v45, %v465_v44 }
 0x129   : > { %v532_v47 = vpop.f32.mrf.mxu0 }
 0x12a   : > { %v535_v48 = vadd.f32 %v532_v47, %v500_v46 }
 0x12c   : > { %v542_v51 = vadd.f32 %v540_v50, %v535_v48 }
 0x12e   : > { %v546_v52 = vmul.f32 %v720_v49, %v542_v51 }
 0x130   : > { %v548_v53 = vsel %vm547_vm14, %v546_v52, 0.0 }
 0x131   : > { %549 = vadd.xlane.f32.xlu2 %v548_v53 }
 0x1a4   : > { %v550_v54 = vpop.xlane.xlu2 %549 }
 0x1a5   : > { %v551_v55 = vmul.f32 0.015625, %v550_v54 }
 0x1a7   : > { %v552_v56 = vsub.f32 %v542_v51, %v551_v55 }
 0x1a9   : > { %v553_v57 = vmul.f32 %v552_v56, %v552_v56 }
 0x1ab   : > { %v554_v58 = vmul.f32 %v720_v49, %v553_v57 }
 0x1ad   : > { %v555_v59 = vsel %vm547_vm14, %v554_v58, 0.0 }
 0x1ae   : > { %556 = vadd.xlane.f32.xlu0 %v555_v59 }
 0x221   : > { %v557_v60 = vpop.xlane.xlu0 %556 }
 0x222   : > { %v558_v61 = vmul.f32 0.015625, %v557_v60 }
 0x224   : > { %v559_v62 = vadd.f32 1e-05, %v558_v61 }
 0x226   : > { %721 = vrsqrt.f32 %v559_v62  ;;  %vm566_vm0 = vweird.f32 %v559_v62 }
 0x22c   : > { %v722_v63 = vpop.eup %721 }
 0x22d   : > { %v561_v0 = vmul.f32 %v722_v63, %v559_v62  ;;  %vm567_vm15 = vweird.f32 %v722_v63 }
 0x22e   : > { %vm568_vm1 = vmor %vm566_vm0, %vm567_vm15 }
 0x22f   : > { %v562_v1 = vmul.f32 %v722_v63, %v561_v0 }
 0x231   : > { %v563_v2 = vmul.f32 0.5, %v562_v1 }
 0x233   : > { %v564_v3 = vsub.f32 1.5, %v563_v2 }
 0x235   : > { %v565_v4 = vmul.f32 %v722_v63, %v564_v3 }
 0x237   : > { %v569_v5 = vsel %vm568_vm1, %v722_v63, %v565_v4 }
 0x238   : > { %v570_v6 = vmul.f32 %v569_v5, %v552_v56 }
 0x23a   : > { %vm571_vm2 = vcmp.ge.f32.partialorder %v570_v6, 0.0  ;;  %v578_v8 = vmul.f32 %v576_v7, %v570_v6 }
 0x23c   : > { %v579_v9 = vsel %vm571_vm2, %v570_v6, %v578_v8 }
 0x23d   : > { %v580_v10 = vmul.f32 %v720_v49, %v579_v9 }
 0x23f   : > { %697 = vst.msk [vmem:[%s617_s11 + $0x10] sm:$0xff] %vm547_vm14, %v580_v10 }
 0x240 PF: > { %s15_s18 = sadd.s32 1, %s729_s18  }
 0x241   : > { %p12_p4 = scmp.ge.s32.totalorder %s15_s18, 4  }
 0x243   :  { %14 = sbr.rel (!%p12_p4) target bundleno = 1 (0x1), region = 78 }

// kernel: dense_decoder_2_forward.11
= control target key start
LH: loop header
LB: loop body
LE: loop exit
PB: predicated region body
PF: predicated region fallthrough
CT: control target
= control target key end

     0   :  { %s725_s18 = smov 0   ;;  %s797_s0 = inlined_call_operand.vmem [shape: f32[2,24,120], index: 0, kind: input, shape index: {}, may-alias: {0,5}]   ;;  %s798_s1 = inlined_call_operand.vmem [shape: f32[9,8,8], index: 1, kind: input, shape index: {}]   ;;  %s799_s2 = inlined_call_operand.vmem [shape: f32[8,1], index: 2, kind: input, shape index: {}]   ;;  %s800_s3 = inlined_call_operand.vmem [shape: f32[8,1], index: 3, kind: input, shape index: {}]   ;;  %s801_s4 = inlined_call_operand.vmem [shape: f32[1,120], index: 4, kind: input, shape index: {}]   ;;  %s802_s5 = inlined_call_operand.vmem [shape: f32[2,24,120], index: 5, kind: output, shape index: {}, may-alias: {0,5}]  }
   0x1 LB: > { %s613_s19 = sadd.s32 4294967295, %s684_s18   ;;  %p617_p0 = scmp.ge.s32.totalorder %s684_s18, 1  ;;  %s684_s18 = sphi %s725_s18, %s15_s18  }
   0x2   : > { %p187_p1 = scmp.lt.s32.totalorder %s684_s18, 3 }
   0x4   : > { %p188_p2 = pnand %p617_p0, %p187_p1 }
   0x5   : > { %p216_p3 = scmp.lt.s32.totalorder (!%p188_p2), %s613_s19, 1  ;;  %s686_s24 = smov (!%p188_p2), 19  }
   0x6   : > { %191 = sbr.rel (%p188_p2) target bundleno = 560 (0x230), region = 40  ;;  %s687_s25 = smov (!%p188_p2), 11  }
   0x7   : > { %s688_s26 = smov (!%p188_p2), 1   ;;  %s689_s27 = smov (!%p188_p2), 20  }
   0x8   : > { %s690_s28 = smov (!%p188_p2), 21   ;;  %s691_s29 = smov (!%p188_p2), 10  }
   0x9   : > { %s692_s30 = smov (!%p188_p2), 9   ;;  %s693_s6 = smov (!%p188_p2), 127  }
   0xb   : > { %s804_s19 = smov (!%p216_p3, %s613_s19), 1  ;;  %vm295_vm0 = vcmask 154624   ;;  %v502_v1 = vld [vmem:[%s799_s2] sm:$0xff]  ;;  %vm326_vm1 = vcmask 89088   ;;  %v694_v2 = vmov 0   ;;  %vm419_vm2 = vcmask 7168  }
   0xc   : > { %s655_s20 = smul.u32 24, %s804_s19  ;;  %673 = vset.pattern.permute.xlu2 %v694_v2  ;;  %674 = vset.pattern.permute.xlu0 %v694_v2  ;;  %vm628_vm3 = vmneg %vm295_vm0  ;;  %v631_v4 = vld [vmem:[%s798_s1 + $0x18] sm:$0xff]  ;;  %vm243_vm6 = vcmask 64512   ;;  %v627_v7 = vld [vmem:[%s798_s1 + $0x10] sm:$0xff]  ;;  %vm241_vm7 = vcmask 162816   ;;  %vm234_vm8 = vcmask 171008  }
   0xd   : > { %vm632_vm4 = vmneg %vm326_vm1  ;;  %v538_v8 = vld [vmem:[%s800_s3] sm:$0xff]  ;;  %vm357_vm10 = vcmask 80896   ;;  %v620_v9 = vld [vmem:[%s798_s1 + $0x8] sm:$0xff]  ;;  %vm388_vm13 = vcmask 72704   ;;  %vm476_vm15 = vcmask 973824   ;;  %vm513_vm0 = vcmask 982016  }
   0xe   : > { %s220_s23 = scalar_lea.vmem %s797_s0, %s655_s20  ;;  %vm644_vm5 = vmneg %vm419_vm2  ;;  %v229_v10 = vld [vmem:[%s798_s1] sm:$0xff]  ;;  %v643_v14 = vld [vmem:[%s798_s1 + $0x30] sm:$0xff]  ;;  %s583_s11 = scalar_lea.vmem %s802_s5, %s655_s20 }
   0xf   : > { %v227_v0 = vld [vmem:[%s220_s23] sm:$0xff]  ;;  %vm621_vm9 = vmneg %vm241_vm7  ;;  %v647_v15 = vld [vmem:[%s798_s1 + $0x38] sm:$0xff] }
  0x10   : > { %292 = vrot.lane.b32.xlu0 %v227_v0, %s686_s24  ;;  %323 = vrot.lane.b32.xlu1 %v227_v0, %s687_s25  ;;  %vm624_vm11 = vmneg %vm234_vm8  ;;  %v635_v16 = vld [vmem:[%s798_s1 + $0x20] sm:$0xff]  ;;  %v639_v17 = vld [vmem:[%s798_s1 + $0x28] sm:$0xff] }
  0x11   : > { %416 = vrot.lane.b32.xlu2 %v227_v0, %s688_s26  ;;  %vm636_vm12 = vmneg %vm357_vm10  ;;  %v649_v20 = vld [vmem:[%s798_s1 + $0x40] sm:$0xff] }
  0x12   : > { %vm640_vm14 = vmneg %vm388_vm13  ;;  %v675_v38 = vld [vmem:[%s801_s4] ss:$0 sm:$0xff] }
  0x18   : > { %238 = vrot.lane.b32.xlu0 %v227_v0, %s689_s27  ;;  %231 = vrot.lane.b32.xlu1 %v227_v0, %s690_s28 }
  0x19   : > { %354 = vrot.lane.b32.xlu2 %v227_v0, %s691_s29 }
  0x20   : > { %385 = vrot.lane.b32.xlu0 %v227_v0, %s692_s30  ;;  %473 = vrot.lane.b32.xlu1 %v227_v0, %s693_s6 }
  0x21   : > { %505 = vperm.xlu2 %673, %v502_v1  }
  0x29   : > { %541 = vperm.xlu2 %673, %v538_v8  }
  0x6b   : > { %v417_v3 = vpop.permute.xlu2 %416 }
  0x73   : > { %v355_v11 = vpop.permute.xlu2 %354 }
  0x7b   : > { %v506_v39 = vpop.permute.xlu2 %505 }
  0x82   : > { %v293_v5 = vpop.permute.xlu0 %292  ;;  %v324_v6 = vpop.permute.xlu1 %323 }
  0x83   : > { %629 = vmatpush.msk.msra.mxu2 %vm628_vm3, %v293_v5  ;;  %633 = vmatpush.msk.msra.mxu3 %vm632_vm4, %v324_v6  ;;  %v542_v60 = vpop.permute.xlu2 %541 }
  0x84   : > { %634 = vmatmul.msk.f32.vlgmr.msra.gmra.mxu3 %vm243_vm6, %v631_v4  ;;  %630 = vmatmul.msk.f32.vlgmr.msra.gmra.mxu2 %vm243_vm6, %v627_v7 }
  0x85   : > { %645 = vmatpush.msk.msrb.mxu2 %vm644_vm5, %v417_v3  ;;  %465 = vmatpush.msrb.mxu3 %v227_v0 }
  0x8a   : > { %v239_v12 = vpop.permute.xlu0 %238  ;;  %v232_v13 = vpop.permute.xlu1 %231 }
  0x8b   : > { %622 = vmatpush.msk.msra.mxu0 %vm621_vm9, %v239_v12  ;;  %625 = vmatpush.msk.msra.mxu1 %vm624_vm11, %v232_v13 }
  0x8c   : > { %623 = vmatmul.msk.f32.vlgmr.msra.gmra.mxu0 %vm243_vm6, %v620_v9  ;;  %626 = vmatmul.msk.f32.vlgmr.msra.gmra.mxu1 %vm243_vm6, %v229_v10 }
  0x8d   : > { %637 = vmatpush.msk.msrb.mxu0 %vm636_vm12, %v355_v11  ;;  %646 = vmatmul.msk.f32.vlgmr.msrb.gmra.mxu2 %vm243_vm6, %v643_v14 }
  0x8e   : > { %648 = vmatmul.msk.f32.vlgmr.msrb.gmra.mxu3 %vm243_vm6, %v647_v15 }
  0x92   : > { %v386_v18 = vpop.permute.xlu0 %385  ;;  %v474_v19 = vpop.permute.xlu1 %473 }
  0x93   : > { %641 = vmatpush.msk.msrb.mxu1 %vm640_vm14, %v386_v18  ;;  %650 = vmatpush.msk.msra.mxu0 %vm476_vm15, %v474_v19 }
  0x94   : > { %638 = vmatmul.msk.f32.vlgmr.msrb.gmra.mxu0 %vm243_vm6, %v635_v16  ;;  %642 = vmatmul.msk.f32.vlgmr.msrb.gmra.mxu1 %vm243_vm6, %v639_v17 }
  0x9c   : > { %651 = vmatmul.msk.f32.vlgmr.msra.gmra.mxu0 %vm243_vm6, %v649_v20 }
 0x107   : > { %v317_v21 = vpop.f32.mrf.mxu2  ;;  %v348_v26 = vpop.f32.mrf.mxu3 }
 0x109   : > { %v264_v22 = vpop.f32.mrf.mxu0  ;;  %v287_v23 = vpop.f32.mrf.mxu1 }
 0x10a   : > { %v288_v24 = vadd.f32 %v287_v23, %v264_v22 }
 0x10c   : > { %v320_v25 = vadd.f32 %v317_v21, %v288_v24 }
 0x10e   : > { %v351_v27 = vadd.f32 %v348_v26, %v320_v25 }
 0x110   : > { %v441_v31 = vpop.f32.mrf.mxu2 }
 0x111   : > { %v379_v28 = vpop.f32.mrf.mxu0  ;;  %v410_v29 = vpop.f32.mrf.mxu1 }
 0x112   : > { %v382_v30 = vadd.f32 %v379_v28, %v351_v27  ;;  %v467_v33 = vpop.f32.mrf.mxu3 }
 0x114   : > { %v413_v32 = vadd.f32 %v410_v29, %v382_v30 }
 0x116   : > { %v444_v34 = vadd.f32 %v441_v31, %v413_v32 }
 0x118   : > { %v470_v35 = vadd.f32 %v467_v33, %v444_v34 }
 0x119   : > { %v498_v36 = vpop.f32.mrf.mxu0 }
 0x11a   : > { %v501_v37 = vadd.f32 %v498_v36, %v470_v35 }
 0x11c   : > { %v508_v40 = vadd.f32 %v506_v39, %v501_v37 }
 0x11e   : > { %v512_v41 = vmul.f32 %v675_v38, %v508_v40 }
 0x120   : > { %v514_v42 = vsel %vm513_vm0, %v512_v41, 0.0 }
 0x121   : > { %515 = vadd.xlane.f32.xlu0 %v514_v42 }
 0x194   : > { %v516_v43 = vpop.xlane.xlu0 %515 }
 0x195   : > { %v517_v44 = vmul.f32 0.015625, %v516_v43 }
 0x197   : > { %v518_v45 = vsub.f32 %v508_v40, %v517_v44 }
 0x199   : > { %v519_v46 = vmul.f32 %v518_v45, %v518_v45 }
 0x19b   : > { %v520_v47 = vmul.f32 %v675_v38, %v519_v46 }
 0x19d   : > { %v521_v48 = vsel %vm513_vm0, %v520_v47, 0.0 }
 0x19e   : > { %522 = vadd.xlane.f32.xlu1 %v521_v48 }
 0x211   : > { %v523_v49 = vpop.xlane.xlu1 %522 }
 0x212   : > { %v524_v50 = vmul.f32 0.015625, %v523_v49 }
 0x214   : > { %v525_v51 = vadd.f32 1e-05, %v524_v50 }
 0x216   : > { %676 = vrsqrt.f32 %v525_v51  ;;  %vm532_vm2 = vweird.f32 %v525_v51 }
 0x21c   : > { %v677_v52 = vpop.eup %676 }
 0x21d   : > { %v527_v53 = vmul.f32 %v677_v52, %v525_v51  ;;  %vm533_vm1 = vweird.f32 %v677_v52 }
 0x21e   : > { %vm534_vm3 = vmor %vm532_vm2, %vm533_vm1 }
 0x21f   : > { %v528_v54 = vmul.f32 %v677_v52, %v527_v53 }
 0x221   : > { %v529_v55 = vmul.f32 0.5, %v528_v54 }
 0x223   : > { %v530_v56 = vsub.f32 1.5, %v529_v55 }
 0x225   : > { %v531_v57 = vmul.f32 %v677_v52, %v530_v56 }
 0x227   : > { %v535_v58 = vsel %vm534_vm3, %v677_v52, %v531_v57 }
 0x228   : > { %v536_v59 = vmul.f32 %v535_v58, %v518_v45 }
 0x22a   : > { %vm537_vm4 = vcmp.ge.f32.partialorder %v536_v59, 0.0  ;;  %v544_v61 = vmul.f32 %v542_v60, %v536_v59 }
 0x22c   : > { %v545_v62 = vsel %vm537_vm4, %v536_v59, %v544_v61 }
 0x22d   : > { %v546_v63 = vmul.f32 %v675_v38, %v545_v62 }
 0x22f   : > { %652 = vst.msk [vmem:[%s583_s11 + $0x8] sm:$0xff] %vm513_vm0, %v546_v63 }
 0x230 PF: > { %s15_s18 = sadd.s32 1, %s684_s18  }
 0x231   : > { %p12_p4 = scmp.ge.s32.totalorder %s15_s18, 4  }
 0x233   :  { %14 = sbr.rel (!%p12_p4) target bundleno = 1 (0x1), region = 78 }

// kernel: dense_decoder_2_forward.12
= control target key start
LH: loop header
LB: loop body
LE: loop exit
PB: predicated region body
PF: predicated region fallthrough
CT: control target
= control target key end

     0   :  { %s774_s18 = smov 0   ;;  %s892_s0 = inlined_call_operand.vmem [shape: f32[2,24,120], index: 0, kind: input, shape index: {}, may-alias: {0,5}]   ;;  %s893_s1 = inlined_call_operand.vmem [shape: f32[9,8,16], index: 1, kind: input, shape index: {}]   ;;  %s894_s2 = inlined_call_operand.vmem [shape: f32[8,1], index: 2, kind: input, shape index: {}]   ;;  %s895_s3 = inlined_call_operand.vmem [shape: f32[8,1], index: 3, kind: input, shape index: {}]   ;;  %s896_s4 = inlined_call_operand.vmem [shape: f32[1,120], index: 4, kind: input, shape index: {}]   ;;  %s897_s5 = inlined_call_operand.vmem [shape: f32[2,24,120], index: 5, kind: output, shape index: {}, may-alias: {0,5}]  }
   0x1 LB: > { %s647_s19 = sadd.s32 4294967295, %s733_s18   ;;  %p651_p0 = scmp.ge.s32.totalorder %s733_s18, 1  ;;  %s733_s18 = sphi %s774_s18, %s15_s18  }
   0x2   : > { %p187_p1 = scmp.lt.s32.totalorder %s733_s18, 3 }
   0x4   : > { %p188_p2 = pnand %p651_p0, %p187_p1 }
   0x5   : > { %p216_p3 = scmp.lt.s32.totalorder (!%p188_p2), %s647_s19, 1  ;;  %s735_s24 = smov (!%p188_p2), 39  }
   0x6   : > { %191 = sbr.rel (%p188_p2) target bundleno = 576 (0x240), region = 40  ;;  %s736_s25 = smov (!%p188_p2), 41  }
   0x7   : > { %s737_s26 = smov (!%p188_p2), 40   ;;  %s738_s27 = smov (!%p188_p2), 21  }
   0x8   : > { %s739_s28 = smov (!%p188_p2), 1   ;;  %s740_s29 = smov (!%p188_p2), 20  }
   0x9   : > { %s741_s30 = smov (!%p188_p2), 19   ;;  %s742_s6 = smov (!%p188_p2), 127  }
   0xb   : > { %s905_s19 = smov (!%p216_p3, %s647_s19), 1  ;;  %vm239_vm0 = vcmask 334848   ;;  %vm308_vm2 = vcmask 318464   ;;  %vm448_vm4 = vcmask 7168   ;;  %vm250_vm6 = vcmask 326656   ;;  %v665_v9 = vld [vmem:[%s893_s1 + $0x10] sm:$0xff] }
   0xc   : > { %s704_s20 = smul.u32 24, %s905_s19  ;;  %vm810_vm1 = vmneg %vm239_vm0  ;;  %vm253_vm7 = vcmask 130048   ;;  %vm343_vm8 = vcmask 171008   ;;  %v654_v13 = vld [vmem:[%s893_s1 + $0x8] sm:$0xff]  ;;  %v536_v14 = vld [vmem:[%s894_s2] sm:$0xff]  ;;  %v743_v15 = vmov 0  }
   0xd   : > { %vm666_vm3 = vmneg %vm308_vm2  ;;  %722 = vset.pattern.permute.xlu1 %v743_v15  ;;  %723 = vset.pattern.permute.xlu0 %v743_v15  ;;  %v671_v16 = vld [vmem:[%s893_s1 + $0x18] sm:$0xff]  ;;  %v230_v17 = vld [vmem:[%s893_s1] sm:$0xff]  ;;  %vm378_vm11 = vcmask 162816   ;;  %vm509_vm13 = vcmask 973824   ;;  %vm413_vm14 = vcmask 154624   ;;  %vm547_vm0 = vcmask 982016  }
   0xe   : > { %s220_s23 = scalar_lea.vmem %s892_s0, %s704_s20  ;;  %vm816_vm5 = vmneg %vm448_vm4  ;;  %v572_v21 = vld [vmem:[%s895_s3] sm:$0xff]  ;;  %v689_v22 = vld [vmem:[%s893_s1 + $0x30] sm:$0xff]  ;;  %s617_s11 = scalar_lea.vmem %s897_s5, %s704_s20 }
   0xf   : > { %v790_v0 = vld [vmem:[%s220_s23 + $0x8] sm:$0xff]  ;;  %v792_v1 = vld [vmem:[%s220_s23] sm:$0xff]  ;;  %vm655_vm9 = vmneg %vm250_vm6 }
  0x10   : > { %304 = vrot.lane.b32.xlu0 %v790_v0, %s735_s24  ;;  %302 = vrot.lane.b32.xlu1 %v792_v1, %s735_s24  ;;  %vm826_vm10 = vmneg %vm343_vm8  ;;  %v695_v23 = vld [vmem:[%s893_s1 + $0x38] sm:$0xff]  ;;  %v677_v26 = vld [vmem:[%s893_s1 + $0x20] sm:$0xff] }
  0x11   : > { %235 = vrot.lane.b32.xlu2 %v790_v0, %s736_s25  ;;  %vm678_vm12 = vmneg %vm378_vm11  ;;  %v683_v30 = vld [vmem:[%s893_s1 + $0x28] sm:$0xff]  ;;  %v697_v31 = vld [vmem:[%s893_s1 + $0x40] sm:$0xff] }
  0x12   : > { %vm684_vm15 = vmneg %vm413_vm14  ;;  %v724_v50 = vld [vmem:[%s896_s4] ss:$0 sm:$0xff] }
  0x18   : > { %246 = vrot.lane.b32.xlu0 %v790_v0, %s737_s26  ;;  %339 = vrot.lane.b32.xlu1 %v790_v0, %s738_s27 }
  0x19   : > { %244 = vrot.lane.b32.xlu2 %v792_v1, %s737_s26 }
  0x20   : > { %337 = vrot.lane.b32.xlu0 %v792_v1, %s738_s27  ;;  %233 = vrot.lane.b32.xlu1 %v792_v1, %s736_s25 }
  0x21   : > { %444 = vrot.lane.b32.xlu2 %v790_v0, %s739_s28 }
  0x28   : > { %374 = vrot.lane.b32.xlu0 %v790_v0, %s740_s29  ;;  %442 = vrot.lane.b32.xlu1 %v792_v1, %s739_s28 }
  0x29   : > { %372 = vrot.lane.b32.xlu2 %v792_v1, %s740_s29 }
  0x30   : > { %409 = vrot.lane.b32.xlu0 %v790_v0, %s741_s30  ;;  %407 = vrot.lane.b32.xlu1 %v792_v1, %s741_s30 }
  0x31   : > { %505 = vrot.lane.b32.xlu2 %v790_v0, %s742_s6 }
  0x38   : > { %503 = vrot.lane.b32.xlu0 %v792_v1, %s742_s6  ;;  %539 = vperm.xlu1 %722, %v536_v14  }
  0x40   : > { %575 = vperm.xlu1 %722, %v572_v21  }
  0x6b   : > { %v236_v3 = vpop.permute.xlu2 %235 }
  0x6c   : > { %661 = vmatpush.msk.msra.mxu1 %vm810_vm1, %v236_v3 }
  0x73   : > { %v245_v4 = vpop.permute.xlu2 %244 }
  0x7b   : > { %v445_v7 = vpop.permute.xlu2 %444 }
  0x82   : > { %v305_v5 = vpop.permute.xlu0 %304  ;;  %v303_v6 = vpop.permute.xlu1 %302 }
  0x83   : > { %667 = vmatpush.msk.msra.mxu2 %vm666_vm3, %v305_v5  ;;  %v373_v18 = vpop.permute.xlu2 %372 }
  0x85   : > { %669 = vmatpush.msk.msra.mxu2 %vm666_vm3, %v303_v6 }
  0x86   : > { %670 = vmatmul.msk.f32.vlgmr.msra.gmra.mxu2 %vm253_vm7, %v665_v9 }
  0x87   : > { %691 = vmatpush.msk.msrb.mxu2 %vm816_vm5, %v445_v7 }
  0x8a   : > { %v247_v11 = vpop.permute.xlu0 %246  ;;  %v340_v12 = vpop.permute.xlu1 %339 }
  0x8b   : > { %656 = vmatpush.msk.msra.mxu0 %vm655_vm9, %v247_v11  ;;  %673 = vmatpush.msk.msra.mxu3 %vm826_vm10, %v340_v12  ;;  %v506_v27 = vpop.permute.xlu2 %505 }
  0x8d   : > { %658 = vmatpush.msk.msra.mxu0 %vm655_vm9, %v245_v4 }
  0x8e   : > { %659 = vmatmul.msk.f32.vlgmr.msra.gmra.mxu0 %vm253_vm7, %v654_v13 }
  0x92   : > { %v338_v19 = vpop.permute.xlu0 %337  ;;  %v234_v20 = vpop.permute.xlu1 %233 }
  0x93   : > { %675 = vmatpush.msk.msra.mxu3 %vm826_vm10, %v338_v19  ;;  %663 = vmatpush.msk.msra.mxu1 %vm810_vm1, %v234_v20 }
  0x94   : > { %676 = vmatmul.msk.f32.vlgmr.msra.gmra.mxu3 %vm253_vm7, %v671_v16  ;;  %664 = vmatmul.msk.f32.vlgmr.msra.gmra.mxu1 %vm253_vm7, %v230_v17 }
  0x95   : > { %494 = vmatpush.msrb.mxu3 %v790_v0 }
  0x97   : > { %495 = vmatpush.msrb.mxu3 %v792_v1 }
  0x9a   : > { %v375_v24 = vpop.permute.xlu0 %374  ;;  %v443_v25 = vpop.permute.xlu1 %442 }
  0x9b   : > { %679 = vmatpush.msk.msrb.mxu0 %vm678_vm12, %v375_v24  ;;  %693 = vmatpush.msk.msrb.mxu2 %vm816_vm5, %v443_v25 }
  0x9c   : > { %694 = vmatmul.msk.f32.vlgmr.msrb.gmra.mxu2 %vm253_vm7, %v689_v22  ;;  %696 = vmatmul.msk.f32.vlgmr.msrb.gmra.mxu3 %vm253_vm7, %v695_v23 }
  0x9d   : > { %681 = vmatpush.msk.msrb.mxu0 %vm678_vm12, %v373_v18 }
  0x9e   : > { %682 = vmatmul.msk.f32.vlgmr.msrb.gmra.mxu0 %vm253_vm7, %v677_v26 }
  0x9f   : > { %698 = vmatpush.msk.msra.mxu0 %vm509_vm13, %v506_v27 }
  0xa2   : > { %v410_v28 = vpop.permute.xlu0 %409  ;;  %v408_v29 = vpop.permute.xlu1 %407 }
  0xa3   : > { %685 = vmatpush.msk.msrb.mxu1 %vm684_vm15, %v410_v28 }
  0xa5   : > { %687 = vmatpush.msk.msrb.mxu1 %vm684_vm15, %v408_v29 }
  0xa6   : > { %688 = vmatmul.msk.f32.vlgmr.msrb.gmra.mxu1 %vm253_vm7, %v683_v30 }
  0xaa   : > { %v504_v32 = vpop.permute.xlu0 %503  ;;  %v540_v51 = vpop.permute.xlu1 %539 }
  0xab   : > { %699 = vmatpush.msk.msra.mxu0 %vm509_vm13, %v504_v32 }
  0xac   : > { %700 = vmatmul.msk.f32.vlgmr.msra.gmra.mxu0 %vm253_vm7, %v697_v31 }
  0xb2   : > { %v576_v8 = vpop.permute.xlu1 %575 }
 0x109   : > { %v331_v36 = vpop.f32.mrf.mxu2 }
 0x10b   : > { %v274_v34 = vpop.f32.mrf.mxu0 }
 0x111   : > { %v297_v33 = vpop.f32.mrf.mxu1 }
 0x112   : > { %v298_v35 = vadd.f32 %v297_v33, %v274_v34 }
 0x114   : > { %v334_v37 = vadd.f32 %v331_v36, %v298_v35 }
 0x117   : > { %v366_v38 = vpop.f32.mrf.mxu3 }
 0x118   : > { %v369_v39 = vadd.f32 %v366_v38, %v334_v37 }
 0x11b   : > { %v401_v40 = vpop.f32.mrf.mxu0 }
 0x11c   : > { %v404_v41 = vadd.f32 %v401_v40, %v369_v39 }
 0x11f   : > { %v471_v43 = vpop.f32.mrf.mxu2  ;;  %v497_v45 = vpop.f32.mrf.mxu3 }
 0x123   : > { %v436_v42 = vpop.f32.mrf.mxu1 }
 0x124   : > { %v439_v44 = vadd.f32 %v436_v42, %v404_v41 }
 0x126   : > { %v474_v46 = vadd.f32 %v471_v43, %v439_v44 }
 0x128   : > { %v500_v47 = vadd.f32 %v497_v45, %v474_v46 }
 0x129   : > { %v532_v48 = vpop.f32.mrf.mxu0 }
 0x12a   : > { %v535_v49 = vadd.f32 %v532_v48, %v500_v47 }
 0x12c   : > { %v542_v52 = vadd.f32 %v540_v51, %v535_v49 }
 0x12e   : > { %v546_v53 = vmul.f32 %v724_v50, %v542_v52 }
 0x130   : > { %v548_v54 = vsel %vm547_vm0, %v546_v53, 0.0 }
 0x131   : > { %549 = vadd.xlane.f32.xlu2 %v548_v54 }
 0x1a4   : > { %v550_v55 = vpop.xlane.xlu2 %549 }
 0x1a5   : > { %v551_v56 = vmul.f32 0.015625, %v550_v55 }
 0x1a7   : > { %v552_v57 = vsub.f32 %v542_v52, %v551_v56 }
 0x1a9   : > { %v553_v58 = vmul.f32 %v552_v57, %v552_v57 }
 0x1ab   : > { %v554_v59 = vmul.f32 %v724_v50, %v553_v58 }
 0x1ad   : > { %v555_v60 = vsel %vm547_vm0, %v554_v59, 0.0 }
 0x1ae   : > { %556 = vadd.xlane.f32.xlu0 %v555_v60 }
 0x221   : > { %v557_v61 = vpop.xlane.xlu0 %556 }
 0x222   : > { %v558_v62 = vmul.f32 0.015625, %v557_v61 }
 0x224   : > { %v559_v63 = vadd.f32 1e-05, %v558_v62 }
 0x226   : > { %725 = vrsqrt.f32 %v559_v63  ;;  %vm566_vm2 = vweird.f32 %v559_v63 }
 0x22c   : > { %v726_v0 = vpop.eup %725 }
 0x22d   : > { %v561_v1 = vmul.f32 %v726_v0, %v559_v63  ;;  %vm567_vm1 = vweird.f32 %v726_v0 }
 0x22e   : > { %vm568_vm3 = vmor %vm566_vm2, %vm567_vm1 }
 0x22f   : > { %v562_v2 = vmul.f32 %v726_v0, %v561_v1 }
 0x231   : > { %v563_v3 = vmul.f32 0.5, %v562_v2 }
 0x233   : > { %v564_v4 = vsub.f32 1.5, %v563_v3 }
 0x235   : > { %v565_v5 = vmul.f32 %v726_v0, %v564_v4 }
 0x237   : > { %v569_v6 = vsel %vm568_vm3, %v726_v0, %v565_v5 }
 0x238   : > { %v570_v7 = vmul.f32 %v569_v6, %v552_v57 }
 0x23a   : > { %vm571_vm4 = vcmp.ge.f32.partialorder %v570_v7, 0.0  ;;  %v578_v9 = vmul.f32 %v576_v8, %v570_v7 }
 0x23c   : > { %v579_v10 = vsel %vm571_vm4, %v570_v7, %v578_v9 }
 0x23d   : > { %v580_v11 = vmul.f32 %v724_v50, %v579_v10 }
 0x23f   : > { %701 = vst.msk [vmem:[%s617_s11 + $0x10] sm:$0xff] %vm547_vm0, %v580_v11 }
 0x240 PF: > { %s15_s18 = sadd.s32 1, %s733_s18  }
 0x241   : > { %p12_p4 = scmp.ge.s32.totalorder %s15_s18, 4  }
 0x243   :  { %14 = sbr.rel (!%p12_p4) target bundleno = 1 (0x1), region = 78 }

// kernel: dense_decoder_2_forward.13
= control target key start
LH: loop header
LB: loop body
LE: loop exit
PB: predicated region body
PF: predicated region fallthrough
CT: control target
= control target key end

     0   :  { %s457_s15 = smov 0   ;;  %s511_s0 = inlined_call_operand.vmem [shape: f32[2,8,64], index: 0, kind: input, shape index: {}]   ;;  %s512_s1 = inlined_call_operand.vmem [shape: f32[3,16,8], index: 1, kind: input, shape index: {}]   ;;  %s513_s2 = inlined_call_operand.vmem [shape: f32[16,1], index: 2, kind: input, shape index: {}]   ;;  %s514_s3 = inlined_call_operand.vmem [shape: f32[3,64], index: 3, kind: input, shape index: {}]   ;;  %s515_s4 = inlined_call_operand.vmem [shape: f32[2,16,64], index: 4, kind: output, shape index: {}]  }
   0x1 LB: > { %s386_s16 = sadd.s32 4294967295, %s427_s15   ;;  %p390_p0 = scmp.ge.s32.totalorder %s427_s15, 1  ;;  %s427_s15 = sphi %s457_s15, %s14_s15  }
   0x2   : > { %p161_p1 = scmp.lt.s32.totalorder %s427_s15, 3 }
   0x4   : > { %p162_p2 = pnand %p390_p0, %p161_p1 }
   0x5   : > { %p186_p3 = scmp.lt.s32.totalorder (!%p162_p2), %s386_s16, 1  ;;  %s429_s21 = smov (!%p162_p2), 127  }
   0x6   : > { %165 = sbr.rel (%p162_p2) target bundleno = 285 (0x11d), region = 36  ;;  %s430_s22 = smov (!%p162_p2), 1  }
   0xb   : > { %s517_s16 = smov (!%p186_p3, %s386_s16), 1  ;;  %v196_v1 = vld [vmem:[%s514_s3] sm:$0x7]  ;;  %vm212_vm0 = vcmask 64512   ;;  %v394_v4 = vld [vmem:[%s512_s1 + $0x10] sm:$0xff]  ;;  %v395_v5 = vld [vmem:[%s512_s1 + $0x18] sm:$0xff] }
   0xc   : > { %s391_s17 = sshll.u32 %s517_s16, 3  ;;  %v210_v2 = vperm.slane %v196_v1, 1  ;;  %v312_v6 = vld [vmem:[%s513_s2] sm:$0xff]  ;;  %v431_v7 = vmov 0   ;;  %v313_v8 = vld [vmem:[%s513_s2 + $0x8] sm:$0xff]  ;;  %vm277_vm1 = vcmask 515072  }
   0xd   : > { %s189_s20 = scalar_lea.vmem %s511_s0, %s391_s17  ;;  %419 = vset.pattern.permute.xlu1 %v431_v7  ;;  %420 = vset.pattern.permute.xlu0 %v431_v7  ;;  %v279_v9 = vperm.slane %v196_v1, 2  ;;  %v400_v13 = vld [vmem:[%s512_s1 + $0x20] sm:$0xff]  ;;  %vm203_vm2 = vcmask 7168   ;;  %v205_v14 = vperm.slane %v196_v1, 0  ;;  %v401_v19 = vld [vmem:[%s512_s1 + $0x28] sm:$0xff]  ;;  %s406_s17 = sshll.u32 %s517_s16, 4 }
   0xe   : > { %v195_v0 = vld [vmem:[%s189_s20] sm:$0xff]  ;;  %316 = vperm.xlu1 %419, %v312_v6   ;;  %v198_v20 = vld [vmem:[%s512_s1 + $0x8] sm:$0xff]  ;;  %s194_s20 = scalar_lea.vmem %s515_s4, %s406_s17  ;;  %vm328_vm3 = vcmask 523264  }
   0xf   : > { %274 = vrot.lane.b32.xlu0 %v195_v0, %s429_s21  ;;  %v211_v3 = vmul.f32 %v210_v2, %v195_v0  ;;  %v197_v18 = vld [vmem:[%s512_s1] sm:$0xff] }
  0x11   : > { %234 = vmatpush.msra.mxu0 %v211_v3  ;;  %407 = vmatpush.msra.mxu3 %v211_v3 }
  0x12   : > { %396 = vmatmul.msk.f32.vlgmr.msra.gmra.mxu0 %vm212_vm0, %v394_v4  ;;  %397 = vmatmul.msk.f32.vlgmr.msra.gmra.mxu3 %vm212_vm0, %v395_v5 }
  0x16   : > { %321 = vperm.xlu1 %419, %v313_v8  }
  0x17   : > { %200 = vrot.lane.b32.xlu0 %v195_v0, %s430_s22 }
  0x80   : > { %v317_v25 = vpop.permute.xlu1 %316 }
  0x81   : > { %v275_v10 = vpop.permute.xlu0 %274 }
  0x82   : > { %v278_v11 = vsel %vm277_vm1, %v275_v10, 0.0 }
  0x83   : > { %v280_v12 = vmul.f32 %v279_v9, %v278_v11 }
  0x85   : > { %302 = vmatpush.msra.mxu2 %v280_v12 }
  0x86   : > { %402 = vmatmul.msk.f32.vlgmr.msra.gmra.mxu2 %vm212_vm0, %v400_v13 }
  0x88   : > { %v322_v34 = vpop.permute.xlu1 %321 }
  0x89   : > { %v201_v15 = vpop.permute.xlu0 %200 }
  0x8a   : > { %v204_v16 = vsel %vm203_vm2, 0.0, %v201_v15 }
  0x8b   : > { %v206_v17 = vmul.f32 %v205_v14, %v204_v16 }
  0x8d   : > { %263 = vmatpush.msra.mxu1 %v206_v17 }
  0x8e   : > { %398 = vmatmul.msk.f32.vlgmr.msra.gmra.mxu1 %vm212_vm0, %v197_v18  ;;  %403 = vmatmul.msk.f32.gmra.mxu2 %vm212_vm0, %v401_v19 }
  0x8f   : > { %v236_v21 = vpop.f32.mrf.mxu0 }
  0x95   : > { %v239_v28 = vpop.f32.mrf.mxu3 }
  0x96   : > { %399 = vmatmul.msk.f32.gmra.mxu1 %vm212_vm0, %v198_v20 }
 0x109   : > { %v304_v22 = vpop.f32.mrf.mxu2 }
 0x10b   : > { %v265_v23 = vpop.f32.mrf.mxu1 }
 0x10c   : > { %v266_v24 = vadd.f32 %v265_v23, %v236_v21 }
 0x10e   : > { %v310_v26 = vadd.f32 %v304_v22, %v266_v24 }
 0x110   : > { %v324_v27 = vadd.f32 %v317_v25, %v310_v26 }
 0x111   : > { %v307_v31 = vpop.f32.mrf.mxu2 }
 0x112   : > { %v326_v29 = vmul.f32 %v324_v27, %v210_v2 }
 0x113   : > { %v268_v30 = vpop.f32.mrf.mxu1 }
 0x114   : > { %329 = vst.msk [vmem:[%s194_s20] sm:$0xff] %vm328_vm3, %v326_v29  ;;  %v269_v32 = vadd.f32 %v268_v30, %v239_v28 }
 0x116   : > { %v311_v33 = vadd.f32 %v307_v31, %v269_v32 }
 0x118   : > { %v325_v35 = vadd.f32 %v322_v34, %v311_v33 }
 0x11a   : > { %v327_v36 = vmul.f32 %v325_v35, %v210_v2 }
 0x11c   : > { %330 = vst.msk [vmem:[%s194_s20 + $0x8] sm:$0xff] %vm328_vm3, %v327_v36 }
 0x11d PF: > { %s14_s15 = sadd.s32 1, %s427_s15  }
 0x11e   : > { %p11_p4 = scmp.ge.s32.totalorder %s14_s15, 4  }
 0x120   :  { %13 = sbr.rel (!%p11_p4) target bundleno = 1 (0x1), region = 68 }

// kernel: dense_decoder_2_forward.15
= control target key start
LH: loop header
LB: loop body
LE: loop exit
PB: predicated region body
PF: predicated region fallthrough
CT: control target
= control target key end

     0   :  { %s456_s15 = smov 0   ;;  %s510_s0 = inlined_call_operand.vmem [shape: f32[2,8,128], index: 0, kind: input, shape index: {}]   ;;  %s511_s1 = inlined_call_operand.vmem [shape: f32[3,16,8], index: 1, kind: input, shape index: {}]   ;;  %s512_s2 = inlined_call_operand.vmem [shape: f32[16,1], index: 2, kind: input, shape index: {}]   ;;  %s513_s3 = inlined_call_operand.vmem [shape: f32[3,128], index: 3, kind: input, shape index: {}]   ;;  %s514_s4 = inlined_call_operand.vmem [shape: f32[2,16,128], index: 4, kind: output, shape index: {}]  }
   0x1 LB: > { %s385_s16 = sadd.s32 4294967295, %s426_s15   ;;  %p389_p0 = scmp.ge.s32.totalorder %s426_s15, 1  ;;  %s426_s15 = sphi %s456_s15, %s14_s15  }
   0x2   : > { %p161_p1 = scmp.lt.s32.totalorder %s426_s15, 3 }
   0x4   : > { %p162_p2 = pnand %p389_p0, %p161_p1 }
   0x5   : > { %p186_p3 = scmp.lt.s32.totalorder (!%p162_p2), %s385_s16, 1  ;;  %s428_s21 = smov (!%p162_p2), 127  }
   0x6   : > { %165 = sbr.rel (%p162_p2) target bundleno = 285 (0x11d), region = 36  ;;  %s429_s22 = smov (!%p162_p2), 1  }
   0xb   : > { %s516_s16 = smov (!%p186_p3, %s385_s16), 1  ;;  %v196_v1 = vld [vmem:[%s513_s3] sm:$0x7]  ;;  %vm212_vm0 = vcmask 64512   ;;  %v393_v4 = vld [vmem:[%s511_s1 + $0x10] sm:$0xff]  ;;  %v394_v5 = vld [vmem:[%s511_s1 + $0x18] sm:$0xff] }
   0xc   : > { %s390_s17 = sshll.u32 %s516_s16, 3  ;;  %v210_v2 = vperm.slane %v196_v1, 1  ;;  %v312_v6 = vld [vmem:[%s512_s2] sm:$0xff]  ;;  %v430_v7 = vmov 0   ;;  %v313_v8 = vld [vmem:[%s512_s2 + $0x8] sm:$0xff]  ;;  %vm277_vm1 = vcmask 1039360  }
   0xd   : > { %s189_s20 = scalar_lea.vmem %s510_s0, %s390_s17  ;;  %418 = vset.pattern.permute.xlu1 %v430_v7  ;;  %419 = vset.pattern.permute.xlu0 %v430_v7  ;;  %v279_v9 = vperm.slane %v196_v1, 2  ;;  %v399_v13 = vld [vmem:[%s511_s1 + $0x20] sm:$0xff]  ;;  %vm203_vm2 = vcmask 7168   ;;  %v205_v14 = vperm.slane %v196_v1, 0  ;;  %v400_v19 = vld [vmem:[%s511_s1 + $0x28] sm:$0xff]  ;;  %s405_s17 = sshll.u32 %s516_s16, 4 }
   0xe   : > { %v195_v0 = vld [vmem:[%s189_s20] sm:$0xff]  ;;  %316 = vperm.xlu1 %418, %v312_v6   ;;  %v198_v20 = vld [vmem:[%s511_s1 + $0x8] sm:$0xff]  ;;  %s194_s20 = scalar_lea.vmem %s514_s4, %s405_s17 }
   0xf   : > { %274 = vrot.lane.b32.xlu0 %v195_v0, %s428_s21  ;;  %v211_v3 = vmul.f32 %v210_v2, %v195_v0  ;;  %v197_v18 = vld [vmem:[%s511_s1] sm:$0xff] }
  0x11   : > { %234 = vmatpush.msra.mxu0 %v211_v3  ;;  %406 = vmatpush.msra.mxu3 %v211_v3 }
  0x12   : > { %395 = vmatmul.msk.f32.vlgmr.msra.gmra.mxu0 %vm212_vm0, %v393_v4  ;;  %396 = vmatmul.msk.f32.vlgmr.msra.gmra.mxu3 %vm212_vm0, %v394_v5 }
  0x16   : > { %321 = vperm.xlu1 %418, %v313_v8  }
  0x17   : > { %200 = vrot.lane.b32.xlu0 %v195_v0, %s429_s22 }
  0x80   : > { %v317_v25 = vpop.permute.xlu1 %316 }
  0x81   : > { %v275_v10 = vpop.permute.xlu0 %274 }
  0x82   : > { %v278_v11 = vsel %vm277_vm1, %v275_v10, 0.0 }
  0x83   : > { %v280_v12 = vmul.f32 %v279_v9, %v278_v11 }
  0x85   : > { %302 = vmatpush.msra.mxu2 %v280_v12 }
  0x86   : > { %401 = vmatmul.msk.f32.vlgmr.msra.gmra.mxu2 %vm212_vm0, %v399_v13 }
  0x88   : > { %v322_v34 = vpop.permute.xlu1 %321 }
  0x89   : > { %v201_v15 = vpop.permute.xlu0 %200 }
  0x8a   : > { %v204_v16 = vsel %vm203_vm2, 0.0, %v201_v15 }
  0x8b   : > { %v206_v17 = vmul.f32 %v205_v14, %v204_v16 }
  0x8d   : > { %263 = vmatpush.msra.mxu1 %v206_v17 }
  0x8e   : > { %397 = vmatmul.msk.f32.vlgmr.msra.gmra.mxu1 %vm212_vm0, %v197_v18  ;;  %402 = vmatmul.msk.f32.gmra.mxu2 %vm212_vm0, %v400_v19 }
  0x8f   : > { %v236_v21 = vpop.f32.mrf.mxu0 }
  0x95   : > { %v239_v28 = vpop.f32.mrf.mxu3 }
  0x96   : > { %398 = vmatmul.msk.f32.gmra.mxu1 %vm212_vm0, %v198_v20 }
 0x109   : > { %v304_v22 = vpop.f32.mrf.mxu2 }
 0x10b   : > { %v265_v23 = vpop.f32.mrf.mxu1 }
 0x10c   : > { %v266_v24 = vadd.f32 %v265_v23, %v236_v21 }
 0x10e   : > { %v310_v26 = vadd.f32 %v304_v22, %v266_v24 }
 0x110   : > { %v324_v27 = vadd.f32 %v317_v25, %v310_v26 }
 0x111   : > { %v307_v31 = vpop.f32.mrf.mxu2 }
 0x112   : > { %v326_v29 = vmul.f32 %v324_v27, %v210_v2 }
 0x113   : > { %v268_v30 = vpop.f32.mrf.mxu1 }
 0x114   : > { %328 = vst [vmem:[%s194_s20] sm:$0xff] %v326_v29  ;;  %v269_v32 = vadd.f32 %v268_v30, %v239_v28 }
 0x116   : > { %v311_v33 = vadd.f32 %v307_v31, %v269_v32 }
 0x118   : > { %v325_v35 = vadd.f32 %v322_v34, %v311_v33 }
 0x11a   : > { %v327_v36 = vmul.f32 %v325_v35, %v210_v2 }
 0x11c   : > { %329 = vst [vmem:[%s194_s20 + $0x8] sm:$0xff] %v327_v36 }
 0x11d PF: > { %s14_s15 = sadd.s32 1, %s426_s15  }
 0x11e   : > { %p11_p4 = scmp.ge.s32.totalorder %s14_s15, 4  }
 0x120   :  { %13 = sbr.rel (!%p11_p4) target bundleno = 1 (0x1), region = 68 }

// kernel: dense_decoder_2_forward.14
= control target key start
LH: loop header
LB: loop body
LE: loop exit
PB: predicated region body
PF: predicated region fallthrough
CT: control target
= control target key end

     0   :  { %s906_s21 = smov 0   ;;  %s1117_s0 = inlined_call_operand.vmem [shape: f32[2,8,128], index: 0, kind: input, shape index: {}]   ;;  %s1118_s1 = inlined_call_operand.vmem [shape: f32[1,128], index: 1, kind: input, shape index: {}]   ;;  %s1119_s2 = inlined_call_operand.vmem [shape: f32[1,128], index: 2, kind: input, shape index: {}]   ;;  %s1120_s3 = inlined_call_operand.vmem [shape: f32[8,1], index: 3, kind: input, shape index: {}]   ;;  %s1121_s4 = inlined_call_operand.vmem [shape: f32[2,8,8], index: 4, kind: input, shape index: {}]   ;;  %s1122_s5 = inlined_call_operand.vmem [shape: f32[8,1], index: 5, kind: input, shape index: {}]   ;;  %s1123_s6 = inlined_call_operand.vmem [shape: f32[1,128], index: 6, kind: input, shape index: {}]   ;;  %s1124_s7 = inlined_call_operand.vmem [shape: f32[1,128], index: 7, kind: input, shape index: {}]   ;;  %s1125_s8 = inlined_call_operand.vmem [shape: f32[8,1], index: 8, kind: input, shape index: {}]   ;;  %s1126_s9 = inlined_call_operand.vmem [shape: f32[128,8], index: 9, kind: input, shape index: {}]   ;;  %s1127_s10 = inlined_call_operand.vmem [shape: f32[8,128], index: 10, kind: input, shape index: {}]   ;;  %s1128_s11 = inlined_call_operand.vmem [shape: f32[1,128], index: 11, kind: input, shape index: {}]   ;;  %s1129_s12 = inlined_call_operand.vmem [shape: f32[2,8,128], index: 12, kind: output, shape index: {}]  }
   0x1 LB: > { %s793_s22 = sadd.s32 4294967295, %s837_s21   ;;  %p797_p0 = scmp.ge.s32.totalorder %s837_s21, 1  ;;  %s837_s21 = sphi %s906_s21, %s22_s21  }
   0x2   : > { %p361_p1 = scmp.lt.s32.totalorder %s837_s21, 3 }
   0x4   : > { %p362_p2 = pnand %p797_p0, %p361_p1 }
   0x5   : > { %p401_p3 = scmp.lt.s32.totalorder (!%p362_p2), %s793_s22, 1  ;;  %s840_s20 = smov (!%p362_p2), 127  }
   0x6   : > { %365 = sbr.rel (%p362_p2) target bundleno = 1402 (0x57a), region = 68 }
   0xb   : > { %v917_v0 = vld [vmem:[%s1126_s9 + $0x78] sm:$0xff]  ;;  %v922_v1 = vld [vmem:[%s1126_s9 + $0x70] sm:$0xff]  ;;  %v929_v2 = vld [vmem:[%s1126_s9 + $0x68] sm:$0xff]  ;;  %s1131_s22 = smov (!%p401_p3, %s793_s22), 1  ;;  %vm448_vm0 = vcmask 64512   ;;  %v839_v24 = vmov 0  }
   0xc   : > { %428 = vmatpush.msra.mxu0 %v917_v0  ;;  %475 = vmatpush.msra.mxu2 %v917_v0  ;;  %v936_v3 = vld [vmem:[%s1126_s9 + $0x60] sm:$0xff]  ;;  %v943_v4 = vld [vmem:[%s1126_s9 + $0x58] sm:$0xff]  ;;  %v950_v5 = vld [vmem:[%s1126_s9 + $0x50] sm:$0xff]  ;;  %s798_s15 = sshll.u32 %s1131_s22, 3  ;;  %vm557_vm5 = vcmask 1039360  }
   0xd   : > { %v957_v6 = vld [vmem:[%s1126_s9 + $0x48] sm:$0xff]  ;;  %v964_v7 = vld [vmem:[%s1126_s9 + $0x40] sm:$0xff]  ;;  %v971_v8 = vld [vmem:[%s1126_s9 + $0x38] sm:$0xff]  ;;  %s404_s24 = scalar_lea.vmem %s1117_s0, %s798_s15  ;;  %820 = vset.pattern.permute.xlu0 %v839_v24  ;;  %821 = vset.pattern.permute.xlu1 %v839_v24 }
   0xe   : > { %429 = vmatpush.msra.mxu0 %v922_v1  ;;  %476 = vmatpush.msra.mxu2 %v922_v1  ;;  %v980_v9 = vld [vmem:[%s1126_s9 + $0x30] sm:$0xff]  ;;  %v987_v10 = vld [vmem:[%s1126_s9 + $0x28] sm:$0xff]  ;;  %v998_v11 = vld [vmem:[%s1126_s9 + $0x20] sm:$0xff] }
   0xf   : > { %v1005_v12 = vld [vmem:[%s1126_s9 + $0x18] sm:$0xff]  ;;  %v1013_v13 = vld [vmem:[%s1126_s9 + $0x10] sm:$0xff]  ;;  %v1020_v14 = vld [vmem:[%s1126_s9 + $0x8] sm:$0xff] }
  0x10   : > { %430 = vmatpush.msra.mxu0 %v929_v2  ;;  %477 = vmatpush.msra.mxu2 %v929_v2  ;;  %v1032_v15 = vld [vmem:[%s1126_s9] sm:$0xff]  ;;  %v802_v47 = vld [vmem:[%s1121_s4 + $0x8] sm:$0xff] }
  0x11   : > { %v409_v16 = vld [vmem:[%s404_s24] sm:$0xff] }
  0x12   : > { %431 = vmatpush.msra.mxu0 %v936_v3  ;;  %478 = vmatpush.msra.mxu2 %v936_v3  ;;  %v426_v17 = vld [vmem:[%s1127_s10] sm:$0xff] }
  0x13   : > { %467 = vmatpush.msra.mxu1 %v426_v17  ;;  %v542_v23 = vld [vmem:[%s1120_s3] sm:$0xff] }
  0x14   : > { %432 = vmatpush.msra.mxu0 %v943_v4  ;;  %479 = vmatpush.msra.mxu2 %v943_v4  ;;  %v822_v35 = vld [vmem:[%s1118_s1] ss:$0 sm:$0xff] }
  0x15   : > { %545 = vperm.xlu0 %820, %v542_v23   ;;  %v823_v38 = vld [vmem:[%s1119_s2] ss:$0 sm:$0xff] }
  0x16   : > { %433 = vmatpush.msra.mxu0 %v950_v5  ;;  %480 = vmatpush.msra.mxu2 %v950_v5  ;;  %v550_v43 = vld [vmem:[%s1121_s4] sm:$0xff] }
  0x17   : > { %v605_v45 = vld [vmem:[%s1122_s5] sm:$0xff] }
  0x18   : > { %434 = vmatpush.msra.mxu0 %v957_v6  ;;  %481 = vmatpush.msra.mxu2 %v957_v6  ;;  %v730_v46 = vld [vmem:[%s1125_s8] sm:$0xff] }
  0x19   : > { %608 = vperm.xlu1 %821, %v605_v45   ;;  %v824_v52 = vld [vmem:[%s1128_s11] ss:$0 sm:$0xff] }
  0x1a   : > { %435 = vmatpush.msra.mxu0 %v964_v7  ;;  %482 = vmatpush.msra.mxu2 %v964_v7 }
  0x1c   : > { %436 = vmatpush.msra.mxu0 %v971_v8  ;;  %483 = vmatpush.msra.mxu2 %v971_v8 }
  0x1e   : > { %437 = vmatpush.msra.mxu0 %v980_v9  ;;  %484 = vmatpush.msra.mxu2 %v980_v9 }
  0x20   : > { %438 = vmatpush.msra.mxu0 %v987_v10  ;;  %485 = vmatpush.msra.mxu2 %v987_v10 }
  0x21   : > { %733 = vperm.xlu1 %821, %v730_v46  }
  0x22   : > { %439 = vmatpush.msra.mxu0 %v998_v11  ;;  %486 = vmatpush.msra.mxu2 %v998_v11 }
  0x24   : > { %440 = vmatpush.msra.mxu0 %v1005_v12  ;;  %487 = vmatpush.msra.mxu2 %v1005_v12 }
  0x26   : > { %441 = vmatpush.msra.mxu0 %v1013_v13  ;;  %488 = vmatpush.msra.mxu2 %v1013_v13 }
  0x28   : > { %442 = vmatpush.msra.mxu0 %v1020_v14  ;;  %489 = vmatpush.msra.mxu2 %v1020_v14 }
  0x2a   : > { %443 = vmatpush.msra.mxu0 %v1032_v15  ;;  %490 = vmatpush.msra.mxu2 %v1032_v15 }
  0x2b   : > { %444 = vmatmul.f32.vlgmr.msra.gmra.mxu0 %v409_v16 }
  0x2c   : > { %513 = vmatpush.msrb.mxu2 %v426_v17  ;;  %701 = vmatpush.msrb.mxu0 %v426_v17 }
  0x87   : > { %v546_v40 = vpop.permute.xlu0 %545 }
  0x8b   : > { %v609_v53 = vpop.permute.xlu1 %608 }
  0xa8   : > { %v445_v18 = vpop.f32.mrf.mxu0 }
  0xa9   : > { %800 = vmatmul.msk.f32.vlgmr.msra.gmra.mxu1 %vm448_vm0, %v445_v18 }
 0x126   : > { %v469_v19 = vpop.f32.mrf.mxu1 }
 0x127   : > { %v472_v20 = vmul.f32 0.0625, %v469_v19 }
 0x129   : > { %v473_v21 = vsub.f32 %v409_v16, %v472_v20 }
 0x12b   : > { %v474_v22 = vmul.f32 %v473_v21, %v473_v21 }
 0x12d   : > { %491 = vmatmul.f32.vlgmr.msra.gmra.mxu2 %v474_v22 }
 0x1b0   : > { %v492_v25 = vpop.f32.mrf.mxu2 }
 0x1b1   : > { %801 = vmatmul.msk.f32.vlgmr.msrb.gmra.mxu2 %vm448_vm0, %v492_v25 }
 0x234   : > { %v515_v26 = vpop.f32.mrf.mxu2 }
 0x235   : > { %v518_v27 = vmul.f32 0.0625, %v515_v26 }
 0x237   : > { %v519_v28 = vadd.f32 1e-05, %v518_v27 }
 0x239   : > { %827 = vrsqrt.f32 %v519_v28  ;;  %vm526_vm2 = vweird.f32 %v519_v28 }
 0x23f   : > { %v828_v29 = vpop.eup %827 }
 0x240   : > { %v521_v30 = vmul.f32 %v828_v29, %v519_v28  ;;  %vm527_vm1 = vweird.f32 %v828_v29 }
 0x241   : > { %vm528_vm3 = vmor %vm526_vm2, %vm527_vm1 }
 0x242   : > { %v522_v31 = vmul.f32 %v828_v29, %v521_v30 }
 0x244   : > { %v523_v32 = vmul.f32 0.5, %v522_v31 }
 0x246   : > { %v524_v33 = vsub.f32 1.5, %v523_v32 }
 0x248   : > { %v525_v34 = vmul.f32 %v828_v29, %v524_v33 }
 0x24a   : > { %v529_v36 = vsel %vm528_vm3, %v828_v29, %v525_v34 }
 0x24b   : > { %v530_v37 = vmul.f32 %v529_v36, %v473_v21 }
 0x24d   : > { %v535_v39 = vmul.f32 %v822_v35, %v530_v37 }
 0x24f   : > { %v540_v41 = vadd.f32 %v823_v38, %v535_v39 }
 0x251   : > { %v548_v42 = vmul.f32 %v546_v40, %v540_v41  ;;  %vm541_vm4 = vcmp.ge.f32.partialorder %v540_v41, 0.0 }
 0x253   : > { %v549_v44 = vsel %vm541_vm4, %v540_v41, %v548_v42 }
 0x254   : > { %554 = vrot.lane.b32.xlu0 %v549_v44, %s840_s20  ;;  %600 = vmatpush.msra.mxu3 %v549_v44  ;;  %s408_s20 = scalar_lea.vmem %s1129_s12, %s798_s15 }
 0x255   : > { %805 = vmatmul.msk.f32.vlgmr.msra.gmra.mxu3 %vm448_vm0, %v550_v43 }
 0x256   : > { %654 = vmatpush.msrb.mxu3 %v426_v17 }
 0x258   : > { %663 = vmatpush.msra.mxu3 %v917_v0 }
 0x25a   : > { %664 = vmatpush.msra.mxu3 %v922_v1 }
 0x25c   : > { %665 = vmatpush.msra.mxu3 %v929_v2 }
 0x25e   : > { %666 = vmatpush.msra.mxu3 %v936_v3 }
 0x260   : > { %667 = vmatpush.msra.mxu3 %v943_v4 }
 0x262   : > { %668 = vmatpush.msra.mxu3 %v950_v5 }
 0x264   : > { %669 = vmatpush.msra.mxu3 %v957_v6 }
 0x266   : > { %670 = vmatpush.msra.mxu3 %v964_v7 }
 0x268   : > { %671 = vmatpush.msra.mxu3 %v971_v8 }
 0x26a   : > { %672 = vmatpush.msra.mxu3 %v980_v9 }
 0x26c   : > { %673 = vmatpush.msra.mxu3 %v987_v10 }
 0x26e   : > { %674 = vmatpush.msra.mxu3 %v998_v11 }
 0x270   : > { %675 = vmatpush.msra.mxu3 %v1005_v12 }
 0x272   : > { %676 = vmatpush.msra.mxu3 %v1013_v13 }
 0x274   : > { %677 = vmatpush.msra.mxu3 %v1020_v14 }
 0x276   : > { %678 = vmatpush.msra.mxu3 %v1032_v15 }
 0x2c6   : > { %v555_v48 = vpop.permute.xlu0 %554 }
 0x2c7   : > { %803 = vmatpush.msk.msrb.mxu1 %vm557_vm5, %v555_v48 }
 0x2c8   : > { %804 = vmatmul.msk.f32.vlgmr.msrb.gmra.mxu1 %vm448_vm0, %v802_v47 }
 0x2c9   : > { %616 = vmatpush.msra.mxu1 %v917_v0 }
 0x2cb   : > { %617 = vmatpush.msra.mxu1 %v922_v1 }
 0x2cd   : > { %618 = vmatpush.msra.mxu1 %v929_v2 }
 0x2cf   : > { %619 = vmatpush.msra.mxu1 %v936_v3 }
 0x2d1   : > { %620 = vmatpush.msra.mxu1 %v943_v4 }
 0x2d3   : > { %621 = vmatpush.msra.mxu1 %v950_v5 }
 0x2d5   : > { %622 = vmatpush.msra.mxu1 %v957_v6 }
 0x2d7   : > { %623 = vmatpush.msra.mxu1 %v964_v7 }
 0x2d8   : > { %v602_v49 = vpop.f32.mrf.mxu3 }
 0x2d9   : > { %624 = vmatpush.msra.mxu1 %v971_v8  ;;  %v825_v8 = vld [vmem:[%s1123_s6] ss:$0 sm:$0xff] }
 0x2db   : > { %625 = vmatpush.msra.mxu1 %v980_v9 }
 0x2dd   : > { %626 = vmatpush.msra.mxu1 %v987_v10 }
 0x2df   : > { %627 = vmatpush.msra.mxu1 %v998_v11  ;;  %v826_v11 = vld [vmem:[%s1124_s7] ss:$0 sm:$0xff] }
 0x2e1   : > { %628 = vmatpush.msra.mxu1 %v1005_v12 }
 0x2e3   : > { %629 = vmatpush.msra.mxu1 %v1013_v13 }
 0x2e5   : > { %630 = vmatpush.msra.mxu1 %v1020_v14  ;;  %v734_v14 = vpop.permute.xlu1 %733 }
 0x2e7   : > { %631 = vmatpush.msra.mxu1 %v1032_v15 }
 0x345   : > { %v579_v50 = vpop.f32.mrf.mxu1 }
 0x346   : > { %v603_v51 = vadd.f32 %v602_v49, %v579_v50 }
 0x348   : > { %v611_v54 = vadd.f32 %v609_v53, %v603_v51 }
 0x34a   : > { %v615_v55 = vmul.f32 %v824_v52, %v611_v54 }
 0x34c   : > { %632 = vmatmul.f32.vlgmr.msra.gmra.mxu1 %v615_v55 }
 0x3c9   : > { %v633_v56 = vpop.f32.mrf.mxu1 }
 0x3ca   : > { %806 = vmatmul.msk.f32.vlgmr.msrb.gmra.mxu3 %vm448_vm0, %v633_v56 }
 0x44d   : > { %v656_v57 = vpop.f32.mrf.mxu3 }
 0x44e   : > { %v659_v58 = vmul.f32 0.06666667, %v656_v57 }
 0x450   : > { %v660_v59 = vsub.f32 %v615_v55, %v659_v58 }
 0x452   : > { %v661_v60 = vmul.f32 %v824_v52, %v660_v59 }
 0x454   : > { %v662_v61 = vmul.f32 %v661_v60, %v661_v60 }
 0x456   : > { %679 = vmatmul.f32.vlgmr.msra.gmra.mxu3 %v662_v61 }
 0x4d9   : > { %v680_v62 = vpop.f32.mrf.mxu3 }
 0x4da   : > { %807 = vmatmul.msk.f32.vlgmr.msrb.gmra.mxu0 %vm448_vm0, %v680_v62 }
 0x557   : > { %v703_v63 = vpop.f32.mrf.mxu0 }
 0x558   : > { %v706_v0 = vmul.f32 0.06666667, %v703_v63 }
 0x55a   : > { %v707_v1 = vadd.f32 1e-05, %v706_v0 }
 0x55c   : > { %829 = vrsqrt.f32 %v707_v1  ;;  %vm714_vm7 = vweird.f32 %v707_v1 }
 0x562   : > { %v830_v2 = vpop.eup %829 }
 0x563   : > { %v709_v3 = vmul.f32 %v830_v2, %v707_v1  ;;  %vm715_vm6 = vweird.f32 %v830_v2 }
 0x564   : > { %vm716_vm8 = vmor %vm714_vm7, %vm715_vm6 }
 0x565   : > { %v710_v4 = vmul.f32 %v830_v2, %v709_v3 }
 0x567   : > { %v711_v5 = vmul.f32 0.5, %v710_v4 }
 0x569   : > { %v712_v6 = vsub.f32 1.5, %v711_v5 }
 0x56b   : > { %v713_v7 = vmul.f32 %v830_v2, %v712_v6 }
 0x56d   : > { %v717_v9 = vsel %vm716_vm8, %v830_v2, %v713_v7 }
 0x56e   : > { %v718_v10 = vmul.f32 %v717_v9, %v661_v60 }
 0x570   : > { %v723_v12 = vmul.f32 %v825_v8, %v718_v10 }
 0x572   : > { %v728_v13 = vadd.f32 %v826_v11, %v723_v12 }
 0x574   : > { %vm729_vm9 = vcmp.ge.f32.partialorder %v728_v13, 0.0  ;;  %v736_v15 = vmul.f32 %v734_v14, %v728_v13 }
 0x576   : > { %v737_v16 = vsel %vm729_vm9, %v728_v13, %v736_v15 }
 0x577   : > { %v738_v17 = vmul.f32 %v824_v52, %v737_v16 }
 0x579   : > { %739 = vst [vmem:[%s408_s20] sm:$0xff] %v738_v17 }
 0x57a PF: > { %s22_s21 = sadd.s32 1, %s837_s21  }
 0x57b   : > { %p19_p4 = scmp.ge.s32.totalorder %s22_s21, 4  }
 0x57d   :  { %21 = sbr.rel (!%p19_p4) target bundleno = 1 (0x1), region = 99 }

// kernel: dense_decoder_2_forward.16
= control target key start
LH: loop header
LB: loop body
LE: loop exit
PB: predicated region body
PF: predicated region fallthrough
CT: control target
= control target key end

     0   :  { %s1219_s21 = smov 0   ;;  %s1592_s0 = inlined_call_operand.vmem [shape: f32[2,8,240], index: 0, kind: input, shape index: {}]   ;;  %s1593_s1 = inlined_call_operand.vmem [shape: f32[1,240], index: 1, kind: input, shape index: {}]   ;;  %s1594_s2 = inlined_call_operand.vmem [shape: f32[1,240], index: 2, kind: input, shape index: {}]   ;;  %s1595_s3 = inlined_call_operand.vmem [shape: f32[8,1], index: 3, kind: input, shape index: {}]   ;;  %s1596_s4 = inlined_call_operand.vmem [shape: f32[2,8,8], index: 4, kind: input, shape index: {}]   ;;  %s1597_s5 = inlined_call_operand.vmem [shape: f32[8,1], index: 5, kind: input, shape index: {}]   ;;  %s1598_s6 = inlined_call_operand.vmem [shape: f32[1,240], index: 6, kind: input, shape index: {}]   ;;  %s1599_s7 = inlined_call_operand.vmem [shape: f32[1,240], index: 7, kind: input, shape index: {}]   ;;  %s1600_s8 = inlined_call_operand.vmem [shape: f32[8,1], index: 8, kind: input, shape index: {}]   ;;  %s1601_s9 = inlined_call_operand.vmem [shape: f32[240,8], index: 9, kind: input, shape index: {}]   ;;  %s1602_s10 = inlined_call_operand.vmem [shape: f32[8,240], index: 10, kind: input, shape index: {}]   ;;  %s1603_s11 = inlined_call_operand.vmem [shape: f32[1,240], index: 11, kind: input, shape index: {}]   ;;  %s1604_s12 = inlined_call_operand.vmem [shape: f32[2,8,240], index: 12, kind: output, shape index: {}]  }
   0x1 LB: > { %s1092_s22 = sadd.s32 4294967295, %s1150_s21   ;;  %p1096_p0 = scmp.ge.s32.totalorder %s1150_s21, 1  ;;  %s1150_s21 = sphi %s1219_s21, %s22_s21  }
   0x2   : > { %p362_p1 = scmp.lt.s32.totalorder %s1150_s21, 3 }
   0x4   : > { %p363_p2 = pnand %p1096_p0, %p362_p1 }
   0x5   : > { %p404_p3 = scmp.lt.s32.totalorder (!%p363_p2), %s1092_s22, 1  ;;  %s1153_s16 = smov (!%p363_p2), 127  }
   0x6   : > { %366 = sbr.rel (%p363_p2) target bundleno = 1434 (0x59a), region = 68 }
   0xb   : > { %v1230_v0 = vld [vmem:[%s1601_s9 + $0x78] sm:$0xff]  ;;  %v1235_v1 = vld [vmem:[%s1601_s9 + $0x70] sm:$0xff]  ;;  %v1241_v2 = vld [vmem:[%s1601_s9 + $0xe8] sm:$0xff]  ;;  %s1606_s22 = smov (!%p404_p3, %s1092_s22), 1  ;;  %vm449_vm0 = vcmask 916480   ;;  %vm493_vm1 = vcmask 64512  }
   0xc   : > { %453 = vmatpush.msra.mxu0 %v1230_v0  ;;  %v1246_v3 = vld [vmem:[%s1601_s9 + $0xe0] sm:$0xff]  ;;  %v1251_v4 = vld [vmem:[%s1601_s9 + $0x68] sm:$0xff]  ;;  %475 = vmatpush.msra.mxu1 %v1241_v2  ;;  %v1258_v5 = vld [vmem:[%s1601_s9 + $0xd8] sm:$0xff]  ;;  %s1121_s19 = sshll.u32 %s1606_s22, 4  ;;  %v1152_v46 = vmov 0   ;;  %vm696_vm10 = vcmask 908288  }
   0xd   : > { %v1263_v6 = vld [vmem:[%s1601_s9 + $0x60] sm:$0xff]  ;;  %v1270_v7 = vld [vmem:[%s1601_s9 + $0xd0] sm:$0xff]  ;;  %v1275_v8 = vld [vmem:[%s1601_s9 + $0x58] sm:$0xff]  ;;  %s408_s30 = scalar_lea.vmem %s1592_s0, %s1121_s19  ;;  %1133 = vset.pattern.permute.xlu0 %v1152_v46  ;;  %1134 = vset.pattern.permute.xlu1 %v1152_v46  ;;  %vm692_vm11 = vcmask 1039360   ;;  %s413_s18 = scalar_lea.vmem %s1604_s12, %s1121_s19 }
   0xe   : > { %454 = vmatpush.msra.mxu0 %v1235_v1  ;;  %476 = vmatpush.msra.mxu1 %v1246_v3  ;;  %v1282_v9 = vld [vmem:[%s1601_s9 + $0xc8] sm:$0xff]  ;;  %v1287_v10 = vld [vmem:[%s1601_s9 + $0x50] sm:$0xff]  ;;  %v1294_v11 = vld [vmem:[%s1601_s9 + $0xc0] sm:$0xff] }
   0xf   : > { %v1299_v12 = vld [vmem:[%s1601_s9 + $0x48] sm:$0xff]  ;;  %v1306_v13 = vld [vmem:[%s1601_s9 + $0xb8] sm:$0xff]  ;;  %v1311_v14 = vld [vmem:[%s1601_s9 + $0x40] sm:$0xff]  ;;  %1135 = vset.pattern.permute.xlu2 %v1152_v46 }
  0x10   : > { %455 = vmatpush.msra.mxu0 %v1251_v4  ;;  %477 = vmatpush.msra.mxu1 %v1258_v5  ;;  %v1320_v15 = vld [vmem:[%s1601_s9 + $0xb0] sm:$0xff]  ;;  %v1325_v16 = vld [vmem:[%s1601_s9 + $0x38] sm:$0xff]  ;;  %v1332_v17 = vld [vmem:[%s1601_s9 + $0xa8] sm:$0xff] }
  0x11   : > { %v1337_v18 = vld [vmem:[%s1601_s9 + $0x30] sm:$0xff]  ;;  %v1348_v19 = vld [vmem:[%s1601_s9 + $0xa0] sm:$0xff]  ;;  %v1353_v20 = vld [vmem:[%s1601_s9 + $0x28] sm:$0xff] }
  0x12   : > { %456 = vmatpush.msra.mxu0 %v1263_v6  ;;  %478 = vmatpush.msra.mxu1 %v1270_v7  ;;  %v1360_v21 = vld [vmem:[%s1601_s9 + $0x98] sm:$0xff]  ;;  %v1365_v22 = vld [vmem:[%s1601_s9 + $0x20] sm:$0xff]  ;;  %v1373_v23 = vld [vmem:[%s1601_s9 + $0x90] sm:$0xff] }
  0x13   : > { %v1378_v24 = vld [vmem:[%s1601_s9 + $0x18] sm:$0xff]  ;;  %v1385_v25 = vld [vmem:[%s1601_s9 + $0x88] sm:$0xff]  ;;  %v1395_v26 = vld [vmem:[%s1601_s9 + $0x10] sm:$0xff] }
  0x14   : > { %457 = vmatpush.msra.mxu0 %v1275_v8  ;;  %479 = vmatpush.msra.mxu1 %v1282_v9  ;;  %v1402_v27 = vld [vmem:[%s1601_s9 + $0x80] sm:$0xff]  ;;  %v1407_v28 = vld [vmem:[%s1601_s9 + $0x8] sm:$0xff] }
  0x15   : > { %v415_v29 = vld [vmem:[%s408_s30 + $0x8] sm:$0xff]  ;;  %v1414_v30 = vld [vmem:[%s1601_s9] sm:$0xff] }
  0x16   : > { %458 = vmatpush.msra.mxu0 %v1287_v10  ;;  %480 = vmatpush.msra.mxu1 %v1294_v11  ;;  %v414_v31 = vld [vmem:[%s408_s30] sm:$0xff]  ;;  %v1428_v33 = vld [vmem:[%s1602_s10 + $0x8] sm:$0xff] }
  0x17   : > { %v1423_v32 = vld [vmem:[%s1602_s10] sm:$0xff]  ;;  %532 = vmatpush.msra.mxu3 %v1428_v33 }
  0x18   : > { %459 = vmatpush.msra.mxu0 %v1299_v12  ;;  %481 = vmatpush.msra.mxu1 %v1306_v13  ;;  %v673_v45 = vld [vmem:[%s1595_s3] sm:$0xff] }
  0x19   : > { %512 = vmatpush.msra.mxu2 %v1423_v32  ;;  %568 = vmatpush.msrb.mxu3 %v1241_v2  ;;  %v655_v63 = vld [vmem:[%s1593_s1] sm:$0x3] }
  0x1a   : > { %460 = vmatpush.msra.mxu0 %v1311_v14  ;;  %482 = vmatpush.msra.mxu1 %v1320_v15  ;;  %v658_v46 = vperm.slane %v655_v63, 1 }
  0x1b   : > { %546 = vmatpush.msrb.mxu2 %v1230_v0  ;;  %569 = vmatpush.msrb.mxu3 %v1246_v3 }
  0x1c   : > { %461 = vmatpush.msra.mxu0 %v1325_v16  ;;  %483 = vmatpush.msra.mxu1 %v1332_v17 }
  0x1d   : > { %547 = vmatpush.msrb.mxu2 %v1235_v1  ;;  %570 = vmatpush.msrb.mxu3 %v1258_v5 }
  0x1e   : > { %462 = vmatpush.msra.mxu0 %v1337_v18  ;;  %484 = vmatpush.msra.mxu1 %v1348_v19 }
  0x1f   : > { %548 = vmatpush.msrb.mxu2 %v1251_v4  ;;  %571 = vmatpush.msrb.mxu3 %v1270_v7 }
  0x20   : > { %463 = vmatpush.msra.mxu0 %v1353_v20  ;;  %485 = vmatpush.msra.mxu1 %v1360_v21 }
  0x21   : > { %549 = vmatpush.msrb.mxu2 %v1263_v6  ;;  %572 = vmatpush.msrb.mxu3 %v1282_v9 }
  0x22   : > { %464 = vmatpush.msra.mxu0 %v1365_v22  ;;  %486 = vmatpush.msra.mxu1 %v1373_v23 }
  0x23   : > { %550 = vmatpush.msrb.mxu2 %v1275_v8  ;;  %573 = vmatpush.msrb.mxu3 %v1294_v11 }
  0x24   : > { %465 = vmatpush.msra.mxu0 %v1378_v24  ;;  %487 = vmatpush.msra.mxu1 %v1385_v25 }
  0x25   : > { %551 = vmatpush.msrb.mxu2 %v1287_v10  ;;  %574 = vmatpush.msrb.mxu3 %v1306_v13 }
  0x26   : > { %466 = vmatpush.msra.mxu0 %v1395_v26  ;;  %488 = vmatpush.msra.mxu1 %v1402_v27 }
  0x27   : > { %1101 = vmatmul.msk.f32.vlgmr.msra.gmra.mxu1 %vm449_vm0, %v415_v29  ;;  %552 = vmatpush.msrb.mxu2 %v1299_v12 }
  0x28   : > { %467 = vmatpush.msra.mxu0 %v1407_v28  ;;  %604 = vmatpush.msrb.mxu1 %v1423_v32 }
  0x29   : > { %553 = vmatpush.msrb.mxu2 %v1311_v14  ;;  %575 = vmatpush.msrb.mxu3 %v1320_v15 }
  0x2a   : > { %468 = vmatpush.msra.mxu0 %v1414_v30  ;;  %676 = vperm.xlu0 %1133, %v673_v45  }
  0x2b   : > { %469 = vmatmul.f32.vlgmr.msra.gmra.mxu0 %v414_v31  ;;  %554 = vmatpush.msrb.mxu2 %v1325_v16 }
  0x2c   : > { %576 = vmatpush.msrb.mxu3 %v1332_v17 }
  0x2d   : > { %555 = vmatpush.msrb.mxu2 %v1337_v18 }
  0x2e   : > { %577 = vmatpush.msrb.mxu3 %v1348_v19 }
  0x2f   : > { %556 = vmatpush.msrb.mxu2 %v1353_v20 }
  0x30   : > { %578 = vmatpush.msrb.mxu3 %v1360_v21 }
  0x31   : > { %557 = vmatpush.msrb.mxu2 %v1365_v22 }
  0x32   : > { %579 = vmatpush.msrb.mxu3 %v1373_v23 }
  0x33   : > { %558 = vmatpush.msrb.mxu2 %v1378_v24 }
  0x34   : > { %580 = vmatpush.msrb.mxu3 %v1385_v25 }
  0x35   : > { %559 = vmatpush.msrb.mxu2 %v1395_v26 }
  0x36   : > { %581 = vmatpush.msrb.mxu3 %v1402_v27 }
  0x37   : > { %560 = vmatpush.msrb.mxu2 %v1407_v28 }
  0x39   : > { %561 = vmatpush.msrb.mxu2 %v1414_v30 }
  0x9c   : > { %v677_v45 = vpop.permute.xlu0 %676 }
  0xa4   : > { %v490_v34 = vpop.f32.mrf.mxu1 }
  0xa8   : > { %v470_v35 = vpop.f32.mrf.mxu0 }
  0xa9   : > { %v491_v36 = vadd.f32 %v490_v34, %v470_v35  ;;  %v663_v34 = vld [vmem:[%s1594_s2] sm:$0x3]  ;;  %v657_v35 = vperm.slane %v655_v63, 0 }
  0xab   : > { %1102 = vmatmul.msk.f32.vlgmr.msra.gmra.mxu2 %vm493_vm1, %v491_v36  ;;  %1103 = vmatmul.msk.f32.vlgmr.msra.gmra.mxu3 %vm493_vm1, %v491_v36 }
  0xac   : > { %624 = vmatpush.msra.mxu3 %v1428_v33 }
 0x12e   : > { %v514_v37 = vpop.f32.mrf.mxu2  ;;  %v534_v38 = vpop.f32.mrf.mxu3 }
 0x12f   : > { %v537_v39 = vmul.f32 0.033333335, %v514_v37  ;;  %v538_v40 = vmul.f32 0.033333335, %v534_v38 }
 0x131   : > { %v539_v41 = vsub.f32 %v414_v31, %v537_v39  ;;  %v540_v42 = vsub.f32 %v415_v29, %v538_v40  ;;  %v665_v39 = vperm.slane %v663_v34, 0 }
 0x133   : > { %v542_v43 = vmul.f32 %v540_v42, %v540_v42  ;;  %v541_v44 = vmul.f32 %v539_v41, %v539_v41 }
 0x135   : > { %562 = vmatmul.f32.vlgmr.msrb.gmra.mxu2 %v541_v44  ;;  %1104 = vmatmul.msk.f32.vlgmr.msrb.gmra.mxu3 %vm449_vm0, %v542_v43 }
 0x1b8   : > { %v563_v47 = vpop.f32.mrf.mxu2  ;;  %v583_v48 = vpop.f32.mrf.mxu3 }
 0x1b9   : > { %v584_v49 = vadd.f32 %v583_v48, %v563_v47 }
 0x1bb   : > { %1105 = vmatmul.msk.f32.vlgmr.msrb.gmra.mxu1 %vm493_vm1, %v584_v49  ;;  %1106 = vmatmul.msk.f32.vlgmr.msra.gmra.mxu3 %vm493_vm1, %v584_v49 }
 0x238   : > { %v606_v50 = vpop.f32.mrf.mxu1 }
 0x239   : > { %v629_v51 = vmul.f32 0.033333335, %v606_v50  ;;  %v666_v50 = vperm.slane %v663_v34, 1 }
 0x23b   : > { %v631_v52 = vadd.f32 1e-05, %v629_v51 }
 0x23d   : > { %1136 = vrsqrt.f32 %v631_v52  ;;  %vm639_vm3 = vweird.f32 %v631_v52 }
 0x23e   : > { %v626_v53 = vpop.f32.mrf.mxu3 }
 0x23f   : > { %v630_v54 = vmul.f32 0.033333335, %v626_v53 }
 0x241   : > { %v632_v55 = vadd.f32 1e-05, %v630_v54 }
 0x243   : > { %v1137_v56 = vpop.eup %1136  ;;  %1138 = vrsqrt.f32 %v632_v55  ;;  %vm649_vm6 = vweird.f32 %v632_v55 }
 0x244   : > { %v634_v57 = vmul.f32 %v1137_v56, %v631_v52  ;;  %vm640_vm2 = vweird.f32 %v1137_v56 }
 0x245   : > { %vm641_vm4 = vmor %vm639_vm3, %vm640_vm2 }
 0x246   : > { %v635_v58 = vmul.f32 %v1137_v56, %v634_v57  ;;  %v1107_v57 = vld [vmem:[%s1596_s4 + $0x8] sm:$0xff] }
 0x248   : > { %v636_v59 = vmul.f32 0.5, %v635_v58 }
 0x249   : > { %v1139_v60 = vpop.eup %1138 }
 0x24a   : > { %v637_v61 = vsub.f32 1.5, %v636_v59  ;;  %v644_v62 = vmul.f32 %v1139_v60, %v632_v55  ;;  %vm650_vm5 = vweird.f32 %v1139_v60 }
 0x24b   : > { %vm651_vm7 = vmor %vm649_vm6, %vm650_vm5 }
 0x24c   : > { %v638_v29 = vmul.f32 %v1137_v56, %v637_v61  ;;  %v645_v31 = vmul.f32 %v1139_v60, %v644_v62 }
 0x24e   : > { %v642_v36 = vsel %vm641_vm4, %v1137_v56, %v638_v29  ;;  %v646_v37 = vmul.f32 0.5, %v645_v31  ;;  %v784_v56 = vld [vmem:[%s1597_s5] sm:$0xff] }
 0x24f   : > { %v653_v38 = vmul.f32 %v642_v36, %v539_v41 }
 0x250   : > { %v647_v40 = vsub.f32 1.5, %v646_v37 }
 0x251   : > { %v661_v43 = vmul.f32 %v657_v35, %v653_v38 }
 0x252   : > { %v648_v44 = vmul.f32 %v1139_v60, %v647_v40 }
 0x253   : > { %v669_v47 = vadd.f32 %v665_v39, %v661_v43  ;;  %v1005_v43 = vld [vmem:[%s1598_s6] sm:$0x3] }
 0x254   : > { %v652_v48 = vsel %vm651_vm7, %v1139_v60, %v648_v44 }
 0x255   : > { %v654_v49 = vmul.f32 %v652_v48, %v540_v42  ;;  %v679_v51 = vmul.f32 %v677_v45, %v669_v47  ;;  %vm671_vm8 = vcmp.ge.f32.partialorder %v669_v47, 0.0  ;;  %v683_v42 = vld [vmem:[%s1596_s4] sm:$0xff] }
 0x257   : > { %v662_v52 = vmul.f32 %v658_v46, %v654_v49  ;;  %v681_v53 = vsel %vm671_vm8, %v669_v47, %v679_v51  ;;  %v1013_v46 = vld [vmem:[%s1599_s7] sm:$0x3]  ;;  %v1008_v47 = vperm.slane %v1005_v43, 1 }
 0x258   : > { %688 = vrot.lane.b32.xlu1 %v681_v53, %s1153_s16  ;;  %759 = vmatpush.msra.mxu1 %v681_v53 }
 0x259   : > { %v670_v41 = vadd.f32 %v666_v50, %v662_v52  ;;  %1111 = vmatmul.msk.f32.vlgmr.msra.gmra.mxu1 %vm493_vm1, %v683_v42  ;;  %v1016_v50 = vperm.slane %v1013_v46, 1 }
 0x25a   : > { %860 = vmatpush.msrb.mxu1 %v1423_v32 }
 0x25b   : > { %v680_v54 = vmul.f32 %v677_v45, %v670_v41  ;;  %vm672_vm9 = vcmp.ge.f32.partialorder %v670_v41, 0.0 }
 0x25c   : > { %896 = vmatpush.msra.mxu1 %v1230_v0 }
 0x25d   : > { %v682_v55 = vsel %vm672_vm9, %v670_v41, %v680_v54 }
 0x25e   : > { %690 = vrot.lane.b32.xlu0 %v682_v55, %s1153_s16  ;;  %779 = vmatpush.msrb.mxu3 %v682_v55  ;;  %v1007_v55 = vperm.slane %v1005_v43, 0 }
 0x25f   : > { %1112 = vmatmul.msk.f32.vlgmr.msrb.gmra.mxu3 %vm493_vm1, %v683_v42  ;;  %897 = vmatpush.msra.mxu1 %v1235_v1 }
 0x260   : > { %880 = vmatpush.msra.mxu3 %v1428_v33  ;;  %787 = vperm.xlu1 %1134, %v784_v56  }
 0x261   : > { %898 = vmatpush.msra.mxu1 %v1251_v4 }
 0x262   : > { %918 = vmatpush.msrb.mxu3 %v1241_v2 }
 0x263   : > { %899 = vmatpush.msra.mxu1 %v1263_v6 }
 0x264   : > { %919 = vmatpush.msrb.mxu3 %v1246_v3 }
 0x265   : > { %900 = vmatpush.msra.mxu1 %v1275_v8 }
 0x266   : > { %920 = vmatpush.msrb.mxu3 %v1258_v5 }
 0x267   : > { %901 = vmatpush.msra.mxu1 %v1287_v10 }
 0x268   : > { %921 = vmatpush.msrb.mxu3 %v1270_v7 }
 0x269   : > { %902 = vmatpush.msra.mxu1 %v1299_v12 }
 0x26a   : > { %922 = vmatpush.msrb.mxu3 %v1282_v9 }
 0x26b   : > { %903 = vmatpush.msra.mxu1 %v1311_v14 }
 0x26c   : > { %923 = vmatpush.msrb.mxu3 %v1294_v11 }
 0x26d   : > { %904 = vmatpush.msra.mxu1 %v1325_v16 }
 0x26e   : > { %924 = vmatpush.msrb.mxu3 %v1306_v13 }
 0x26f   : > { %905 = vmatpush.msra.mxu1 %v1337_v18 }
 0x270   : > { %925 = vmatpush.msrb.mxu3 %v1320_v15 }
 0x271   : > { %906 = vmatpush.msra.mxu1 %v1353_v20 }
 0x272   : > { %926 = vmatpush.msrb.mxu3 %v1332_v17 }
 0x273   : > { %907 = vmatpush.msra.mxu1 %v1365_v22 }
 0x274   : > { %927 = vmatpush.msrb.mxu3 %v1348_v19 }
 0x275   : > { %908 = vmatpush.msra.mxu1 %v1378_v24 }
 0x276   : > { %928 = vmatpush.msrb.mxu3 %v1360_v21 }
 0x277   : > { %909 = vmatpush.msra.mxu1 %v1395_v26 }
 0x278   : > { %929 = vmatpush.msrb.mxu3 %v1373_v23 }
 0x279   : > { %910 = vmatpush.msra.mxu1 %v1407_v28 }
 0x27a   : > { %930 = vmatpush.msrb.mxu3 %v1385_v25 }
 0x27b   : > { %911 = vmatpush.msra.mxu1 %v1414_v30 }
 0x27c   : > { %931 = vmatpush.msrb.mxu3 %v1402_v27 }
 0x2ca   : > { %v689_v58 = vpop.permute.xlu1 %688 }
 0x2d0   : > { %v691_v59 = vpop.permute.xlu0 %690 }
 0x2d1   : > { %1109 = vmatpush.msk.msra.mxu2 %vm696_vm10, %v691_v59  ;;  %v693_v60 = vsel %vm692_vm11, %v689_v58, %v691_v59 }
 0x2d2   : > { %716 = vmatpush.msrb.mxu0 %v693_v60  ;;  %1110 = vmatmul.msk.f32.vlgmr.msra.gmra.mxu2 %vm493_vm1, %v1107_v57 }
 0x2d3   : > { %1108 = vmatmul.msk.f32.vlgmr.msrb.gmra.mxu0 %vm493_vm1, %v1107_v57  ;;  %824 = vmatpush.msrb.mxu2 %v1241_v2  ;;  %v788_v2 = vpop.permute.xlu1 %787  ;;  %v1015_v57 = vperm.slane %v1013_v46, 0 }
 0x2d4   : > { %802 = vmatpush.msra.mxu0 %v1230_v0  ;;  %v448_v0 = vld [vmem:[%s1603_s11] sm:$0x3] }
 0x2d5   : > { %825 = vmatpush.msrb.mxu2 %v1246_v3 }
 0x2d6   : > { %803 = vmatpush.msra.mxu0 %v1235_v1  ;;  %v761_v1 = vpop.f32.mrf.mxu1 }
 0x2d7   : > { %826 = vmatpush.msrb.mxu2 %v1258_v5  ;;  %v1558_v5 = vperm.slane %v448_v0, 0 }
 0x2d8   : > { %804 = vmatpush.msra.mxu0 %v1251_v4 }
 0x2d9   : > { %827 = vmatpush.msrb.mxu2 %v1270_v7 }
 0x2da   : > { %805 = vmatpush.msra.mxu0 %v1263_v6 }
 0x2db   : > { %828 = vmatpush.msrb.mxu2 %v1282_v9 }
 0x2dc   : > { %806 = vmatpush.msra.mxu0 %v1275_v8 }
 0x2dd   : > { %829 = vmatpush.msrb.mxu2 %v1294_v11  ;;  %v1561_v11 = vperm.slane %v448_v0, 1 }
 0x2de   : > { %807 = vmatpush.msra.mxu0 %v1287_v10 }
 0x2df   : > { %830 = vmatpush.msrb.mxu2 %v1306_v13 }
 0x2e0   : > { %808 = vmatpush.msra.mxu0 %v1299_v12 }
 0x2e1   : > { %831 = vmatpush.msrb.mxu2 %v1320_v15 }
 0x2e2   : > { %809 = vmatpush.msra.mxu0 %v1311_v14  ;;  %v781_v6 = vpop.f32.mrf.mxu3 }
 0x2e3   : > { %832 = vmatpush.msrb.mxu2 %v1332_v17 }
 0x2e4   : > { %810 = vmatpush.msra.mxu0 %v1325_v16 }
 0x2e5   : > { %833 = vmatpush.msrb.mxu2 %v1348_v19 }
 0x2e6   : > { %811 = vmatpush.msra.mxu0 %v1337_v18 }
 0x2e7   : > { %834 = vmatpush.msrb.mxu2 %v1360_v21 }
 0x2e8   : > { %812 = vmatpush.msra.mxu0 %v1353_v20 }
 0x2e9   : > { %835 = vmatpush.msrb.mxu2 %v1373_v23 }
 0x2ea   : > { %813 = vmatpush.msra.mxu0 %v1365_v22 }
 0x2eb   : > { %836 = vmatpush.msrb.mxu2 %v1385_v25 }
 0x2ec   : > { %814 = vmatpush.msra.mxu0 %v1378_v24 }
 0x2ed   : > { %837 = vmatpush.msrb.mxu2 %v1402_v27  ;;  %v1023_v27 = vld [vmem:[%s1600_s8] sm:$0xff] }
 0x2ee   : > { %815 = vmatpush.msra.mxu0 %v1395_v26  ;;  %1026 = vperm.xlu2 %1135, %v1023_v27  }
 0x2ef   : > { %954 = vmatpush.msra.mxu2 %v1423_v32 }
 0x2f0   : > { %816 = vmatpush.msra.mxu0 %v1407_v28 }
 0x2f2   : > { %817 = vmatpush.msra.mxu0 %v1414_v30 }
 0x2f4   : > { %974 = vmatpush.msrb.mxu0 %v1428_v33 }
 0x348   : > { %v1027_v54 = vpop.permute.xlu2 %1026 }
 0x350   : > { %v718_v3 = vpop.f32.mrf.mxu0 }
 0x351   : > { %v762_v4 = vadd.f32 %v761_v1, %v718_v3 }
 0x353   : > { %v790_v7 = vadd.f32 %v788_v2, %v762_v4 }
 0x355   : > { %v738_v8 = vpop.f32.mrf.mxu2  ;;  %v797_v9 = vmul.f32 %v1558_v5, %v790_v7 }
 0x356   : > { %v782_v10 = vadd.f32 %v781_v6, %v738_v8 }
 0x357   : > { %818 = vmatmul.f32.vlgmr.msra.gmra.mxu0 %v797_v9 }
 0x358   : > { %v791_v12 = vadd.f32 %v788_v2, %v782_v10 }
 0x35a   : > { %v798_v13 = vmul.f32 %v1561_v11, %v791_v12 }
 0x35c   : > { %1113 = vmatmul.msk.f32.vlgmr.msrb.gmra.mxu2 %vm449_vm0, %v798_v13 }
 0x3d4   : > { %v819_v14 = vpop.f32.mrf.mxu0 }
 0x3df   : > { %v839_v15 = vpop.f32.mrf.mxu2 }
 0x3e0   : > { %v840_v16 = vadd.f32 %v839_v15, %v819_v14 }
 0x3e2   : > { %1114 = vmatmul.msk.f32.vlgmr.msrb.gmra.mxu1 %vm493_vm1, %v840_v16  ;;  %1115 = vmatmul.msk.f32.vlgmr.msra.gmra.mxu3 %vm493_vm1, %v840_v16 }
 0x45f   : > { %v862_v17 = vpop.f32.mrf.mxu1 }
 0x460   : > { %v885_v18 = vmul.f32 0.03448276, %v862_v17 }
 0x462   : > { %v887_v19 = vsub.f32 %v797_v9, %v885_v18 }
 0x464   : > { %v889_v20 = vmul.f32 %v887_v19, %v1558_v5 }
 0x465   : > { %v882_v21 = vpop.f32.mrf.mxu3 }
 0x466   : > { %v891_v22 = vmul.f32 %v889_v20, %v889_v20  ;;  %v886_v23 = vmul.f32 0.03448276, %v882_v21 }
 0x468   : > { %v888_v24 = vsub.f32 %v798_v13, %v886_v23  ;;  %912 = vmatmul.f32.vlgmr.msra.gmra.mxu1 %v891_v22 }
 0x46a   : > { %v890_v25 = vmul.f32 %v888_v24, %v1561_v11 }
 0x46c   : > { %v892_v26 = vmul.f32 %v890_v25, %v890_v25 }
 0x46e   : > { %1116 = vmatmul.msk.f32.vlgmr.msrb.gmra.mxu3 %vm449_vm0, %v892_v26 }
 0x4e5   : > { %v913_v28 = vpop.f32.mrf.mxu1 }
 0x4f1   : > { %v933_v30 = vpop.f32.mrf.mxu3 }
 0x4f2   : > { %v934_v32 = vadd.f32 %v933_v30, %v913_v28 }
 0x4f4   : > { %1117 = vmatmul.msk.f32.vlgmr.msra.gmra.mxu2 %vm493_vm1, %v934_v32  ;;  %1118 = vmatmul.msk.f32.vlgmr.msrb.gmra.mxu0 %vm493_vm1, %v934_v32 }
 0x571   : > { %v976_v33 = vpop.f32.mrf.mxu0 }
 0x572   : > { %v980_v61 = vmul.f32 0.03448276, %v976_v33 }
 0x574   : > { %v982_v62 = vadd.f32 1e-05, %v980_v61 }
 0x576   : > { %1140 = vrsqrt.f32 %v982_v62  ;;  %vm999_vm13 = vweird.f32 %v982_v62 }
 0x577   : > { %v956_v63 = vpop.f32.mrf.mxu2 }
 0x578   : > { %v979_v29 = vmul.f32 0.03448276, %v956_v63 }
 0x57a   : > { %v981_v31 = vadd.f32 1e-05, %v979_v29 }
 0x57c   : > { %v1141_v34 = vpop.eup %1140  ;;  %1142 = vrsqrt.f32 %v981_v31  ;;  %vm989_vm1 = vweird.f32 %v981_v31 }
 0x57d   : > { %v994_v35 = vmul.f32 %v1141_v34, %v982_v62  ;;  %vm1000_vm12 = vweird.f32 %v1141_v34 }
 0x57e   : > { %vm1001_vm14 = vmor %vm999_vm13, %vm1000_vm12 }
 0x57f   : > { %v995_v36 = vmul.f32 %v1141_v34, %v994_v35 }
 0x581   : > { %v996_v37 = vmul.f32 0.5, %v995_v36 }
 0x582   : > { %v1143_v38 = vpop.eup %1142 }
 0x583   : > { %v997_v39 = vsub.f32 1.5, %v996_v37  ;;  %v984_v40 = vmul.f32 %v1143_v38, %v981_v31  ;;  %vm990_vm15 = vweird.f32 %v1143_v38 }
 0x584   : > { %vm991_vm2 = vmor %vm989_vm1, %vm990_vm15 }
 0x585   : > { %v998_v44 = vmul.f32 %v1141_v34, %v997_v39  ;;  %v985_v45 = vmul.f32 %v1143_v38, %v984_v40 }
 0x587   : > { %v1002_v48 = vsel %vm1001_vm14, %v1141_v34, %v998_v44  ;;  %v986_v49 = vmul.f32 0.5, %v985_v45 }
 0x588   : > { %v1004_v51 = vmul.f32 %v1002_v48, %v890_v25 }
 0x589   : > { %v987_v52 = vsub.f32 1.5, %v986_v49 }
 0x58a   : > { %v1012_v53 = vmul.f32 %v1008_v47, %v1004_v51 }
 0x58b   : > { %v988_v41 = vmul.f32 %v1143_v38, %v987_v52 }
 0x58c   : > { %v1020_v42 = vadd.f32 %v1016_v50, %v1012_v53 }
 0x58d   : > { %v992_v56 = vsel %vm991_vm2, %v1143_v38, %v988_v41 }
 0x58e   : > { %v1003_v58 = vmul.f32 %v992_v56, %v889_v20  ;;  %vm1022_vm3 = vcmp.ge.f32.partialorder %v1020_v42, 0.0  ;;  %v1030_v59 = vmul.f32 %v1027_v54, %v1020_v42 }
 0x590   : > { %v1011_v60 = vmul.f32 %v1007_v55, %v1003_v58  ;;  %v1032_v0 = vsel %vm1022_vm3, %v1020_v42, %v1030_v59 }
 0x591   : > { %v1034_v1 = vmul.f32 %v1032_v0, %v1561_v11 }
 0x592   : > { %v1019_v2 = vadd.f32 %v1015_v57, %v1011_v60 }
 0x593   : > { %1036 = vst.msk [vmem:[%s413_s18 + $0x8] sm:$0xff] %vm449_vm0, %v1034_v1 }
 0x594   : > { %vm1021_vm4 = vcmp.ge.f32.partialorder %v1019_v2, 0.0  ;;  %v1029_v3 = vmul.f32 %v1027_v54, %v1019_v2 }
 0x596   : > { %v1031_v4 = vsel %vm1021_vm4, %v1019_v2, %v1029_v3 }
 0x597   : > { %v1033_v6 = vmul.f32 %v1031_v4, %v1558_v5 }
 0x599   : > { %1035 = vst [vmem:[%s413_s18] sm:$0xff] %v1033_v6 }
 0x59a PF: > { %s22_s21 = sadd.s32 1, %s1150_s21  }
 0x59b   : > { %p19_p4 = scmp.ge.s32.totalorder %s22_s21, 4  }
 0x59d   :  { %21 = sbr.rel (!%p19_p4) target bundleno = 1 (0x1), region = 99 }

// kernel: dense_decoder_2_forward.17
= control target key start
LH: loop header
LB: loop body
LE: loop exit
PB: predicated region body
PF: predicated region fallthrough
CT: control target
= control target key end

     0   :  { %s655_s17 = smov 0   ;;  %s727_s0 = inlined_call_operand.vmem [shape: f32[2,8,240], index: 0, kind: input, shape index: {}]   ;;  %s728_s1 = inlined_call_operand.vmem [shape: f32[5,1,8], index: 1, kind: input, shape index: {}]   ;;  %s729_s2 = inlined_call_operand.<no memory space> [shape: f32[1,1], index: 2, kind: input, shape index: {}]   ;;  %s730_s3 = inlined_call_operand.vmem [shape: f32[5,240], index: 3, kind: input, shape index: {}]   ;;  %s731_s4 = inlined_call_operand.vmem [shape: f32[2,1,240], index: 4, kind: output, shape index: {}]  }
   0x1   :  { %v9_v0 = vstv %s729_s2 }
   0x2   :  { %10 = vst [vmem:[#allocation2] sm:$0x1] %v9_v0 }
   0x3 LB: > { %s574_s18 = sadd.s32 4294967295, %s620_s17   ;;  %p578_p0 = scmp.ge.s32.totalorder %s620_s17, 1  ;;  %s620_s17 = sphi %s655_s17, %s16_s17  }
   0x4   : > { %p164_p1 = scmp.lt.s32.totalorder %s620_s17, 3 }
   0x6   : > { %p165_p2 = pnand %p578_p0, %p164_p1 }
   0x7   : > { %p189_p3 = scmp.lt.s32.totalorder (!%p165_p2), %s574_s18, 1  ;;  %s622_s22 = smov (!%p165_p2), 1  }
   0x8   : > { %168 = sbr.rel (%p165_p2) target bundleno = 296 (0x128), region = 36  ;;  %s623_s23 = smov (!%p165_p2), 2  }
   0x9   : > { %s624_s24 = smov (!%p165_p2), 127   ;;  %s625_s25 = smov (!%p165_p2), 126  }
   0xd   : > { %s733_s18 = smov (!%p189_p3, %s574_s18), 1  ;;  %v672_v4 = vld [vmem:[%s730_s3] sm:$0x1f]  ;;  %vm377_vm0 = vcmask 1039360   ;;  %vm224_vm1 = vcmask 7168   ;;  %vm209_vm2 = vcmask 15360  }
   0xe   : > { %s598_s2 = sshll.u32 %s733_s18, 4  ;;  %v229_v6 = vperm.slane %v672_v4, 1  ;;  %v493_v7 = vld [vmem:[#allocation2] sm:$0x1]  ;;  %v214_v8 = vperm.slane %v672_v4, 0  ;;  %v383_v9 = vperm.slane %v672_v4, 3 }
   0xf   : > { %s193_s21 = scalar_lea.vmem %s727_s0, %s598_s2  ;;  %v322_v10 = vperm.slane %v672_v4, 2  ;;  %v626_v11 = vmov 0   ;;  %vm233_vm3 = vcmask 64512   ;;  %v582_v19 = vld [vmem:[%s728_s1 + $0x1] sm:$0x1]  ;;  %vm381_vm4 = vcmask 908288  }
  0x10   : > { %v198_v1 = vld [vmem:[%s193_s21] sm:$0xff]  ;;  %v199_v2 = vld [vmem:[%s193_s21 + $0x8] sm:$0xff]  ;;  %612 = vset.pattern.permute.xlu2 %v626_v11  ;;  %613 = vset.pattern.permute.xlu0 %v626_v11  ;;  %vm438_vm5 = vcmask 1031168   ;;  %vm442_vm6 = vcmask 900096   ;;  %v444_v39 = vperm.slane %v672_v4, 4  ;;  %s581_s14 = sshll.u32 %s733_s18, 1 }
  0x11   : > { %220 = vrot.lane.b32.xlu1 %v198_v1, %s622_s22  ;;  %205 = vrot.lane.b32.xlu0 %v198_v1, %s623_s23  ;;  %v202_v20 = vld [vmem:[%s728_s1] sm:$0x1]  ;;  %v324_v22 = vmul.f32 %v322_v10, %v198_v1  ;;  %v689_v23 = vld [vmem:[%s730_s3 + $0x8] sm:$0x1f]  ;;  %vm513_vm7 = vcmask 1040384   ;;  %s197_s2 = scalar_lea.vmem %s731_s4, %s581_s14 }
  0x12   : > { %375 = vrot.lane.b32.xlu2 %v199_v2, %s624_s24  ;;  %v230_v24 = vperm.slane %v689_v23, 1  ;;  %v215_v25 = vperm.slane %v689_v23, 0  ;;  %v323_v26 = vperm.slane %v689_v23, 2  ;;  %v384_v27 = vperm.slane %v689_v23, 3  ;;  %v587_v36 = vld [vmem:[%s728_s1 + $0x2] sm:$0x1] }
  0x13   : > { %v590_v38 = vld [vmem:[%s728_s1 + $0x3] sm:$0x1]  ;;  %v445_v40 = vperm.slane %v689_v23, 4  ;;  %v593_v47 = vld [vmem:[%s728_s1 + $0x4] sm:$0x1] }
  0x14   : > { %v325_v35 = vmul.f32 %v323_v26, %v199_v2 }
  0x19   : > { %222 = vrot.lane.b32.xlu1 %v199_v2, %s622_s22  ;;  %207 = vrot.lane.b32.xlu0 %v199_v2, %s623_s23 }
  0x1a   : > { %373 = vrot.lane.b32.xlu2 %v198_v1, %s624_s24 }
  0x21   : > { %434 = vrot.lane.b32.xlu1 %v198_v1, %s625_s25  ;;  %436 = vrot.lane.b32.xlu0 %v199_v2, %s625_s25 }
  0x22   : > { %496 = vperm.xlu2 %612, %v493_v7   ;;  %v504_v7 = vrot.slane %v672_v4, 2 }
  0x6c   : > { %v376_v3 = vpop.permute.xlu2 %375 }
  0x6d   : > { %v382_v28 = vsel %vm381_vm4, %v376_v3, 0.0 }
  0x6e   : > { %v386_v37 = vmul.f32 %v384_v27, %v382_v28 }
  0x74   : > { %v374_v5 = vpop.permute.xlu2 %373 }
  0x75   : > { %v378_v12 = vsel %vm377_vm0, %v374_v5, %v376_v3  ;;  %v505_v5 = vrot.slane %v689_v23, 2 }
  0x76   : > { %v385_v21 = vmul.f32 %v383_v9, %v378_v12  ;;  %v516_v9 = vlaneseq }
  0x78   : > { %vm518_vm8 = vcmp.lt.s32.totalorder %v516_v9, 240 }
  0x7c   : > { %v497_v59 = vpop.permute.xlu2 %496 }
  0x7d   : > { %v499_v63 = vperm.slane %v497_v59, 0 }
  0x83   : > { %v221_v13 = vpop.permute.xlu1 %220  ;;  %v206_v14 = vpop.permute.xlu0 %205 }
  0x84   : > { %v228_v15 = vsel %vm224_vm1, 0.0, %v221_v13  ;;  %v213_v16 = vsel %vm209_vm2, 0.0, %v206_v14 }
  0x85   : > { %v231_v17 = vmul.f32 %v229_v6, %v228_v15  ;;  %v216_v18 = vmul.f32 %v214_v8, %v213_v16 }
  0x87   : > { %252 = vmatpush.msra.mxu0 %v231_v17  ;;  %295 = vmatpush.msra.mxu2 %v216_v18 }
  0x88   : > { %583 = vmatmul.msk.f32.vlgmr.msra.gmra.mxu0 %vm233_vm3, %v582_v19  ;;  %585 = vmatmul.msk.f32.vlgmr.msra.gmra.mxu2 %vm233_vm3, %v202_v20 }
  0x89   : > { %405 = vmatpush.msrb.mxu2 %v385_v21  ;;  %344 = vmatpush.msrb.mxu0 %v324_v22 }
  0x8b   : > { %v223_v29 = vpop.permute.xlu1 %222  ;;  %v208_v30 = vpop.permute.xlu0 %207 }
  0x8c   : > { %v225_v31 = vsel %vm224_vm1, %v221_v13, %v223_v29  ;;  %v210_v32 = vsel %vm209_vm2, %v206_v14, %v208_v30 }
  0x8d   : > { %v232_v33 = vmul.f32 %v230_v24, %v225_v31  ;;  %v217_v34 = vmul.f32 %v215_v25, %v210_v32 }
  0x8f   : > { %272 = vmatpush.msra.mxu1 %v232_v33  ;;  %315 = vmatpush.msra.mxu3 %v217_v34 }
  0x90   : > { %584 = vmatmul.msk.f32.vlgmr.msra.gmra.mxu1 %vm233_vm3, %v582_v19  ;;  %586 = vmatmul.msk.f32.vlgmr.msra.gmra.mxu3 %vm233_vm3, %v202_v20 }
  0x91   : > { %588 = vmatmul.msk.f32.vlgmr.msrb.gmra.mxu0 %vm233_vm3, %v587_v36  ;;  %364 = vmatpush.msrb.mxu1 %v325_v35 }
  0x92   : > { %591 = vmatmul.msk.f32.vlgmr.msrb.gmra.mxu2 %vm233_vm3, %v590_v38  ;;  %425 = vmatpush.msrb.mxu3 %v386_v37 }
  0x93   : > { %v435_v41 = vpop.permute.xlu1 %434  ;;  %v437_v42 = vpop.permute.xlu0 %436 }
  0x94   : > { %v439_v43 = vsel %vm438_vm5, %v435_v41, %v437_v42  ;;  %v443_v44 = vsel %vm442_vm6, %v437_v42, 0.0 }
  0x95   : > { %v446_v45 = vmul.f32 %v444_v39, %v439_v43  ;;  %v447_v46 = vmul.f32 %v445_v40, %v443_v44 }
  0x97   : > { %466 = vmatpush.msra.mxu0 %v446_v45  ;;  %486 = vmatpush.msra.mxu1 %v447_v46 }
  0x98   : > { %589 = vmatmul.msk.f32.vlgmr.msrb.gmra.mxu1 %vm233_vm3, %v587_v36  ;;  %592 = vmatmul.msk.f32.vlgmr.msrb.gmra.mxu3 %vm233_vm3, %v590_v38 }
  0x99   : > { %594 = vmatmul.msk.f32.vlgmr.msra.gmra.mxu0 %vm233_vm3, %v593_v47 }
  0xa0   : > { %595 = vmatmul.msk.f32.vlgmr.msra.gmra.mxu1 %vm233_vm3, %v593_v47 }
 0x105   : > { %v254_v48 = vpop.f32.mrf.mxu0 }
 0x10b   : > { %v297_v49 = vpop.f32.mrf.mxu2 }
 0x10c   : > { %v298_v52 = vadd.f32 %v297_v49, %v254_v48 }
 0x10d   : > { %v274_v50 = vpop.f32.mrf.mxu1 }
 0x10e   : > { %v346_v51 = vpop.f32.mrf.mxu0 }
 0x10f   : > { %v369_v54 = vadd.f32 %v346_v51, %v298_v52 }
 0x113   : > { %v317_v53 = vpop.f32.mrf.mxu3 }
 0x114   : > { %v318_v57 = vadd.f32 %v317_v53, %v274_v50 }
 0x115   : > { %v407_v55 = vpop.f32.mrf.mxu2  ;;  %v366_v56 = vpop.f32.mrf.mxu1 }
 0x116   : > { %v430_v58 = vadd.f32 %v407_v55, %v369_v54  ;;  %v468_v60 = vpop.f32.mrf.mxu0  ;;  %v370_v61 = vadd.f32 %v366_v56, %v318_v57 }
 0x118   : > { %v491_v0 = vadd.f32 %v468_v60, %v430_v58 }
 0x11a   : > { %v500_v6 = vadd.f32 %v499_v63, %v491_v0 }
 0x11b   : > { %v427_v62 = vpop.f32.mrf.mxu3 }
 0x11c   : > { %v431_v1 = vadd.f32 %v427_v62, %v370_v61  ;;  %v508_v11 = vmul.f32 %v504_v7, %v500_v6 }
 0x11d   : > { %v488_v2 = vpop.f32.mrf.mxu1 }
 0x11e   : > { %v492_v3 = vadd.f32 %v488_v2, %v431_v1 }
 0x120   : > { %v501_v8 = vadd.f32 %v499_v63, %v492_v3 }
 0x122   : > { %v509_v10 = vmul.f32 %v505_v5, %v501_v8 }
 0x124   : > { %v512_v12 = vrot.slane %v509_v10, 7 }
 0x126   : > { %v514_v13 = vsel %vm513_vm7, %v508_v11, %v512_v12 }
 0x127   : > { %520 = vst.msk [vmem:[%s197_s2] sm:$0x3] %vm518_vm8, %v514_v13 }
 0x128 PF: > { %s16_s17 = sadd.s32 1, %s620_s17  }
 0x129   : > { %p13_p4 = scmp.ge.s32.totalorder %s16_s17, 4  }
 0x12b   :  { %15 = sbr.rel (!%p13_p4) target bundleno = 3 (0x3), region = 70 }

</bundles_post_ra>
